<compile_context>
chip_gen: v5e
topology: v5e:2x2
jax: 0.10.0
libtpu: 0.0.40
codegen_flags: <defaults>
</compile_context>

<pallas_src>
import jax
import jax.numpy as jnp
from jax.experimental import pallas as pl
from jax.experimental.pallas import tpu as pltpu


def fused_mlp_kernel(x_ref, w_ref, b_ref, o_ref):
    """One grid step per layer: act = relu(act @ W[l] + b[l]).

    x_ref: (B, H) f32  — zero-padded input, resident (constant block index)
    w_ref: (1, H, H) bf16 — layer-l weight tile (auto double-buffered prefetch)
    b_ref: (1, 1, H) f32  — layer-l bias
    o_ref: (B, H) f32  — resident output block, doubles as the carried activation
    """
    l = pl.program_id(0)

    @pl.when(l == 0)
    def _():
        o_ref[...] = x_ref[...]  # seed the carried activation with the input

    a = o_ref[...].astype(jnp.bfloat16)          # bf16 is native MXU input
    y = jnp.dot(a, w_ref[0], preferred_element_type=jnp.float32)
    y = y + b_ref[0]                             # (1, H) broadcasts over batch
    o_ref[...] = jnp.maximum(y, 0.0)             # relu after every linear layer


def base_model_forward(x, w_stack, b_stack):
    """x: (B, dim) f32; w_stack: (L, H, H) bf16 (layer 0 zero-padded along K);
    b_stack: (L, 1, H) f32. Returns (B, H) f32."""
    B, dim = x.shape
    L, H, H2 = w_stack.shape
    assert H == H2 and dim <= H

    # Zero-pad the feature axis of x to H; the padded rows of W[0] are zero so
    # layer-0 results are bit-identical to the unpadded matmul.
    x_pad = jnp.zeros((B, H), jnp.float32).at[:, :dim].set(x.astype(jnp.float32))

    flops = 2 * B * H * H * L
    bytes_accessed = (w_stack.size * w_stack.dtype.itemsize
                      + b_stack.size * b_stack.dtype.itemsize
                      + x_pad.size * 4 + B * H * 4)

    return pl.pallas_call(
        fused_mlp_kernel,
        out_shape=jax.ShapeDtypeStruct((B, H), jnp.float32),
        grid=(L,),
        in_specs=[
            pl.BlockSpec((B, H), lambda l: (0, 0)),        # input, loaded once
            pl.BlockSpec((1, H, H), lambda l: (l, 0, 0)),  # layer-l weights
            pl.BlockSpec((1, 1, H), lambda l: (l, 0, 0)),  # layer-l bias
        ],
        out_specs=pl.BlockSpec((B, H), lambda l: (0, 0)),  # carried act / output
        compiler_params=pltpu.CompilerParams(
            dimension_semantics=("arbitrary",)),           # sequential layer carry
        cost_estimate=pl.CostEstimate(
            flops=flops, transcendentals=0, bytes_accessed=bytes_accessed),
    )(x_pad, w_stack, b_stack)


def init_params(key, dim, num_fc=4, hidden=1024):
    """Mirror BaseModel: fc1 = Linear(dim, 1024); fcs = (num_fc-1) x Linear(1024, 1024).

    PyTorch nn.Linear(in, out) has weight (out, in); we store the transpose
    (in, out), stacked as (num_fc, hidden, hidden) bf16 with layer 0's K axis
    zero-padded from `dim` up to `hidden`. Biases stacked as (num_fc, 1, hidden) f32.
    """
    w_stack = jnp.zeros((num_fc, hidden, hidden), jnp.bfloat16)
    b_stack = jnp.zeros((num_fc, 1, hidden), jnp.float32)
    in_dim = dim
    for i in range(num_fc):
        key, kw, kb = jax.random.split(key, 3)
        scale = 1.0 / jnp.sqrt(float(in_dim))
        w = jax.random.uniform(kw, (in_dim, hidden), jnp.float32, -scale, scale)
        b = jax.random.uniform(kb, (hidden,), jnp.float32, -scale, scale)
        w_stack = w_stack.at[i, :in_dim, :].set(w.astype(jnp.bfloat16))
        b_stack = b_stack.at[i, 0, :].set(b)
        in_dim = hidden
    return w_stack, b_stack


def reference_forward(x, w_stack, b_stack):
    """Pure-JAX reference with identical numerics (bf16 inputs, f32 accumulate)."""
    B, dim = x.shape
    L, H, _ = w_stack.shape
    a = jnp.zeros((B, H), jnp.float32).at[:, :dim].set(x)
    for i in range(L):
        y = jnp.dot(a.astype(jnp.bfloat16), w_stack[i],
                    preferred_element_type=jnp.float32) + b_stack[i]
        a = jnp.maximum(y, 0.0)
    return a


if __name__ == "__main__":
    key = jax.random.PRNGKey(0)
    batch, dim, num_fc, hidden = 8, 32, 4, 1024

    key, kx = jax.random.split(key)
    x = jax.random.normal(kx, (batch, dim), jnp.float32)
    w_stack, b_stack = init_params(key, dim, num_fc=num_fc, hidden=hidden)

    out = base_model_forward(x, w_stack, b_stack)
    out = jax.block_until_ready(out)

    ref = reference_forward(x, w_stack, b_stack)
    assert out.shape == (batch, hidden)
    assert jnp.allclose(out, ref, atol=1e-2, rtol=1e-2)

    print("KERNEL_OK")
</pallas_src>

<mosaic_0001>
module attributes {stable_mosaic.version = 11 : i64} {
  func.func @fused_mlp_kernel(%arg0: i32, %arg1: memref<8x1024xf32, #tpu.memory_space<vmem>>, %arg2: memref<1x1024x1024xbf16, #tpu.memory_space<vmem>>, %arg3: memref<1x1x1024xf32, #tpu.memory_space<vmem>>, %arg4: memref<8x1024xf32, #tpu.memory_space<vmem>>) attributes {dimension_semantics = [#tpu.dimension_semantics<arbitrary>], iteration_bounds = array<i64: 4>, scalar_prefetch = 0 : i64, scratch_operands = 0 : i64, tpu.core_type = #tpu.core_type<tc>, window_params = [{pipeline_mode = #tpu.pipeline_mode<synchronous>, transform_indices = @transform_0, window_bounds = array<i64: 8, 1024>}, {transform_indices = @transform_1, window_bounds = array<i64: 1, 1024, 1024>}, {transform_indices = @transform_2, window_bounds = array<i64: 1, 1, 1024>}, {pipeline_mode = #tpu.pipeline_mode<synchronous>, transform_indices = @transform_3, window_bounds = array<i64: 8, 1024>}]} {
    %c0_i32 = arith.constant 0 : i32
    %0 = arith.cmpi eq, %arg0, %c0_i32 : i32
    %1 = arith.extui %0 : i1 to i32
    %c0_i32_0 = arith.constant 0 : i32
    %2 = arith.cmpi ne, %1, %c0_i32_0 : i32
    scf.if %2 {
      %c0_11 = arith.constant 0 : index
      %c0_12 = arith.constant 0 : index
      %15 = vector.load %arg1[%c0_11, %c0_12] : memref<8x1024xf32, #tpu.memory_space<vmem>>, vector<8x1024xf32>
      %c0_13 = arith.constant 0 : index
      %c0_14 = arith.constant 0 : index
      %16 = vector.load %arg4[%c0_13, %c0_14] : memref<8x1024xf32, #tpu.memory_space<vmem>>, vector<8x1024xf32>
      tpu.vector_store %arg4[%c0_13, %c0_14], %15 {strides = array<i32>} : memref<8x1024xf32, #tpu.memory_space<vmem>>, vector<8x1024xf32>,
    } else {
    }
    %c0 = arith.constant 0 : index
    %c0_1 = arith.constant 0 : index
    %3 = vector.load %arg4[%c0, %c0_1] : memref<8x1024xf32, #tpu.memory_space<vmem>>, vector<8x1024xf32>
    %4 = arith.truncf %3 : vector<8x1024xf32> to vector<8x1024xbf16>
    %c0_2 = arith.constant 0 : index
    %c0_3 = arith.constant 0 : index
    %c0_4 = arith.constant 0 : index
    %5 = vector.load %arg2[%c0_2, %c0_3, %c0_4] : memref<1x1024x1024xbf16, #tpu.memory_space<vmem>>, vector<1x1024x1024xbf16>
    %6 = vector.shape_cast %5 : vector<1x1024x1024xbf16> to vector<1024x1024xbf16>
    %cst = arith.constant dense<0.000000e+00> : vector<8x1024xf32>
    %7 = tpu.matmul %4, %6, %cst {dimension_numbers = #tpu.dot_dimension_numbers<[1], [0], [0], [1], [0, 0, 1, 1], [], []>} : vector<8x1024xbf16>, vector<1024x1024xbf16>, vector<8x1024xf32> -> vector<8x1024xf32>
    %c0_5 = arith.constant 0 : index
    %c0_6 = arith.constant 0 : index
    %c0_7 = arith.constant 0 : index
    %8 = vector.load %arg3[%c0_5, %c0_6, %c0_7] : memref<1x1x1024xf32, #tpu.memory_space<vmem>>, vector<1x1x1024xf32>
    %9 = vector.shape_cast %8 : vector<1x1x1024xf32> to vector<1x1024xf32>
    %10 = vector.broadcast %9 : vector<1x1024xf32> to vector<8x1024xf32>
    %11 = arith.addf %7, %10 : vector<8x1024xf32>
    %cst_8 = arith.constant 0.000000e+00 : f32
    %12 = vector.broadcast %cst_8 : f32 to vector<8x1024xf32>
    %13 = arith.maximumf %11, %12 : vector<8x1024xf32>
    %c0_9 = arith.constant 0 : index
    %c0_10 = arith.constant 0 : index
    %14 = vector.load %arg4[%c0_9, %c0_10] : memref<8x1024xf32, #tpu.memory_space<vmem>>, vector<8x1024xf32>
    tpu.vector_store %arg4[%c0_9, %c0_10], %13 {strides = array<i32>} : memref<8x1024xf32, #tpu.memory_space<vmem>>, vector<8x1024xf32>,
    return
  }
  func.func @transform_0(%arg0: i32) -> (i32, i32) {
    %c0_i32 = arith.constant 0 : i32
    %c0_i32_0 = arith.constant 0 : i32
    %c0_i32_1 = arith.constant 0 : i32
    return %c0_i32, %c0_i32_0 : i32, i32
  }
  func.func @transform_1(%arg0: i32) -> (i32, i32, i32) {
    %c0_i32 = arith.constant 0 : i32
    %c0_i32_0 = arith.constant 0 : i32
    %c0_i32_1 = arith.constant 0 : i32
    return %arg0, %c0_i32, %c0_i32_0 : i32, i32, i32
  }
  func.func @transform_2(%arg0: i32) -> (i32, i32, i32) {
    %c0_i32 = arith.constant 0 : i32
    %c0_i32_0 = arith.constant 0 : i32
    %c0_i32_1 = arith.constant 0 : i32
    return %arg0, %c0_i32, %c0_i32_0 : i32, i32, i32
  }
  func.func @transform_3(%arg0: i32) -> (i32, i32) {
    %c0_i32 = arith.constant 0 : i32
    %c0_i32_0 = arith.constant 0 : i32
    %c0_i32_1 = arith.constant 0 : i32
    return %c0_i32, %c0_i32_0 : i32, i32
  }
}

</mosaic_0001>

<bundles_post_ra>
// kernel: tpu_custom_call.1
= control target key start
LH: loop header
LB: loop body
LE: loop exit
PB: predicated region body
PF: predicated region fallthrough
CT: control target
= control target key end

     0   :  { %8 = vsyncpa [#allocation3], 0  ;;  %s8449_s0 = inlined_call_operand.hbm [shape: f32[8,1024], index: 0, kind: input, shape index: {}]   ;;  %s8450_s1 = inlined_call_operand.hbm [shape: bf16[4,1024,1024], index: 1, kind: input, shape index: {}]   ;;  %s8451_s2 = inlined_call_operand.hbm [shape: f32[4,1,1024], index: 2, kind: input, shape index: {}]   ;;  %s8452_s3 = inlined_call_operand.hbm [shape: f32[8,1024], index: 3, kind: output, shape index: {}]  }
   0x1   :  { %9 = vsyncpa [#allocation6], 0 }
   0x2   :  { %11 = vsyncpa [#allocation6 + $0x1], 0 }
   0x3   :  { %12 = vsyncpa [#allocation4], 0  ;;  %s7126_s12 = smov 0   ;;  %s7128_s13 = smov 0  }
   0x4   :  { %s7130_s14 = smov 0   ;;  %s7132_s15 = smov 0  }
   0x5 LB: > { %s7147_s16 = sadd.s32 1, %s7100_s15   ;;  %s46_s17 = sadd.s32 1, %s7096_s14  ;;  %s7100_s15 = sphi %s7132_s15, %s8459_s15   ;;  %s7096_s14 = sphi %s7130_s14, %s8458_s14   ;;  %s7092_s13 = sphi %s7128_s13, %s8457_s13   ;;  %s7088_s12 = sphi %s7126_s12, %s8456_s12  }
   0x6   : > { %s43_s18 = ssub.s32 %s7100_s15, %s7147_s16  ;;  %p53_p0 = scmp.ne.s32.totalorder %s7096_s14, %s7092_s13 }
   0x7   : > { %p44_p1 = scmp.eq.s32.totalorder %s43_s18, 0  ;;  %p54_p2 = scmp.eq.s32.totalorder %s7100_s15, 0 }
   0x8   : > { %p6898_p3 = scmp.lt.s32.totalorder %s7100_s15, 4  ;;  %s142_s20 = sand.u32 1, %s7100_s15  }
   0x9   : > { %s7157_s19 = scalar_select %p44_p1, %s7096_s14, %s46_s17  }
   0xa   : > { %p55_p4 = por %p54_p2, %p53_p0  ;;  %s144_s21 = sand.u32 1, %s7096_s14  }
   0xb   : > { %s4299_s22 = sshll.u32 %s144_s21, 12  ;;  %s6361_s23 = sshll.u32 %s7100_s15, 12 }
   0xc   : > { %s151_s26 = scalar_lea.hbm %s8450_s1, %s6361_s23  ;;  %s146_s28 = scalar_lea.vmem [#allocation5], %s4299_s22 }
   0xd   : > { %s152_s27 = sshll.u32 %s151_s26, 4  ;;  %s154_s29 = sshll.u32 %s146_s28, 4  ;;  %s153_s27 = int_to_ptr.hbm [resolvable:$true] %s152_s27  ;;  %s155_s29 = int_to_ptr.vmem [resolvable:$true] %s154_s29 }
   0xe   : > { %p7169_p5 = pnand %p6898_p3, %p55_p4  ;;  %s7173_s4 = scalar_lea.sflag [#allocation6], %s142_s20 }
   0xf   : > { %s6940_s5 = sshra.s32 %s153_s27, 4  ;;  %s6947_s9 = scalar_lea.hbm %s8450_s1, 16384  ;;  %s6941_s5 = int_to_ptr.hbm [resolvable:$true] %s6940_s5 }
  0x10   : > { %s6942_s6 = scalar_lea.hbm %s6941_s5, 4096  ;;  %p6944_p7 = pneg %p7169_p5 }
  0x11   : > { %p6943_p6 = scmp.ne.s32.totalorder %s6941_s5, %s6942_s6  ;;  %p6948_p10 = scmp.lt.s32.totalorder %s6941_s5, %s8450_s1 }
  0x12   : > { %p6949_p11 = scmp.lt.s32.totalorder %s6947_s9, %s6942_s6 }
  0x13   : > { %p6945_p8 = pnand %p6944_p7, %p6943_p6 }
  0x14   : > { %p6950_p12 = por %p6949_p11, %p6948_p10 }
  0x15   : > { %p6946_p9 = pneg %p6945_p8 }
  0x17   : > { %p6951_p13 = pnand %p6950_p12, %p6946_p9 }
  0x19   : > { %6954 = shalt.err (!%p6951_p13)
}
  0x1a   : > { %s7102_s17 = smov 512   ;;  %s7103_s18 = smov 32  }
  0x1b   : > { %6893 = dma.hbm_to_vmem [thread:$0]  (!%p7169_p5), %s153_s27, 65536, %s155_s29, %s7173_s4, %s7102_s17, %s7102_s17, %s7103_s18  }
  0x1c   : > { %s7190_s20 = sadd.s32 4294967295, %s7100_s15   ;;  %p59_p0 = scmp.ne.s32.totalorder %s7092_s13, %s7088_s12 }
  0x1d   : > { %p60_p1 = scmp.eq.s32.totalorder %s7190_s20, 0  ;;  %p4296_p2 = scmp.ge.s32.totalorder %s7100_s15, 1 }
  0x1e   : > { %p117_p3 = scmp.lt.s32.totalorder %s7100_s15, 5  ;;  %p4297_p4 = scmp.ne.s32.totalorder %s7190_s20, 0 }
  0x1f   : > { %p7200_p6 = por %p60_p1, %p59_p0  ;;  %s129_s25 = sshll.u32 %s8449_s0, 4  ;;  %s130_s25 = int_to_ptr.hbm [resolvable:$true] %s129_s25 }
  0x20   : > { %p7207_p8 = pnand %p4296_p2, %p117_p3  ;;  %s4302_s12 = sshll.u32 %s144_s21, 3 }
  0x21   : > { %s7104_s27 = smov [#allocation2]   ;;  %s4303_s29 = sshll.u32 %s7100_s15, 3 }
  0x22   : > { %p6886_p9 = pneg %p7207_p8  ;;  %s131_s28 = sshll.u32 %s7104_s27, 4  ;;  %s132_s28 = int_to_ptr.vmem [resolvable:$true] %s131_s28 }
  0x23   : > { %s172_s7 = scalar_lea.hbm %s8451_s2, %s4303_s29  ;;  %s168_s8 = scalar_lea.vmem [#allocation7], %s4302_s12 }
  0x24   : > { %p6887_p10 = pnand %p6886_p9, %p60_p1  ;;  %s176_s9 = sshll.u32 %s168_s8, 4  ;;  %s177_s9 = int_to_ptr.vmem [resolvable:$true] %s176_s9 }
  0x25   : > { %s174_s10 = sshll.u32 %s172_s7, 4  ;;  %s7007_s18 = scalar_lea.hbm %s8451_s2, 32  ;;  %s175_s10 = int_to_ptr.hbm [resolvable:$true] %s174_s10 }
  0x26   : > { %6889 = dma.hbm_to_vmem [thread:$0]  (!%p6887_p10), %s130_s25, 1024, %s132_s28, [#allocation3]  }
  0x27   : > { %s7000_s21 = sshra.s32 %s175_s10, 4  ;;  %s7001_s21 = int_to_ptr.hbm [resolvable:$true] %s7000_s21 }
  0x28   : > { %s7002_s11 = scalar_lea.hbm %s7001_s21, 8  ;;  %p7008_p0 = scmp.lt.s32.totalorder %s7001_s21, %s8451_s2 }
  0x29   : > { %p7003_p11 = scmp.ne.s32.totalorder %s7001_s21, %s7002_s11  ;;  %p7009_p2 = scmp.lt.s32.totalorder %s7007_s18, %s7002_s11 }
  0x2b   : > { %p7005_p12 = pnand %p7003_p11, %p6944_p7  ;;  %p7010_p3 = por %p7009_p2, %p7008_p0 }
  0x2d   : > { %p7006_p13 = pneg %p7005_p12 }
  0x2f   : > { %p7011_p9 = pnand %p7010_p3, %p7006_p13 }
  0x31   : > { %7014 = shalt.err (!%p7011_p9)
}
  0x32   : > { %6896 = dma.hbm_to_vmem [thread:$0]  (!%p7169_p5), %s175_s10, 128, %s177_s9, %s7173_s4  }
  0x33   : > { %185 = sbr.rel (%p7207_p8) target bundleno = 1003 (0x3eb), region = 32 }
  0x38   : > { %7075 = dma.done.wait (%p60_p1), [#allocation3], 1024  }
  0x39   : > { %7077 = vsyncadd (%p60_p1), [#allocation3], 4294966272  ;;  %s192_s25 = sand.u32 1, %s7190_s20   ;;  %s194_s12 = sand.u32 1, %s7092_s13  }
  0x3a   : > { %s4306_s27 = sshll.u32 %s194_s12, 12  ;;  %s193_s28 = scalar_lea.sflag [#allocation6], %s192_s25 }
  0x3b   : > { %s7241_s29 = scalar_lea.vmem [#allocation5], %s4306_s27 }
  0x3c   : > { %7079 = dma.done.wait (%p7200_p6), %s193_s28, 65664  }
  0x3d   : > { %7081 = vsyncadd (%p7200_p6), %s193_s28, 4294901632  ;;  %s4307_s30 = sshll.u32 %s194_s12, 3  ;;  %233 = sbr.rel (%p4297_p4) target bundleno = 75 (0x4b), region = 48 }
  0x3e   : > { %s7247_s4 = scalar_lea.vmem [#allocation7], %s4307_s30 }
  0x42   : > { %v234_v0 = vld [vmem:[#allocation2] sm:$0xff]  ;;  %v235_v1 = vld [vmem:[#allocation2 + $0x8] sm:$0xff]  ;;  %v236_v2 = vld [vmem:[#allocation2 + $0x10] sm:$0xff] }
  0x43   : > { %242 = vst [vmem:[#allocation8] sm:$0xff] %v234_v0  ;;  %v237_v3 = vld [vmem:[#allocation2 + $0x18] sm:$0xff]  ;;  %v238_v4 = vld [vmem:[#allocation2 + $0x20] sm:$0xff]  ;;  %v239_v5 = vld [vmem:[#allocation2 + $0x28] sm:$0xff] }
  0x44   : > { %243 = vst [vmem:[#allocation8 + $0x8] sm:$0xff] %v235_v1  ;;  %v240_v6 = vld [vmem:[#allocation2 + $0x30] sm:$0xff]  ;;  %v241_v7 = vld [vmem:[#allocation2 + $0x38] sm:$0xff] }
  0x45   : > { %244 = vst [vmem:[#allocation8 + $0x10] sm:$0xff] %v236_v2 }
  0x46   : > { %245 = vst [vmem:[#allocation8 + $0x18] sm:$0xff] %v237_v3 }
  0x47   : > { %246 = vst [vmem:[#allocation8 + $0x20] sm:$0xff] %v238_v4 }
  0x48   : > { %247 = vst [vmem:[#allocation8 + $0x28] sm:$0xff] %v239_v5 }
  0x49   : > { %248 = vst [vmem:[#allocation8 + $0x30] sm:$0xff] %v240_v6 }
  0x4a   : > { %249 = vst [vmem:[#allocation8 + $0x38] sm:$0xff] %v241_v7 }
  0x4b PF: > { %v4535_v8 = vld [vmem:[%s7241_s29 + $0x1c0] sm:$0xf]  ;;  %s7105_s22 = smov [#allocation8]   ;;  %s4212_s7 = sshll.u32 %s8452_s3, 4  ;;  %s4213_s7 = int_to_ptr.hbm [resolvable:$true] %s4212_s7 }
  0x4c   : > { %v6422_v9 = vld [vmem:[%s7241_s29 + $0x1dc] sm:$0xf0]  ;;  %s4210_s26 = sshll.u32 %s7105_s22, 4  ;;  %p6900_p5 = scmp.eq.s32.totalorder %s7190_s20, 3  ;;  %s4211_s26 = int_to_ptr.vmem [resolvable:$true] %s4210_s26 }
  0x4d   : > { %v4791_v10 = vld [vmem:[%s7241_s29 + $0x3c0] sm:$0xf]  ;;  %v4536_v11 = vor.u32 %v6422_v9, %v4535_v8 }
  0x4e   : > { %v6486_v12 = vld [vmem:[%s7241_s29 + $0x3dc] sm:$0xf0] }
  0x4f   : > { %v5047_v13 = vld [vmem:[%s7241_s29 + $0x5c0] sm:$0xf]  ;;  %v4792_v15 = vor.u32 %v6486_v12, %v4791_v10  ;;  %3356 = vmatpush.bf16.msra.mxu0 %v4536_v11 }
  0x50   : > { %v6550_v14 = vld [vmem:[%s7241_s29 + $0x5dc] sm:$0xf0] }
  0x51   : > { %v5048_v16 = vor.u32 %v6550_v14, %v5047_v13  ;;  %v5303_v17 = vld [vmem:[%s7241_s29 + $0x7c0] sm:$0xf]  ;;  %3369 = vmatpush.bf16.msra.mxu1 %v4792_v15 }
  0x52   : > { %v6614_v18 = vld [vmem:[%s7241_s29 + $0x7dc] sm:$0xf0] }
  0x53   : > { %v4503_v19 = vld [vmem:[%s7241_s29 + $0x180] sm:$0xf]  ;;  %v5304_v20 = vor.u32 %v6614_v18, %v5303_v17  ;;  %3382 = vmatpush.bf16.msra.mxu2 %v5048_v16 }
  0x54   : > { %v6414_v21 = vld [vmem:[%s7241_s29 + $0x19c] sm:$0xf0] }
  0x55   : > { %v4759_v22 = vld [vmem:[%s7241_s29 + $0x380] sm:$0xf]  ;;  %v4504_v24 = vor.u32 %v6414_v21, %v4503_v19  ;;  %3395 = vmatpush.bf16.msra.mxu3 %v5304_v20 }
  0x56   : > { %v6478_v23 = vld [vmem:[%s7241_s29 + $0x39c] sm:$0xf0] }
  0x57   : > { %v4760_v25 = vor.u32 %v6478_v23, %v4759_v22  ;;  %v5015_v26 = vld [vmem:[%s7241_s29 + $0x580] sm:$0xf]  ;;  %3357 = vmatpush.bf16.msra.mxu0 %v4504_v24 }
  0x58   : > { %v6542_v27 = vld [vmem:[%s7241_s29 + $0x59c] sm:$0xf0] }
  0x59   : > { %v5271_v28 = vld [vmem:[%s7241_s29 + $0x780] sm:$0xf]  ;;  %v5016_v29 = vor.u32 %v6542_v27, %v5015_v26  ;;  %3370 = vmatpush.bf16.msra.mxu1 %v4760_v25 }
  0x5a   : > { %v6606_v30 = vld [vmem:[%s7241_s29 + $0x79c] sm:$0xf0] }
  0x5b   : > { %v4471_v31 = vld [vmem:[%s7241_s29 + $0x140] sm:$0xf]  ;;  %v5272_v33 = vor.u32 %v6606_v30, %v5271_v28  ;;  %3383 = vmatpush.bf16.msra.mxu2 %v5016_v29 }
  0x5c   : > { %v6406_v32 = vld [vmem:[%s7241_s29 + $0x15c] sm:$0xf0] }
  0x5d   : > { %v4727_v34 = vld [vmem:[%s7241_s29 + $0x340] sm:$0xf]  ;;  %v4472_v37 = vor.u32 %v6406_v32, %v4471_v31  ;;  %3396 = vmatpush.bf16.msra.mxu3 %v5272_v33 }
  0x5e   : > { %v6470_v35 = vld [vmem:[%s7241_s29 + $0x35c] sm:$0xf0] }
  0x5f   : > { %v4983_v36 = vld [vmem:[%s7241_s29 + $0x540] sm:$0xf]  ;;  %v4728_v41 = vor.u32 %v6470_v35, %v4727_v34  ;;  %3358 = vmatpush.bf16.msra.mxu0 %v4472_v37 }
  0x60   : > { %v6534_v38 = vld [vmem:[%s7241_s29 + $0x55c] sm:$0xf0] }
  0x61   : > { %v5239_v39 = vld [vmem:[%s7241_s29 + $0x740] sm:$0xf]  ;;  %v4984_v42 = vor.u32 %v6534_v38, %v4983_v36  ;;  %3371 = vmatpush.bf16.msra.mxu1 %v4728_v41 }
  0x62   : > { %v6598_v40 = vld [vmem:[%s7241_s29 + $0x75c] sm:$0xf0] }
  0x63   : > { %v4439_v43 = vld [vmem:[%s7241_s29 + $0x100] sm:$0xf]  ;;  %v5240_v46 = vor.u32 %v6598_v40, %v5239_v39  ;;  %3384 = vmatpush.bf16.msra.mxu2 %v4984_v42 }
  0x64   : > { %v6398_v44 = vld [vmem:[%s7241_s29 + $0x11c] sm:$0xf0] }
  0x65   : > { %v4695_v45 = vld [vmem:[%s7241_s29 + $0x300] sm:$0xf]  ;;  %v4440_v52 = vor.u32 %v6398_v44, %v4439_v43  ;;  %3397 = vmatpush.bf16.msra.mxu3 %v5240_v46 }
  0x66   : > { %v6462_v47 = vld [vmem:[%s7241_s29 + $0x31c] sm:$0xf0] }
  0x67   : > { %v4951_v48 = vld [vmem:[%s7241_s29 + $0x500] sm:$0xf]  ;;  %v4696_v53 = vor.u32 %v6462_v47, %v4695_v45  ;;  %3359 = vmatpush.bf16.msra.mxu0 %v4440_v52 }
  0x68   : > { %v6526_v49 = vld [vmem:[%s7241_s29 + $0x51c] sm:$0xf0] }
  0x69   : > { %v5207_v50 = vld [vmem:[%s7241_s29 + $0x700] sm:$0xf]  ;;  %v4952_v54 = vor.u32 %v6526_v49, %v4951_v48  ;;  %3372 = vmatpush.bf16.msra.mxu1 %v4696_v53 }
  0x6a   : > { %v6590_v51 = vld [vmem:[%s7241_s29 + $0x71c] sm:$0xf0] }
  0x6b   : > { %v4407_v55 = vld [vmem:[%s7241_s29 + $0xc0] sm:$0xf]  ;;  %v5208_v58 = vor.u32 %v6590_v51, %v5207_v50  ;;  %3385 = vmatpush.bf16.msra.mxu2 %v4952_v54 }
  0x6c   : > { %v6390_v56 = vld [vmem:[%s7241_s29 + $0xdc] sm:$0xf0] }
  0x6d   : > { %v4663_v57 = vld [vmem:[%s7241_s29 + $0x2c0] sm:$0xf]  ;;  %v4408_v0 = vor.u32 %v6390_v56, %v4407_v55  ;;  %3398 = vmatpush.bf16.msra.mxu3 %v5208_v58 }
  0x6e   : > { %v6454_v59 = vld [vmem:[%s7241_s29 + $0x2dc] sm:$0xf0] }
  0x6f   : > { %v4919_v60 = vld [vmem:[%s7241_s29 + $0x4c0] sm:$0xf]  ;;  %v4664_v1 = vor.u32 %v6454_v59, %v4663_v57  ;;  %3360 = vmatpush.bf16.msra.mxu0 %v4408_v0 }
  0x70   : > { %v6518_v61 = vld [vmem:[%s7241_s29 + $0x4dc] sm:$0xf0] }
  0x71   : > { %v5175_v62 = vld [vmem:[%s7241_s29 + $0x6c0] sm:$0xf]  ;;  %v4920_v2 = vor.u32 %v6518_v61, %v4919_v60  ;;  %3373 = vmatpush.bf16.msra.mxu1 %v4664_v1 }
  0x72   : > { %v6582_v63 = vld [vmem:[%s7241_s29 + $0x6dc] sm:$0xf0] }
  0x73   : > { %v4375_v3 = vld [vmem:[%s7241_s29 + $0x80] sm:$0xf]  ;;  %v5176_v6 = vor.u32 %v6582_v63, %v5175_v62  ;;  %3386 = vmatpush.bf16.msra.mxu2 %v4920_v2 }
  0x74   : > { %v6382_v4 = vld [vmem:[%s7241_s29 + $0x9c] sm:$0xf0] }
  0x75   : > { %v4631_v5 = vld [vmem:[%s7241_s29 + $0x280] sm:$0xf]  ;;  %v4376_v12 = vor.u32 %v6382_v4, %v4375_v3  ;;  %3399 = vmatpush.bf16.msra.mxu3 %v5176_v6 }
  0x76   : > { %v6446_v7 = vld [vmem:[%s7241_s29 + $0x29c] sm:$0xf0] }
  0x77   : > { %v4887_v8 = vld [vmem:[%s7241_s29 + $0x480] sm:$0xf]  ;;  %v4632_v13 = vor.u32 %v6446_v7, %v4631_v5  ;;  %3361 = vmatpush.bf16.msra.mxu0 %v4376_v12 }
  0x78   : > { %v6510_v9 = vld [vmem:[%s7241_s29 + $0x49c] sm:$0xf0] }
  0x79   : > { %v5143_v10 = vld [vmem:[%s7241_s29 + $0x680] sm:$0xf]  ;;  %v4888_v14 = vor.u32 %v6510_v9, %v4887_v8  ;;  %3374 = vmatpush.bf16.msra.mxu1 %v4632_v13  ;;  %v250_v13 = vld [vmem:[#allocation8] sm:$0xff] }
  0x7a   : > { %v6574_v11 = vld [vmem:[%s7241_s29 + $0x69c] sm:$0xf0] }
  0x7b   : > { %v4343_v15 = vld [vmem:[%s7241_s29 + $0x40] sm:$0xf]  ;;  %v5144_v18 = vor.u32 %v6574_v11, %v5143_v10  ;;  %3387 = vmatpush.bf16.msra.mxu2 %v4888_v14 }
  0x7c   : > { %v6374_v16 = vld [vmem:[%s7241_s29 + $0x5c] sm:$0xf0] }
  0x7d   : > { %v4599_v17 = vld [vmem:[%s7241_s29 + $0x240] sm:$0xf]  ;;  %v4344_v24 = vor.u32 %v6374_v16, %v4343_v15  ;;  %3400 = vmatpush.bf16.msra.mxu3 %v5144_v18  ;;  %v253_v18 = vld [vmem:[#allocation8 + $0x18] sm:$0xff] }
  0x7e   : > { %v6438_v19 = vld [vmem:[%s7241_s29 + $0x25c] sm:$0xf0] }
  0x7f   : > { %v4855_v20 = vld [vmem:[%s7241_s29 + $0x440] sm:$0xf]  ;;  %v4600_v27 = vor.u32 %v6438_v19, %v4599_v17  ;;  %3362 = vmatpush.bf16.msra.mxu0 %v4344_v24  ;;  %v7345_v17 = vpack.c.bf16 %v250_v13, %v250_v13  ;;  %v251_v19 = vld [vmem:[#allocation8 + $0x8] sm:$0xff]  ;;  %v7350_v24 = vpack.c.bf16 %v253_v18, %v253_v18  ;;  %v6418_v13 = vld [vmem:[%s7241_s29 + $0x1c4] sm:$0xf] }
  0x80   : > { %v6502_v21 = vld [vmem:[%s7241_s29 + $0x45c] sm:$0xf0]  ;;  %v4793_v18 = vld [vmem:[%s7241_s29 + $0x3e0] sm:$0xf0] }
  0x81   : > { %v5111_v22 = vld [vmem:[%s7241_s29 + $0x640] sm:$0xf]  ;;  %v4856_v28 = vor.u32 %v6502_v21, %v4855_v20  ;;  %3375 = vmatpush.bf16.msra.mxu1 %v4600_v27 }
  0x82   : > { %v6566_v23 = vld [vmem:[%s7241_s29 + $0x65c] sm:$0xf0] }
  0x83   : > { %v4311_v25 = vld [vmem:[%s7241_s29] sm:$0xf]  ;;  %v5112_v32 = vor.u32 %v6566_v23, %v5111_v22  ;;  %3388 = vmatpush.bf16.msra.mxu2 %v4856_v28 }
  0x84   : > { %v6366_v26 = vld [vmem:[%s7241_s29 + $0x1c] sm:$0xf0] }
  0x85   : > { %v4567_v29 = vld [vmem:[%s7241_s29 + $0x200] sm:$0xf]  ;;  %v4312_v39 = vor.u32 %v6366_v26, %v4311_v25  ;;  %3401 = vmatpush.bf16.msra.mxu3 %v5112_v32  ;;  %v7352_v25 = vpack.c.bf16 %v251_v19, %v251_v19  ;;  %v6546_v19 = vld [vmem:[%s7241_s29 + $0x5c4] sm:$0xf] }
  0x86   : > { %v6430_v30 = vld [vmem:[%s7241_s29 + $0x21c] sm:$0xf0] }
  0x87   : > { %v4823_v31 = vld [vmem:[%s7241_s29 + $0x400] sm:$0xf]  ;;  %v4568_v43 = vor.u32 %v6430_v30, %v4567_v29  ;;  %3363 = vmatpush.bf16.msra.mxu0 %v4312_v39 }
  0x88   : > { %v6494_v33 = vld [vmem:[%s7241_s29 + $0x41c] sm:$0xf0] }
  0x89   : > { %v5079_v34 = vld [vmem:[%s7241_s29 + $0x600] sm:$0xf]  ;;  %v4824_v44 = vor.u32 %v6494_v33, %v4823_v31  ;;  %3376 = vmatpush.bf16.msra.mxu1 %v4568_v43 }
  0x8a   : > { %v6558_v35 = vld [vmem:[%s7241_s29 + $0x61c] sm:$0xf0]  ;;  %3364 = vmatmul.bf16.vlgmr.msra.gmra.mxu0 %v7345_v17 }
  0x8b   : > { %v5559_v36 = vld [vmem:[%s7241_s29 + $0x9c0] sm:$0xf]  ;;  %v5080_v47 = vor.u32 %v6558_v35, %v5079_v34  ;;  %3389 = vmatpush.bf16.msra.mxu2 %v4824_v44 }
  0x8c   : > { %v6678_v37 = vld [vmem:[%s7241_s29 + $0x9dc] sm:$0xf0]  ;;  %3377 = vmatmul.bf16.vlgmr.msra.gmra.mxu1 %v7352_v25 }
  0x8d   : > { %v5815_v38 = vld [vmem:[%s7241_s29 + $0xbc0] sm:$0xf]  ;;  %v5560_v48 = vor.u32 %v6678_v37, %v5559_v36  ;;  %3402 = vmatpush.bf16.msra.mxu3 %v5080_v47 }
  0x8e   : > { %v6742_v40 = vld [vmem:[%s7241_s29 + $0xbdc] sm:$0xf0] }
  0x8f   : > { %v6071_v41 = vld [vmem:[%s7241_s29 + $0xdc0] sm:$0xf]  ;;  %v5816_v49 = vor.u32 %v6742_v40, %v5815_v38  ;;  %3408 = vmatpush.bf16.msrb.mxu0 %v5560_v48 }
  0x90   : > { %v6806_v42 = vld [vmem:[%s7241_s29 + $0xddc] sm:$0xf0]  ;;  %3403 = vmatmul.bf16.vlgmr.msra.gmra.mxu3 %v7350_v24 }
  0x91   : > { %v6327_v45 = vld [vmem:[%s7241_s29 + $0xfc0] sm:$0xf]  ;;  %v6072_v50 = vor.u32 %v6806_v42, %v6071_v41  ;;  %3421 = vmatpush.bf16.msrb.mxu1 %v5816_v49 }
  0x92   : > { %v6870_v46 = vld [vmem:[%s7241_s29 + $0xfdc] sm:$0xf0] }
  0x93   : > { %v5527_v51 = vld [vmem:[%s7241_s29 + $0x980] sm:$0xf]  ;;  %v6328_v54 = vor.u32 %v6870_v46, %v6327_v45  ;;  %3434 = vmatpush.bf16.msrb.mxu2 %v6072_v50 }
  0x94   : > { %v6670_v52 = vld [vmem:[%s7241_s29 + $0x99c] sm:$0xf0] }
  0x95   : > { %v5783_v53 = vld [vmem:[%s7241_s29 + $0xb80] sm:$0xf]  ;;  %v5528_v60 = vor.u32 %v6670_v52, %v5527_v51  ;;  %3447 = vmatpush.bf16.msrb.mxu3 %v6328_v54 }
  0x96   : > { %v6734_v55 = vld [vmem:[%s7241_s29 + $0xb9c] sm:$0xf0] }
  0x97   : > { %v6039_v56 = vld [vmem:[%s7241_s29 + $0xd80] sm:$0xf]  ;;  %v5784_v62 = vor.u32 %v6734_v55, %v5783_v53  ;;  %3409 = vmatpush.bf16.msrb.mxu0 %v5528_v60 }
  0x98   : > { %v6798_v57 = vld [vmem:[%s7241_s29 + $0xd9c] sm:$0xf0] }
  0x99   : > { %v6295_v58 = vld [vmem:[%s7241_s29 + $0xf80] sm:$0xf]  ;;  %v6040_v63 = vor.u32 %v6798_v57, %v6039_v56  ;;  %3422 = vmatpush.bf16.msrb.mxu1 %v5784_v62 }
  0x9a   : > { %v6862_v59 = vld [vmem:[%s7241_s29 + $0xf9c] sm:$0xf0] }
  0x9b   : > { %v5495_v61 = vld [vmem:[%s7241_s29 + $0x940] sm:$0xf]  ;;  %v6296_v3 = vor.u32 %v6862_v59, %v6295_v58  ;;  %3435 = vmatpush.bf16.msrb.mxu2 %v6040_v63 }
  0x9c   : > { %v6662_v0 = vld [vmem:[%s7241_s29 + $0x95c] sm:$0xf0] }
  0x9d   : > { %v5751_v1 = vld [vmem:[%s7241_s29 + $0xb40] sm:$0xf]  ;;  %v5496_v10 = vor.u32 %v6662_v0, %v5495_v61  ;;  %3448 = vmatpush.bf16.msrb.mxu3 %v6296_v3 }
  0x9e   : > { %v252_v2 = vld [vmem:[#allocation8 + $0x10] sm:$0xff] }
  0x9f   : > { %v6726_v4 = vld [vmem:[%s7241_s29 + $0xb5c] sm:$0xf0]  ;;  %v7337_v7 = vpack.c.bf16 %v252_v2, %v252_v2  ;;  %3410 = vmatpush.bf16.msrb.mxu0 %v5496_v10 }
  0xa0   : > { %v6007_v5 = vld [vmem:[%s7241_s29 + $0xd40] sm:$0xf]  ;;  %v5752_v14 = vor.u32 %v6726_v4, %v5751_v1 }
  0xa1   : > { %v6790_v6 = vld [vmem:[%s7241_s29 + $0xd5c] sm:$0xf0]  ;;  %3390 = vmatmul.bf16.vlgmr.msra.gmra.mxu2 %v7337_v7 }
  0xa2   : > { %v6263_v8 = vld [vmem:[%s7241_s29 + $0xf40] sm:$0xf]  ;;  %v6008_v15 = vor.u32 %v6790_v6, %v6007_v5  ;;  %3423 = vmatpush.bf16.msrb.mxu1 %v5752_v14  ;;  %v4537_v14 = vld [vmem:[%s7241_s29 + $0x1e0] sm:$0xf0] }
  0xa3   : > { %v6854_v9 = vld [vmem:[%s7241_s29 + $0xf5c] sm:$0xf0] }
  0xa4   : > { %v5463_v11 = vld [vmem:[%s7241_s29 + $0x900] sm:$0xf]  ;;  %v6264_v20 = vor.u32 %v6854_v9, %v6263_v8  ;;  %3436 = vmatpush.bf16.msrb.mxu2 %v6008_v15  ;;  %v6482_v15 = vld [vmem:[%s7241_s29 + $0x3c4] sm:$0xf] }
  0xa5   : > { %v6654_v12 = vld [vmem:[%s7241_s29 + $0x91c] sm:$0xf0] }
  0xa6   : > { %v5719_v16 = vld [vmem:[%s7241_s29 + $0xb00] sm:$0xf]  ;;  %v5464_v28 = vor.u32 %v6654_v12, %v5463_v11  ;;  %3449 = vmatpush.bf16.msrb.mxu3 %v6264_v20  ;;  %v5049_v20 = vld [vmem:[%s7241_s29 + $0x5e0] sm:$0xf0] }
  0xa7   : > { %v6718_v21 = vld [vmem:[%s7241_s29 + $0xb1c] sm:$0xf0] }
  0xa8   : > { %v5975_v22 = vld [vmem:[%s7241_s29 + $0xd00] sm:$0xf]  ;;  %v5720_v29 = vor.u32 %v6718_v21, %v5719_v16  ;;  %3411 = vmatpush.bf16.msrb.mxu0 %v5464_v28 }
  0xa9   : > { %v6782_v23 = vld [vmem:[%s7241_s29 + $0xd1c] sm:$0xf0] }
  0xaa   : > { %v6231_v26 = vld [vmem:[%s7241_s29 + $0xf00] sm:$0xf]  ;;  %v5976_v30 = vor.u32 %v6782_v23, %v5975_v22  ;;  %3424 = vmatpush.bf16.msrb.mxu1 %v5720_v29  ;;  %v6610_v23 = vld [vmem:[%s7241_s29 + $0x7c4] sm:$0xf]  ;;  %v4540_v29 = vor.u32 %v6418_v13, %v4537_v14 }
  0xab   : > { %v6846_v27 = vld [vmem:[%s7241_s29 + $0xf1c] sm:$0xf0]  ;;  %v4409_v13 = vld [vmem:[%s7241_s29 + $0xe0] sm:$0xf0] }
  0xac   : > { %v5431_v31 = vld [vmem:[%s7241_s29 + $0x8c0] sm:$0xf]  ;;  %v6232_v34 = vor.u32 %v6846_v27, %v6231_v26  ;;  %3437 = vmatpush.bf16.msrb.mxu2 %v5976_v30  ;;  %v5305_v26 = vld [vmem:[%s7241_s29 + $0x7e0] sm:$0xf0] }
  0xad   : > { %v6646_v32 = vld [vmem:[%s7241_s29 + $0x8dc] sm:$0xf0]  ;;  %v6410_v30 = vld [vmem:[%s7241_s29 + $0x184] sm:$0xf] }
  0xae   : > { %v5687_v33 = vld [vmem:[%s7241_s29 + $0xac0] sm:$0xf]  ;;  %v5432_v40 = vor.u32 %v6646_v32, %v5431_v31  ;;  %3450 = vmatpush.bf16.msrb.mxu3 %v6232_v34  ;;  %v254_v31 = vld [vmem:[#allocation8 + $0x20] sm:$0xff]  ;;  %v257_v32 = vld [vmem:[#allocation8 + $0x38] sm:$0xff]  ;;  %v5052_v34 = vor.u32 %v6546_v19, %v5049_v20 }
  0xaf   : > { %v6710_v35 = vld [vmem:[%s7241_s29 + $0xadc] sm:$0xf0]  ;;  %v6450_v14 = vld [vmem:[%s7241_s29 + $0x2c4] sm:$0xf] }
  0xb0   : > { %v5943_v36 = vld [vmem:[%s7241_s29 + $0xcc0] sm:$0xf]  ;;  %v5688_v41 = vor.u32 %v6710_v35, %v5687_v33  ;;  %3412 = vmatpush.bf16.msrb.mxu0 %v5432_v40  ;;  %v4796_v33 = vor.u32 %v6482_v15, %v4793_v18  ;;  %v4505_v35 = vld [vmem:[%s7241_s29 + $0x1a0] sm:$0xf0] }
  0xb1   : > { %v6774_v37 = vld [vmem:[%s7241_s29 + $0xcdc] sm:$0xf0]  ;;  %v6538_v40 = vld [vmem:[%s7241_s29 + $0x584] sm:$0xf] }
  0xb2   : > { %v6199_v38 = vld [vmem:[%s7241_s29 + $0xec0] sm:$0xf]  ;;  %v5944_v42 = vor.u32 %v6774_v37, %v5943_v36  ;;  %3425 = vmatpush.bf16.msrb.mxu1 %v5688_v41  ;;  %v6474_v36 = vld [vmem:[%s7241_s29 + $0x384] sm:$0xf]  ;;  %v255_v37 = vld [vmem:[#allocation8 + $0x28] sm:$0xff] }
  0xb3   : > { %v6838_v39 = vld [vmem:[%s7241_s29 + $0xedc] sm:$0xf0]  ;;  %v5017_v41 = vld [vmem:[%s7241_s29 + $0x5a0] sm:$0xf0] }
  0xb4   : > { %v5399_v43 = vld [vmem:[%s7241_s29 + $0x880] sm:$0xf]  ;;  %v6200_v46 = vor.u32 %v6838_v39, %v6199_v38  ;;  %3438 = vmatpush.bf16.msrb.mxu2 %v5944_v42  ;;  %v5308_v38 = vor.u32 %v6610_v23, %v5305_v26  ;;  %v4761_v39 = vld [vmem:[%s7241_s29 + $0x3a0] sm:$0xf0] }
  0xb5   : > { %v6638_v44 = vld [vmem:[%s7241_s29 + $0x89c] sm:$0xf0]  ;;  %v6514_v18 = vld [vmem:[%s7241_s29 + $0x4c4] sm:$0xf] }
  0xb6   : > { %v5655_v45 = vld [vmem:[%s7241_s29 + $0xa80] sm:$0xf]  ;;  %v5400_v52 = vor.u32 %v6638_v44, %v5399_v43  ;;  %3451 = vmatpush.bf16.msrb.mxu3 %v6200_v46  ;;  %v6602_v43 = vld [vmem:[%s7241_s29 + $0x784] sm:$0xf]  ;;  %v7411_v46 = vpack.c.bf16 %v257_v32, %v257_v32 }
  0xb7   : > { %v6702_v47 = vld [vmem:[%s7241_s29 + $0xa9c] sm:$0xf0]  ;;  %v5273_v44 = vld [vmem:[%s7241_s29 + $0x7a0] sm:$0xf0] }
  0xb8   : > { %v5911_v48 = vld [vmem:[%s7241_s29 + $0xc80] sm:$0xf]  ;;  %v5656_v53 = vor.u32 %v6702_v47, %v5655_v45  ;;  %3413 = vmatpush.bf16.msrb.mxu0 %v5400_v52  ;;  %v7409_v45 = vpack.c.bf16 %v254_v31, %v254_v31  ;;  %v4508_v47 = vor.u32 %v6410_v30, %v4505_v35  ;;  %v4473_v52 = vld [vmem:[%s7241_s29 + $0x160] sm:$0xf0] }
  0xb9   : > { %v6766_v49 = vld [vmem:[%s7241_s29 + $0xc9c] sm:$0xf0]  ;;  %v4921_v19 = vld [vmem:[%s7241_s29 + $0x4e0] sm:$0xf0] }
  0xba   : > { %v6167_v50 = vld [vmem:[%s7241_s29 + $0xe80] sm:$0xf]  ;;  %v5912_v54 = vor.u32 %v6766_v49, %v5911_v48  ;;  %3426 = vmatpush.bf16.msrb.mxu1 %v5656_v53  ;;  %v7413_v48 = vpack.c.bf16 %v255_v37, %v255_v37  ;;  %v4764_v49 = vor.u32 %v6474_v36, %v4761_v39  ;;  %v6466_v53 = vld [vmem:[%s7241_s29 + $0x344] sm:$0xf]  ;;  %v4924_v26 = vor.u32 %v6514_v18, %v4921_v19 }
  0xbb   : > { %v6830_v51 = vld [vmem:[%s7241_s29 + $0xe9c] sm:$0xf0]  ;;  %v6578_v20 = vld [vmem:[%s7241_s29 + $0x6c4] sm:$0xf] }
  0xbc   : > { %v5367_v55 = vld [vmem:[%s7241_s29 + $0x840] sm:$0xf]  ;;  %v6168_v58 = vor.u32 %v6830_v51, %v6167_v50  ;;  %3439 = vmatpush.bf16.msrb.mxu2 %v5912_v54  ;;  %v5020_v50 = vor.u32 %v6538_v40, %v5017_v41  ;;  %v6402_v51 = vld [vmem:[%s7241_s29 + $0x144] sm:$0xf]  ;;  %v5276_v54 = vor.u32 %v6602_v43, %v5273_v44 }
  0xbd   : > { %v6630_v56 = vld [vmem:[%s7241_s29 + $0x85c] sm:$0xf0]  ;;  %v4633_v31 = vld [vmem:[%s7241_s29 + $0x2a0] sm:$0xf0] }
  0xbe   : > { %v5623_v57 = vld [vmem:[%s7241_s29 + $0xa40] sm:$0xf]  ;;  %v5368_v0 = vor.u32 %v6630_v56, %v5367_v55  ;;  %3452 = vmatpush.bf16.msrb.mxu3 %v6168_v58  ;;  %v4729_v55 = vld [vmem:[%s7241_s29 + $0x360] sm:$0xf0] }
  0xbf   : > { %v6694_v59 = vld [vmem:[%s7241_s29 + $0xa5c] sm:$0xf0]  ;;  %v6530_v56 = vld [vmem:[%s7241_s29 + $0x544] sm:$0xf] }
  0xc0   : > { %v5879_v60 = vld [vmem:[%s7241_s29 + $0xc40] sm:$0xf]  ;;  %v5624_v3 = vor.u32 %v6694_v59, %v5623_v57  ;;  %3414 = vmatpush.bf16.msrb.mxu0 %v5368_v0  ;;  %v4985_v57 = vld [vmem:[%s7241_s29 + $0x560] sm:$0xf0] }
  0xc1   : > { %v6758_v61 = vld [vmem:[%s7241_s29 + $0xc5c] sm:$0xf0]  ;;  %v6594_v58 = vld [vmem:[%s7241_s29 + $0x744] sm:$0xf] }
  0xc2   : > { %v6135_v62 = vld [vmem:[%s7241_s29 + $0xe40] sm:$0xf]  ;;  %v5880_v4 = vor.u32 %v6758_v61, %v5879_v60  ;;  %3427 = vmatpush.bf16.msrb.mxu1 %v5624_v3  ;;  %v5241_v59 = vld [vmem:[%s7241_s29 + $0x760] sm:$0xf0]  ;;  %v4476_v60 = vor.u32 %v6402_v51, %v4473_v52  ;;  %v4732_v61 = vor.u32 %v6466_v53, %v4729_v55 }
  0xc3   : > { %v6822_v63 = vld [vmem:[%s7241_s29 + $0xe5c] sm:$0xf0]  ;;  %v4441_v0 = vld [vmem:[%s7241_s29 + $0x120] sm:$0xf0] }
  0xc4   : > { %v5335_v1 = vld [vmem:[%s7241_s29 + $0x800] sm:$0xf]  ;;  %v6136_v9 = vor.u32 %v6822_v63, %v6135_v62  ;;  %3440 = vmatpush.bf16.msrb.mxu2 %v5880_v4  ;;  %v4988_v62 = vor.u32 %v6530_v56, %v4985_v57  ;;  %v6394_v63 = vld [vmem:[%s7241_s29 + $0x104] sm:$0xf] }
  0xc5   : > { %v6622_v2 = vld [vmem:[%s7241_s29 + $0x81c] sm:$0xf0]  ;;  %v4697_v3 = vld [vmem:[%s7241_s29 + $0x320] sm:$0xf0] }
  0xc6   : > { %v5591_v5 = vld [vmem:[%s7241_s29 + $0xa00] sm:$0xf]  ;;  %v5336_v16 = vor.u32 %v6622_v2, %v5335_v1  ;;  %3453 = vmatpush.bf16.msrb.mxu3 %v6136_v9  ;;  %v6458_v1 = vld [vmem:[%s7241_s29 + $0x304] sm:$0xf]  ;;  %v5244_v2 = vor.u32 %v6594_v58, %v5241_v59  ;;  %v4444_v9 = vor.u32 %v6394_v63, %v4441_v0 }
  0xc7   : > { %v6686_v6 = vld [vmem:[%s7241_s29 + $0xa1c] sm:$0xf0]  ;;  %v6522_v4 = vld [vmem:[%s7241_s29 + $0x504] sm:$0xf] }
  0xc8   : > { %v5847_v8 = vld [vmem:[%s7241_s29 + $0xc00] sm:$0xf]  ;;  %v5592_v21 = vor.u32 %v6686_v6, %v5591_v5  ;;  %3415 = vmatpush.bf16.msrb.mxu0 %v5336_v16  ;;  %v4953_v5 = vld [vmem:[%s7241_s29 + $0x520] sm:$0xf0] }
  0xc9   : > { %v6750_v10 = vld [vmem:[%s7241_s29 + $0xc1c] sm:$0xf0]  ;;  %v6586_v6 = vld [vmem:[%s7241_s29 + $0x704] sm:$0xf] }
  0xca   : > { %v6103_v11 = vld [vmem:[%s7241_s29 + $0xe00] sm:$0xf]  ;;  %v5848_v22 = vor.u32 %v6750_v10, %v5847_v8  ;;  %3428 = vmatpush.bf16.msrb.mxu1 %v5592_v21  ;;  %v5209_v8 = vld [vmem:[%s7241_s29 + $0x720] sm:$0xf0]  ;;  %v4700_v10 = vor.u32 %v6458_v1, %v4697_v3 }
  0xcb   : > { %v6814_v12 = vld [vmem:[%s7241_s29 + $0xe1c] sm:$0xf0]  ;;  %3416 = vmatmul.bf16.vlgmr.msrb.gmra.mxu0 %v7409_v45  ;;  %v5212_v15 = vor.u32 %v6586_v6, %v5209_v8  ;;  %v4665_v16 = vld [vmem:[%s7241_s29 + $0x2e0] sm:$0xf0] }
  0xcc   : > { %v256_v27 = vld [vmem:[#allocation8 + $0x30] sm:$0xff]  ;;  %v6104_v28 = vor.u32 %v6814_v12, %v6103_v11  ;;  %3441 = vmatpush.bf16.msrb.mxu2 %v5848_v22  ;;  %3460 = vmatpush.bf16.msra.mxu0 %v4540_v29  ;;  %v4956_v11 = vor.u32 %v6522_v4, %v4953_v5  ;;  %v4668_v23 = vor.u32 %v6450_v14, %v4665_v16 }
  0xcd   : > { %v7405_v42 = vpack.c.bf16 %v256_v27, %v256_v27  ;;  %3429 = vmatmul.bf16.vlgmr.msrb.gmra.mxu1 %v7413_v48  ;;  %v6386_v12 = vld [vmem:[%s7241_s29 + $0xc4] sm:$0xf] }
  0xce   : > { %3454 = vmatpush.bf16.msrb.mxu3 %v6104_v28  ;;  %3473 = vmatpush.bf16.msra.mxu1 %v4796_v33  ;;  %v5177_v21 = vld [vmem:[%s7241_s29 + $0x6e0] sm:$0xf0]  ;;  %v4412_v22 = vor.u32 %v6386_v12, %v4409_v13 }
  0xcf   : > { %3442 = vmatmul.bf16.vlgmr.msrb.gmra.mxu2 %v7405_v42  ;;  %v6378_v27 = vld [vmem:[%s7241_s29 + $0x84] sm:$0xf]  ;;  %v5180_v30 = vor.u32 %v6578_v20, %v5177_v21 }
  0xd0   : > { %3486 = vmatpush.bf16.msra.mxu2 %v5052_v34  ;;  %3461 = vmatpush.bf16.msra.mxu0 %v4508_v47  ;;  %v4377_v28 = vld [vmem:[%s7241_s29 + $0xa0] sm:$0xf0] }
  0xd1   : > { %3455 = vmatmul.bf16.vlgmr.msrb.gmra.mxu3 %v7411_v46  ;;  %v6442_v29 = vld [vmem:[%s7241_s29 + $0x284] sm:$0xf]  ;;  %v4380_v36 = vor.u32 %v6378_v27, %v4377_v28 }
  0xd2   : > { %3499 = vmatpush.bf16.msra.mxu3 %v5308_v38  ;;  %3474 = vmatpush.bf16.msra.mxu1 %v4764_v49  ;;  %v6506_v32 = vld [vmem:[%s7241_s29 + $0x484] sm:$0xf]  ;;  %v4636_v37 = vor.u32 %v6442_v29, %v4633_v31 }
  0xd3   : > { %v4889_v33 = vld [vmem:[%s7241_s29 + $0x4a0] sm:$0xf0] }
  0xd4   : > { %3487 = vmatpush.bf16.msra.mxu2 %v5020_v50  ;;  %3462 = vmatpush.bf16.msra.mxu0 %v4476_v60  ;;  %v6570_v34 = vld [vmem:[%s7241_s29 + $0x684] sm:$0xf]  ;;  %v4892_v38 = vor.u32 %v6506_v32, %v4889_v33 }
  0xd5   : > { %v5145_v35 = vld [vmem:[%s7241_s29 + $0x6a0] sm:$0xf0] }
  0xd6   : > { %3500 = vmatpush.bf16.msra.mxu3 %v5276_v54  ;;  %3475 = vmatpush.bf16.msra.mxu1 %v4732_v61  ;;  %v6370_v39 = vld [vmem:[%s7241_s29 + $0x44] sm:$0xf]  ;;  %v5148_v43 = vor.u32 %v6570_v34, %v5145_v35 }
  0xd7   : > { %v4345_v40 = vld [vmem:[%s7241_s29 + $0x60] sm:$0xf0] }
  0xd8   : > { %3488 = vmatpush.bf16.msra.mxu2 %v4988_v62  ;;  %3463 = vmatpush.bf16.msra.mxu0 %v4444_v9  ;;  %v6434_v41 = vld [vmem:[%s7241_s29 + $0x244] sm:$0xf]  ;;  %v4348_v52 = vor.u32 %v6370_v39, %v4345_v40 }
  0xd9   : > { %v4601_v44 = vld [vmem:[%s7241_s29 + $0x260] sm:$0xf0] }
  0xda   : > { %3501 = vmatpush.bf16.msra.mxu3 %v5244_v2  ;;  %3476 = vmatpush.bf16.msra.mxu1 %v4700_v10  ;;  %v6498_v47 = vld [vmem:[%s7241_s29 + $0x444] sm:$0xf]  ;;  %v4604_v55 = vor.u32 %v6434_v41, %v4601_v44 }
  0xdb   : > { %v4857_v49 = vld [vmem:[%s7241_s29 + $0x460] sm:$0xf0] }
  0xdc   : > { %3489 = vmatpush.bf16.msra.mxu2 %v4956_v11  ;;  %3464 = vmatpush.bf16.msra.mxu0 %v4412_v22  ;;  %v6562_v50 = vld [vmem:[%s7241_s29 + $0x644] sm:$0xf]  ;;  %v4860_v56 = vor.u32 %v6498_v47, %v4857_v49 }
  0xdd   : > { %v5113_v51 = vld [vmem:[%s7241_s29 + $0x660] sm:$0xf0] }
  0xde   : > { %3502 = vmatpush.bf16.msra.mxu3 %v5212_v15  ;;  %3477 = vmatpush.bf16.msra.mxu1 %v4668_v23  ;;  %v6362_v53 = vld [vmem:[%s7241_s29 + $0x4] sm:$0xf]  ;;  %v5116_v60 = vor.u32 %v6562_v50, %v5113_v51 }
  0xdf   : > { %v4313_v54 = vld [vmem:[%s7241_s29 + $0x20] sm:$0xf0] }
  0xe0   : > { %3490 = vmatpush.bf16.msra.mxu2 %v4924_v26  ;;  %3465 = vmatpush.bf16.msra.mxu0 %v4380_v36  ;;  %v6426_v57 = vld [vmem:[%s7241_s29 + $0x204] sm:$0xf]  ;;  %v4316_v3 = vor.u32 %v6362_v53, %v4313_v54 }
  0xe1   : > { %v4569_v58 = vld [vmem:[%s7241_s29 + $0x220] sm:$0xf0] }
  0xe2   : > { %3503 = vmatpush.bf16.msra.mxu3 %v5180_v30  ;;  %3478 = vmatpush.bf16.msra.mxu1 %v4636_v37  ;;  %v6490_v59 = vld [vmem:[%s7241_s29 + $0x404] sm:$0xf]  ;;  %v4572_v8 = vor.u32 %v6426_v57, %v4569_v58 }
  0xe3   : > { %v4825_v61 = vld [vmem:[%s7241_s29 + $0x420] sm:$0xf0] }
  0xe4   : > { %3491 = vmatpush.bf16.msra.mxu2 %v4892_v38  ;;  %v6554_v62 = vld [vmem:[%s7241_s29 + $0x604] sm:$0xf]  ;;  %3466 = vmatpush.bf16.msra.mxu0 %v4348_v52  ;;  %v4828_v9 = vor.u32 %v6490_v59, %v4825_v61 }
  0xe5   : > { %v5081_v63 = vld [vmem:[%s7241_s29 + $0x620] sm:$0xf0] }
  0xe6   : > { %3504 = vmatpush.bf16.msra.mxu3 %v5148_v43  ;;  %v6674_v0 = vld [vmem:[%s7241_s29 + $0x9c4] sm:$0xf]  ;;  %3479 = vmatpush.bf16.msra.mxu1 %v4604_v55  ;;  %v5084_v12 = vor.u32 %v6554_v62, %v5081_v63 }
  0xe7   : > { %v5561_v1 = vld [vmem:[%s7241_s29 + $0x9e0] sm:$0xf0] }
  0xe8   : > { %v6738_v2 = vld [vmem:[%s7241_s29 + $0xbc4] sm:$0xf]  ;;  %3492 = vmatpush.bf16.msra.mxu2 %v4860_v56  ;;  %v5564_v13 = vor.u32 %v6674_v0, %v5561_v1  ;;  %3467 = vmatpush.bf16.msra.mxu0 %v4316_v3 }
  0xe9   : > { %v5817_v4 = vld [vmem:[%s7241_s29 + $0xbe0] sm:$0xf0] }
  0xea   : > { %v6802_v5 = vld [vmem:[%s7241_s29 + $0xdc4] sm:$0xf]  ;;  %3505 = vmatpush.bf16.msra.mxu3 %v5116_v60  ;;  %v5820_v14 = vor.u32 %v6738_v2, %v5817_v4  ;;  %3480 = vmatpush.bf16.msra.mxu1 %v4572_v8 }
  0xeb   : > { %v6073_v6 = vld [vmem:[%s7241_s29 + $0xde0] sm:$0xf0]  ;;  %3468 = vmatmul.bf16.vlgmr.msra.gmra.mxu0 %v7345_v17 }
  0xec   : > { %v6866_v10 = vld [vmem:[%s7241_s29 + $0xfc4] sm:$0xf]  ;;  %v6076_v15 = vor.u32 %v6802_v5, %v6073_v6  ;;  %3493 = vmatpush.bf16.msra.mxu2 %v4828_v9  ;;  %3512 = vmatpush.bf16.msrb.mxu0 %v5564_v13 }
  0xed   : > { %v6329_v11 = vld [vmem:[%s7241_s29 + $0xfe0] sm:$0xf0]  ;;  %3481 = vmatmul.bf16.vlgmr.msra.gmra.mxu1 %v7352_v25 }
  0xee   : > { %v6666_v16 = vld [vmem:[%s7241_s29 + $0x984] sm:$0xf]  ;;  %v6332_v20 = vor.u32 %v6866_v10, %v6329_v11  ;;  %3506 = vmatpush.bf16.msra.mxu3 %v5084_v12  ;;  %3525 = vmatpush.bf16.msrb.mxu1 %v5820_v14 }
  0xef   : > { %v5529_v18 = vld [vmem:[%s7241_s29 + $0x9a0] sm:$0xf0]  ;;  %3494 = vmatmul.bf16.vlgmr.msra.gmra.mxu2 %v7337_v7 }
  0xf0   : > { %v6730_v19 = vld [vmem:[%s7241_s29 + $0xb84] sm:$0xf]  ;;  %v5532_v28 = vor.u32 %v6666_v16, %v5529_v18  ;;  %3538 = vmatpush.bf16.msrb.mxu2 %v6076_v15 }
  0xf1   : > { %v5785_v21 = vld [vmem:[%s7241_s29 + $0xba0] sm:$0xf0]  ;;  %3507 = vmatmul.bf16.vlgmr.msra.gmra.mxu3 %v7350_v24 }
  0xf2   : > { %v6794_v22 = vld [vmem:[%s7241_s29 + $0xd84] sm:$0xf]  ;;  %v5788_v29 = vor.u32 %v6730_v19, %v5785_v21  ;;  %3551 = vmatpush.bf16.msrb.mxu3 %v6332_v20  ;;  %3513 = vmatpush.bf16.msrb.mxu0 %v5532_v28 }
  0xf3   : > { %v6041_v23 = vld [vmem:[%s7241_s29 + $0xda0] sm:$0xf0] }
  0xf4   : > { %v6858_v26 = vld [vmem:[%s7241_s29 + $0xf84] sm:$0xf]  ;;  %v6044_v30 = vor.u32 %v6794_v22, %v6041_v23  ;;  %3526 = vmatpush.bf16.msrb.mxu1 %v5788_v29 }
  0xf5   : > { %v6297_v27 = vld [vmem:[%s7241_s29 + $0xfa0] sm:$0xf0] }
  0xf6   : > { %v6658_v31 = vld [vmem:[%s7241_s29 + $0x944] sm:$0xf]  ;;  %v6300_v34 = vor.u32 %v6858_v26, %v6297_v27  ;;  %3539 = vmatpush.bf16.msrb.mxu2 %v6044_v30 }
  0xf7   : > { %v5497_v32 = vld [vmem:[%s7241_s29 + $0x960] sm:$0xf0] }
  0xf8   : > { %v6722_v33 = vld [vmem:[%s7241_s29 + $0xb44] sm:$0xf]  ;;  %v5500_v40 = vor.u32 %v6658_v31, %v5497_v32  ;;  %3552 = vmatpush.bf16.msrb.mxu3 %v6300_v34 }
  0xf9   : > { %v5753_v35 = vld [vmem:[%s7241_s29 + $0xb60] sm:$0xf0] }
  0xfa   : > { %v6786_v36 = vld [vmem:[%s7241_s29 + $0xd44] sm:$0xf]  ;;  %v5756_v41 = vor.u32 %v6722_v33, %v5753_v35  ;;  %3514 = vmatpush.bf16.msrb.mxu0 %v5500_v40 }
  0xfb   : > { %v6009_v37 = vld [vmem:[%s7241_s29 + $0xd60] sm:$0xf0] }
  0xfc   : > { %v6850_v38 = vld [vmem:[%s7241_s29 + $0xf44] sm:$0xf]  ;;  %v6012_v43 = vor.u32 %v6786_v36, %v6009_v37  ;;  %3527 = vmatpush.bf16.msrb.mxu1 %v5756_v41 }
  0xfd   : > { %v6265_v39 = vld [vmem:[%s7241_s29 + $0xf60] sm:$0xf0] }
  0xfe   : > { %v6650_v44 = vld [vmem:[%s7241_s29 + $0x904] sm:$0xf]  ;;  %v6268_v50 = vor.u32 %v6850_v38, %v6265_v39  ;;  %3540 = vmatpush.bf16.msrb.mxu2 %v6012_v43 }
  0xff   : > { %v5465_v47 = vld [vmem:[%s7241_s29 + $0x920] sm:$0xf0] }
 0x100   : > { %v6714_v49 = vld [vmem:[%s7241_s29 + $0xb04] sm:$0xf]  ;;  %v5468_v56 = vor.u32 %v6650_v44, %v5465_v47  ;;  %3553 = vmatpush.bf16.msrb.mxu3 %v6268_v50  ;;  %v4543_v47 = vld [vmem:[%s7241_s29 + $0x1c8] sm:$0xf] }
 0x101   : > { %v5721_v51 = vld [vmem:[%s7241_s29 + $0xb20] sm:$0xf0]  ;;  %v4799_v50 = vld [vmem:[%s7241_s29 + $0x3c8] sm:$0xf] }
 0x102   : > { %v6778_v52 = vld [vmem:[%s7241_s29 + $0xd04] sm:$0xf]  ;;  %v5724_v57 = vor.u32 %v6714_v49, %v5721_v51  ;;  %3515 = vmatpush.bf16.msrb.mxu0 %v5468_v56  ;;  %v6423_v49 = vld [vmem:[%s7241_s29 + $0x1e4] sm:$0xf0] }
 0x103   : > { %v5977_v53 = vld [vmem:[%s7241_s29 + $0xd20] sm:$0xf0] }
 0x104   : > { %v6842_v54 = vld [vmem:[%s7241_s29 + $0xf04] sm:$0xf]  ;;  %v5980_v58 = vor.u32 %v6778_v52, %v5977_v53  ;;  %3528 = vmatpush.bf16.msrb.mxu1 %v5724_v57  ;;  %v6487_v52 = vld [vmem:[%s7241_s29 + $0x3e4] sm:$0xf0] }
 0x105   : > { %v6233_v55 = vld [vmem:[%s7241_s29 + $0xf20] sm:$0xf0]  ;;  %v5055_v53 = vld [vmem:[%s7241_s29 + $0x5c8] sm:$0xf] }
 0x106   : > { %v6642_v59 = vld [vmem:[%s7241_s29 + $0x8c4] sm:$0xf]  ;;  %v6236_v62 = vor.u32 %v6842_v54, %v6233_v55  ;;  %3541 = vmatpush.bf16.msrb.mxu2 %v5980_v58  ;;  %v6551_v54 = vld [vmem:[%s7241_s29 + $0x5e4] sm:$0xf0] }
 0x107   : > { %v5433_v60 = vld [vmem:[%s7241_s29 + $0x8e0] sm:$0xf0]  ;;  %v5311_v57 = vld [vmem:[%s7241_s29 + $0x7c8] sm:$0xf] }
 0x108   : > { %v6706_v61 = vld [vmem:[%s7241_s29 + $0xac4] sm:$0xf]  ;;  %v5436_v4 = vor.u32 %v6642_v59, %v5433_v60  ;;  %3554 = vmatpush.bf16.msrb.mxu3 %v6236_v62  ;;  %v6615_v58 = vld [vmem:[%s7241_s29 + $0x7e4] sm:$0xf0]  ;;  %v4544_v60 = vor.u32 %v6423_v49, %v4543_v47  ;;  %v5056_v62 = vor.u32 %v6551_v54, %v5055_v53 }
 0x109   : > { %v5689_v63 = vld [vmem:[%s7241_s29 + $0xae0] sm:$0xf0]  ;;  %v4927_v47 = vld [vmem:[%s7241_s29 + $0x4c8] sm:$0xf] }
 0x10a   : > { %v6770_v0 = vld [vmem:[%s7241_s29 + $0xcc4] sm:$0xf]  ;;  %v5692_v5 = vor.u32 %v6706_v61, %v5689_v63  ;;  %3516 = vmatpush.bf16.msrb.mxu0 %v5436_v4  ;;  %v4800_v61 = vor.u32 %v6487_v52, %v4799_v50  ;;  %v4511_v63 = vld [vmem:[%s7241_s29 + $0x188] sm:$0xf] }
 0x10b   : > { %v5945_v1 = vld [vmem:[%s7241_s29 + $0xce0] sm:$0xf0]  ;;  %v5023_v4 = vld [vmem:[%s7241_s29 + $0x588] sm:$0xf] }
 0x10c   : > { %v6834_v2 = vld [vmem:[%s7241_s29 + $0xec4] sm:$0xf]  ;;  %v5948_v6 = vor.u32 %v6770_v0, %v5945_v1  ;;  %3529 = vmatpush.bf16.msrb.mxu1 %v5692_v5  ;;  %v6415_v0 = vld [vmem:[%s7241_s29 + $0x1a4] sm:$0xf0] }
 0x10d   : > { %v6201_v3 = vld [vmem:[%s7241_s29 + $0xee0] sm:$0xf0]  ;;  %v4767_v1 = vld [vmem:[%s7241_s29 + $0x388] sm:$0xf] }
 0x10e   : > { %v6634_v8 = vld [vmem:[%s7241_s29 + $0x884] sm:$0xf]  ;;  %v6204_v11 = vor.u32 %v6834_v2, %v6201_v3  ;;  %3542 = vmatpush.bf16.msrb.mxu2 %v5948_v6  ;;  %v5312_v2 = vor.u32 %v6615_v58, %v5311_v57  ;;  %v6479_v3 = vld [vmem:[%s7241_s29 + $0x3a4] sm:$0xf0] }
 0x10f   : > { %v5401_v9 = vld [vmem:[%s7241_s29 + $0x8a0] sm:$0xf0]  ;;  %v6543_v5 = vld [vmem:[%s7241_s29 + $0x5a4] sm:$0xf0] }
 0x110   : > { %v6698_v10 = vld [vmem:[%s7241_s29 + $0xa84] sm:$0xf]  ;;  %v5404_v18 = vor.u32 %v6634_v8, %v5401_v9  ;;  %3555 = vmatpush.bf16.msrb.mxu3 %v6204_v11  ;;  %v5279_v6 = vld [vmem:[%s7241_s29 + $0x788] sm:$0xf]  ;;  %v4512_v9 = vor.u32 %v6415_v0, %v4511_v63  ;;  %v5024_v11 = vor.u32 %v6543_v5, %v5023_v4 }
 0x111   : > { %v5657_v12 = vld [vmem:[%s7241_s29 + $0xaa0] sm:$0xf0]  ;;  %v6607_v8 = vld [vmem:[%s7241_s29 + $0x7a4] sm:$0xf0] }
 0x112   : > { %v6762_v13 = vld [vmem:[%s7241_s29 + $0xc84] sm:$0xf]  ;;  %v5660_v19 = vor.u32 %v6698_v10, %v5657_v12  ;;  %3517 = vmatpush.bf16.msrb.mxu0 %v5404_v18  ;;  %v4768_v10 = vor.u32 %v6479_v3, %v4767_v1  ;;  %v4479_v12 = vld [vmem:[%s7241_s29 + $0x148] sm:$0xf] }
 0x113   : > { %v5913_v14 = vld [vmem:[%s7241_s29 + $0xca0] sm:$0xf0]  ;;  %v4991_v18 = vld [vmem:[%s7241_s29 + $0x548] sm:$0xf] }
 0x114   : > { %v6826_v15 = vld [vmem:[%s7241_s29 + $0xe84] sm:$0xf]  ;;  %v5916_v20 = vor.u32 %v6762_v13, %v5913_v14  ;;  %3530 = vmatpush.bf16.msrb.mxu1 %v5660_v19  ;;  %v6407_v13 = vld [vmem:[%s7241_s29 + $0x164] sm:$0xf0] }
 0x115   : > { %v6169_v16 = vld [vmem:[%s7241_s29 + $0xea0] sm:$0xf0]  ;;  %v4735_v14 = vld [vmem:[%s7241_s29 + $0x348] sm:$0xf] }
 0x116   : > { %v6626_v21 = vld [vmem:[%s7241_s29 + $0x844] sm:$0xf]  ;;  %v6172_v26 = vor.u32 %v6826_v15, %v6169_v16  ;;  %3543 = vmatpush.bf16.msrb.mxu2 %v5916_v20  ;;  %v5280_v15 = vor.u32 %v6607_v8, %v5279_v6  ;;  %v6471_v16 = vld [vmem:[%s7241_s29 + $0x364] sm:$0xf0] }
 0x117   : > { %v5369_v22 = vld [vmem:[%s7241_s29 + $0x860] sm:$0xf0]  ;;  %v6535_v19 = vld [vmem:[%s7241_s29 + $0x564] sm:$0xf0] }
 0x118   : > { %v6690_v23 = vld [vmem:[%s7241_s29 + $0xa44] sm:$0xf]  ;;  %v5372_v32 = vor.u32 %v6626_v21, %v5369_v22  ;;  %3556 = vmatpush.bf16.msrb.mxu3 %v6172_v26  ;;  %v5247_v20 = vld [vmem:[%s7241_s29 + $0x748] sm:$0xf]  ;;  %v4480_v22 = vor.u32 %v6407_v13, %v4479_v12  ;;  %v4992_v26 = vor.u32 %v6535_v19, %v4991_v18 }
 0x119   : > { %v5625_v27 = vld [vmem:[%s7241_s29 + $0xa60] sm:$0xf0]  ;;  %v6599_v21 = vld [vmem:[%s7241_s29 + $0x764] sm:$0xf0] }
 0x11a   : > { %v6754_v28 = vld [vmem:[%s7241_s29 + $0xc44] sm:$0xf]  ;;  %v5628_v35 = vor.u32 %v6690_v23, %v5625_v27  ;;  %3518 = vmatpush.bf16.msrb.mxu0 %v5372_v32  ;;  %v4736_v23 = vor.u32 %v6471_v16, %v4735_v14  ;;  %v4447_v27 = vld [vmem:[%s7241_s29 + $0x108] sm:$0xf] }
 0x11b   : > { %v5881_v29 = vld [vmem:[%s7241_s29 + $0xc60] sm:$0xf0]  ;;  %v4959_v32 = vld [vmem:[%s7241_s29 + $0x508] sm:$0xf] }
 0x11c   : > { %v6818_v30 = vld [vmem:[%s7241_s29 + $0xe44] sm:$0xf]  ;;  %v5884_v36 = vor.u32 %v6754_v28, %v5881_v29  ;;  %3531 = vmatpush.bf16.msrb.mxu1 %v5628_v35  ;;  %v6399_v28 = vld [vmem:[%s7241_s29 + $0x124] sm:$0xf0] }
 0x11d   : > { %v6137_v31 = vld [vmem:[%s7241_s29 + $0xe60] sm:$0xf0]  ;;  %v4703_v29 = vld [vmem:[%s7241_s29 + $0x308] sm:$0xf] }
 0x11e   : > { %v6618_v33 = vld [vmem:[%s7241_s29 + $0x804] sm:$0xf]  ;;  %v6140_v40 = vor.u32 %v6818_v30, %v6137_v31  ;;  %3544 = vmatpush.bf16.msrb.mxu2 %v5884_v36  ;;  %v5248_v30 = vor.u32 %v6599_v21, %v5247_v20  ;;  %v6463_v31 = vld [vmem:[%s7241_s29 + $0x324] sm:$0xf0]  ;;  %v4448_v36 = vor.u32 %v6399_v28, %v4447_v27 }
 0x11f   : > { %v5337_v34 = vld [vmem:[%s7241_s29 + $0x820] sm:$0xf0]  ;;  %v6591_v35 = vld [vmem:[%s7241_s29 + $0x724] sm:$0xf0] }
 0x120   : > { %v6682_v37 = vld [vmem:[%s7241_s29 + $0xa04] sm:$0xf]  ;;  %v5340_v51 = vor.u32 %v6618_v33, %v5337_v34  ;;  %3557 = vmatpush.bf16.msrb.mxu3 %v6140_v40  ;;  %v6527_v33 = vld [vmem:[%s7241_s29 + $0x524] sm:$0xf0] }
 0x121   : > { %v5593_v38 = vld [vmem:[%s7241_s29 + $0xa20] sm:$0xf0]  ;;  %v5215_v34 = vld [vmem:[%s7241_s29 + $0x708] sm:$0xf] }
 0x122   : > { %v6746_v39 = vld [vmem:[%s7241_s29 + $0xc04] sm:$0xf]  ;;  %v5596_v55 = vor.u32 %v6682_v37, %v5593_v38  ;;  %3519 = vmatpush.bf16.msrb.mxu0 %v5340_v51  ;;  %v4704_v37 = vor.u32 %v6463_v31, %v4703_v29  ;;  %v4960_v38 = vor.u32 %v6527_v33, %v4959_v32  ;;  %v6391_v40 = vld [vmem:[%s7241_s29 + $0xe4] sm:$0xf0] }
 0x123   : > { %v5849_v41 = vld [vmem:[%s7241_s29 + $0xc20] sm:$0xf0]  ;;  %v6519_v49 = vld [vmem:[%s7241_s29 + $0x4e4] sm:$0xf0] }
 0x124   : > { %v6810_v43 = vld [vmem:[%s7241_s29 + $0xe04] sm:$0xf]  ;;  %v5852_v56 = vor.u32 %v6746_v39, %v5849_v41  ;;  %3532 = vmatpush.bf16.msrb.mxu1 %v5596_v55  ;;  %v4415_v39 = vld [vmem:[%s7241_s29 + $0xc8] sm:$0xf]  ;;  %v4928_v54 = vor.u32 %v6519_v49, %v4927_v47 }
 0x125   : > { %v6105_v44 = vld [vmem:[%s7241_s29 + $0xe20] sm:$0xf0]  ;;  %3520 = vmatmul.bf16.vlgmr.msrb.gmra.mxu0 %v7409_v45  ;;  %v4671_v41 = vld [vmem:[%s7241_s29 + $0x2c8] sm:$0xf]  ;;  %v4416_v52 = vor.u32 %v6391_v40, %v4415_v39 }
 0x126   : > { %v6108_v59 = vor.u32 %v6810_v43, %v6105_v44  ;;  %3545 = vmatpush.bf16.msrb.mxu2 %v5852_v56  ;;  %3564 = vmatpush.bf16.msra.mxu0 %v4544_v60  ;;  %v5216_v43 = vor.u32 %v6591_v35, %v5215_v34  ;;  %v6455_v44 = vld [vmem:[%s7241_s29 + $0x2e4] sm:$0xf0] }
 0x127   : > { %3533 = vmatmul.bf16.vlgmr.msrb.gmra.mxu1 %v7413_v48  ;;  %v5183_v50 = vld [vmem:[%s7241_s29 + $0x6c8] sm:$0xf]  ;;  %v4672_v53 = vor.u32 %v6455_v44, %v4671_v41 }
 0x128   : > { %3558 = vmatpush.bf16.msrb.mxu3 %v6108_v59  ;;  %3577 = vmatpush.bf16.msra.mxu1 %v4800_v61  ;;  %v6583_v51 = vld [vmem:[%s7241_s29 + $0x6e4] sm:$0xf0] }
 0x129   : > { %3546 = vmatmul.bf16.vlgmr.msrb.gmra.mxu2 %v7405_v42  ;;  %v4383_v55 = vld [vmem:[%s7241_s29 + $0x88] sm:$0xf]  ;;  %v5184_v58 = vor.u32 %v6583_v51, %v5183_v50 }
 0x12a   : > { %3590 = vmatpush.bf16.msra.mxu2 %v5056_v62  ;;  %3565 = vmatpush.bf16.msra.mxu0 %v4512_v9  ;;  %v6383_v56 = vld [vmem:[%s7241_s29 + $0xa4] sm:$0xf0] }
 0x12b   : > { %3559 = vmatmul.bf16.vlgmr.msrb.gmra.mxu3 %v7411_v46  ;;  %v4639_v57 = vld [vmem:[%s7241_s29 + $0x288] sm:$0xf]  ;;  %v4384_v0 = vor.u32 %v6383_v56, %v4383_v55 }
 0x12c   : > { %3603 = vmatpush.bf16.msra.mxu3 %v5312_v2  ;;  %3578 = vmatpush.bf16.msra.mxu1 %v4768_v10  ;;  %v6447_v59 = vld [vmem:[%s7241_s29 + $0x2a4] sm:$0xf0] }
 0x12d   : > { %v4895_v60 = vld [vmem:[%s7241_s29 + $0x488] sm:$0xf]  ;;  %v4640_v1 = vor.u32 %v6447_v59, %v4639_v57 }
 0x12e   : > { %3591 = vmatpush.bf16.msra.mxu2 %v5024_v11  ;;  %3566 = vmatpush.bf16.msra.mxu0 %v4480_v22  ;;  %v6511_v61 = vld [vmem:[%s7241_s29 + $0x4a4] sm:$0xf0] }
 0x12f   : > { %v5151_v62 = vld [vmem:[%s7241_s29 + $0x688] sm:$0xf]  ;;  %v4896_v2 = vor.u32 %v6511_v61, %v4895_v60 }
 0x130   : > { %3604 = vmatpush.bf16.msra.mxu3 %v5280_v15  ;;  %3579 = vmatpush.bf16.msra.mxu1 %v4736_v23  ;;  %v6575_v63 = vld [vmem:[%s7241_s29 + $0x6a4] sm:$0xf0] }
 0x131   : > { %v4351_v3 = vld [vmem:[%s7241_s29 + $0x48] sm:$0xf]  ;;  %v5152_v6 = vor.u32 %v6575_v63, %v5151_v62 }
 0x132   : > { %3592 = vmatpush.bf16.msra.mxu2 %v4992_v26  ;;  %3567 = vmatpush.bf16.msra.mxu0 %v4448_v36  ;;  %v6375_v4 = vld [vmem:[%s7241_s29 + $0x64] sm:$0xf0] }
 0x133   : > { %v4607_v5 = vld [vmem:[%s7241_s29 + $0x248] sm:$0xf]  ;;  %v4352_v13 = vor.u32 %v6375_v4, %v4351_v3 }
 0x134   : > { %3605 = vmatpush.bf16.msra.mxu3 %v5248_v30  ;;  %3580 = vmatpush.bf16.msra.mxu1 %v4704_v37  ;;  %v6439_v8 = vld [vmem:[%s7241_s29 + $0x264] sm:$0xf0] }
 0x135   : > { %v4863_v9 = vld [vmem:[%s7241_s29 + $0x448] sm:$0xf]  ;;  %v4608_v16 = vor.u32 %v6439_v8, %v4607_v5 }
 0x136   : > { %3593 = vmatpush.bf16.msra.mxu2 %v4960_v38  ;;  %3568 = vmatpush.bf16.msra.mxu0 %v4416_v52  ;;  %v6503_v10 = vld [vmem:[%s7241_s29 + $0x464] sm:$0xf0] }
 0x137   : > { %v5119_v11 = vld [vmem:[%s7241_s29 + $0x648] sm:$0xf]  ;;  %v4864_v18 = vor.u32 %v6503_v10, %v4863_v9 }
 0x138   : > { %3606 = vmatpush.bf16.msra.mxu3 %v5216_v43  ;;  %3581 = vmatpush.bf16.msra.mxu1 %v4672_v53  ;;  %v6567_v12 = vld [vmem:[%s7241_s29 + $0x664] sm:$0xf0] }
 0x139   : > { %v4319_v14 = vld [vmem:[%s7241_s29 + $0x8] sm:$0xf]  ;;  %v5120_v22 = vor.u32 %v6567_v12, %v5119_v11 }
 0x13a   : > { %3594 = vmatpush.bf16.msra.mxu2 %v4928_v54  ;;  %3569 = vmatpush.bf16.msra.mxu0 %v4384_v0  ;;  %v6367_v15 = vld [vmem:[%s7241_s29 + $0x24] sm:$0xf0] }
 0x13b   : > { %v4575_v19 = vld [vmem:[%s7241_s29 + $0x208] sm:$0xf]  ;;  %v4320_v31 = vor.u32 %v6367_v15, %v4319_v14 }
 0x13c   : > { %3607 = vmatpush.bf16.msra.mxu3 %v5184_v58  ;;  %3582 = vmatpush.bf16.msra.mxu1 %v4640_v1  ;;  %v6431_v20 = vld [vmem:[%s7241_s29 + $0x224] sm:$0xf0] }
 0x13d   : > { %v4831_v21 = vld [vmem:[%s7241_s29 + $0x408] sm:$0xf]  ;;  %v4576_v35 = vor.u32 %v6431_v20, %v4575_v19 }
 0x13e   : > { %3595 = vmatpush.bf16.msra.mxu2 %v4896_v2  ;;  %v6495_v23 = vld [vmem:[%s7241_s29 + $0x424] sm:$0xf0]  ;;  %3570 = vmatpush.bf16.msra.mxu0 %v4352_v13 }
 0x13f   : > { %v5087_v26 = vld [vmem:[%s7241_s29 + $0x608] sm:$0xf]  ;;  %v4832_v36 = vor.u32 %v6495_v23, %v4831_v21 }
 0x140   : > { %3608 = vmatpush.bf16.msra.mxu3 %v5152_v6  ;;  %v6559_v27 = vld [vmem:[%s7241_s29 + $0x624] sm:$0xf0]  ;;  %3583 = vmatpush.bf16.msra.mxu1 %v4608_v16 }
 0x141   : > { %v5567_v28 = vld [vmem:[%s7241_s29 + $0x9c8] sm:$0xf]  ;;  %v5088_v39 = vor.u32 %v6559_v27, %v5087_v26 }
 0x142   : > { %v6679_v29 = vld [vmem:[%s7241_s29 + $0x9e4] sm:$0xf0]  ;;  %3596 = vmatpush.bf16.msra.mxu2 %v4864_v18  ;;  %3571 = vmatpush.bf16.msra.mxu0 %v4320_v31 }
 0x143   : > { %v5823_v30 = vld [vmem:[%s7241_s29 + $0xbc8] sm:$0xf]  ;;  %v5568_v40 = vor.u32 %v6679_v29, %v5567_v28 }
 0x144   : > { %v6743_v32 = vld [vmem:[%s7241_s29 + $0xbe4] sm:$0xf0]  ;;  %3609 = vmatpush.bf16.msra.mxu3 %v5120_v22  ;;  %3584 = vmatpush.bf16.msra.mxu1 %v4576_v35 }
 0x145   : > { %v6079_v33 = vld [vmem:[%s7241_s29 + $0xdc8] sm:$0xf]  ;;  %v5824_v41 = vor.u32 %v6743_v32, %v5823_v30  ;;  %3572 = vmatmul.bf16.vlgmr.msra.gmra.mxu0 %v7345_v17 }
 0x146   : > { %v6807_v34 = vld [vmem:[%s7241_s29 + $0xde4] sm:$0xf0]  ;;  %3597 = vmatpush.bf16.msra.mxu2 %v4832_v36  ;;  %3616 = vmatpush.bf16.msrb.mxu0 %v5568_v40 }
 0x147   : > { %v6335_v37 = vld [vmem:[%s7241_s29 + $0xfc8] sm:$0xf]  ;;  %v6080_v43 = vor.u32 %v6807_v34, %v6079_v33  ;;  %3585 = vmatmul.bf16.vlgmr.msra.gmra.mxu1 %v7352_v25  ;;  %v3365_v33 = vpop.f32.mrf.mxu0 }
 0x148   : > { %v6871_v38 = vld [vmem:[%s7241_s29 + $0xfe4] sm:$0xf0]  ;;  %3610 = vmatpush.bf16.msra.mxu3 %v5088_v39  ;;  %3629 = vmatpush.bf16.msrb.mxu1 %v5824_v41 }
 0x149   : > { %v5535_v44 = vld [vmem:[%s7241_s29 + $0x988] sm:$0xf]  ;;  %v6336_v50 = vor.u32 %v6871_v38, %v6335_v37  ;;  %3598 = vmatmul.bf16.vlgmr.msra.gmra.mxu2 %v7337_v7 }
 0x14a   : > { %v6671_v47 = vld [vmem:[%s7241_s29 + $0x9a4] sm:$0xf0]  ;;  %3642 = vmatpush.bf16.msrb.mxu2 %v6080_v43 }
 0x14b   : > { %v5791_v49 = vld [vmem:[%s7241_s29 + $0xb88] sm:$0xf]  ;;  %v5536_v56 = vor.u32 %v6671_v47, %v5535_v44  ;;  %3611 = vmatmul.bf16.vlgmr.msra.gmra.mxu3 %v7350_v24 }
 0x14c   : > { %v6735_v51 = vld [vmem:[%s7241_s29 + $0xba4] sm:$0xf0]  ;;  %3655 = vmatpush.bf16.msrb.mxu3 %v6336_v50  ;;  %v7655_v50 = vpop.f32.mrf.mxu2 }
 0x14d   : > { %v6047_v52 = vld [vmem:[%s7241_s29 + $0xd88] sm:$0xf]  ;;  %v5792_v57 = vor.u32 %v6735_v51, %v5791_v49  ;;  %3617 = vmatpush.bf16.msrb.mxu0 %v5536_v56  ;;  %v3378_v49 = vpop.f32.mrf.mxu1 }
 0x14e   : > { %v6799_v53 = vld [vmem:[%s7241_s29 + $0xda4] sm:$0xf0] }
 0x14f   : > { %v6303_v54 = vld [vmem:[%s7241_s29 + $0xf88] sm:$0xf]  ;;  %v6048_v58 = vor.u32 %v6799_v53, %v6047_v52  ;;  %3630 = vmatpush.bf16.msrb.mxu1 %v5792_v57 }
 0x150   : > { %v6863_v55 = vld [vmem:[%s7241_s29 + $0xfa4] sm:$0xf0] }
 0x151   : > { %v5503_v59 = vld [vmem:[%s7241_s29 + $0x948] sm:$0xf]  ;;  %v6304_v62 = vor.u32 %v6863_v55, %v6303_v54  ;;  %3643 = vmatpush.bf16.msrb.mxu2 %v6048_v58 }
 0x152   : > { %v6663_v60 = vld [vmem:[%s7241_s29 + $0x964] sm:$0xf0] }
 0x153   : > { %v5759_v61 = vld [vmem:[%s7241_s29 + $0xb48] sm:$0xf]  ;;  %v5504_v4 = vor.u32 %v6663_v60, %v5503_v59  ;;  %3656 = vmatpush.bf16.msrb.mxu3 %v6304_v62 }
 0x154   : > { %v6727_v63 = vld [vmem:[%s7241_s29 + $0xb64] sm:$0xf0] }
 0x155   : > { %v6015_v0 = vld [vmem:[%s7241_s29 + $0xd48] sm:$0xf]  ;;  %v5760_v5 = vor.u32 %v6727_v63, %v5759_v61  ;;  %3618 = vmatpush.bf16.msrb.mxu0 %v5504_v4 }
 0x156   : > { %v6791_v1 = vld [vmem:[%s7241_s29 + $0xd64] sm:$0xf0] }
 0x157   : > { %v6271_v2 = vld [vmem:[%s7241_s29 + $0xf48] sm:$0xf]  ;;  %v6016_v6 = vor.u32 %v6791_v1, %v6015_v0  ;;  %3631 = vmatpush.bf16.msrb.mxu1 %v5760_v5  ;;  %v7669_v1 = vpop.f32.mrf.mxu3  ;;  %v3367_v5 = vpop.f32.mrf.mxu0 }
 0x158   : > { %v6855_v3 = vld [vmem:[%s7241_s29 + $0xf64] sm:$0xf0] }
 0x159   : > { %v5471_v8 = vld [vmem:[%s7241_s29 + $0x908] sm:$0xf]  ;;  %v6272_v11 = vor.u32 %v6855_v3, %v6271_v2  ;;  %3644 = vmatpush.bf16.msrb.mxu2 %v6016_v6 }
 0x15a   : > { %v6655_v9 = vld [vmem:[%s7241_s29 + $0x924] sm:$0xf0] }
 0x15b   : > { %v5727_v10 = vld [vmem:[%s7241_s29 + $0xb08] sm:$0xf]  ;;  %v5472_v18 = vor.u32 %v6655_v9, %v5471_v8  ;;  %3657 = vmatpush.bf16.msrb.mxu3 %v6272_v11 }
 0x15c   : > { %v6719_v12 = vld [vmem:[%s7241_s29 + $0xb24] sm:$0xf0] }
 0x15d   : > { %v5983_v13 = vld [vmem:[%s7241_s29 + $0xd08] sm:$0xf]  ;;  %v5728_v19 = vor.u32 %v6719_v12, %v5727_v10  ;;  %3619 = vmatpush.bf16.msrb.mxu0 %v5472_v18  ;;  %v4545_v18 = vld [vmem:[%s7241_s29 + $0x1e8] sm:$0xf0] }
 0x15e   : > { %v6783_v14 = vld [vmem:[%s7241_s29 + $0xd24] sm:$0xf0] }
 0x15f   : > { %v6239_v15 = vld [vmem:[%s7241_s29 + $0xf08] sm:$0xf]  ;;  %v5984_v20 = vor.u32 %v6783_v14, %v5983_v13  ;;  %3632 = vmatpush.bf16.msrb.mxu1 %v5728_v19  ;;  %v6483_v19 = vld [vmem:[%s7241_s29 + $0x3cc] sm:$0xf] }
 0x160   : > { %v6847_v16 = vld [vmem:[%s7241_s29 + $0xf24] sm:$0xf0] }
 0x161   : > { %v5439_v21 = vld [vmem:[%s7241_s29 + $0x8c8] sm:$0xf]  ;;  %v6240_v26 = vor.u32 %v6847_v16, %v6239_v15  ;;  %3645 = vmatpush.bf16.msrb.mxu2 %v5984_v20  ;;  %v6419_v16 = vld [vmem:[%s7241_s29 + $0x1cc] sm:$0xf] }
 0x162   : > { %v6647_v22 = vld [vmem:[%s7241_s29 + $0x8e4] sm:$0xf0] }
 0x163   : > { %v5695_v23 = vld [vmem:[%s7241_s29 + $0xac8] sm:$0xf]  ;;  %v5440_v32 = vor.u32 %v6647_v22, %v5439_v21  ;;  %3658 = vmatpush.bf16.msrb.mxu3 %v6240_v26  ;;  %v3380_v21 = vpop.f32.mrf.mxu1  ;;  %v3393_v22 = vpop.f32.mrf.mxu2  ;;  %v4801_v26 = vld [vmem:[%s7241_s29 + $0x3e8] sm:$0xf0] }
 0x164   : > { %v6711_v27 = vld [vmem:[%s7241_s29 + $0xae4] sm:$0xf0]  ;;  %v6387_v21 = vld [vmem:[%s7241_s29 + $0xcc] sm:$0xf] }
 0x165   : > { %v5951_v28 = vld [vmem:[%s7241_s29 + $0xcc8] sm:$0xf]  ;;  %v5696_v34 = vor.u32 %v6711_v27, %v5695_v23  ;;  %3620 = vmatpush.bf16.msrb.mxu0 %v5440_v32  ;;  %v6547_v27 = vld [vmem:[%s7241_s29 + $0x5cc] sm:$0xf] }
 0x166   : > { %v6775_v29 = vld [vmem:[%s7241_s29 + $0xce4] sm:$0xf0]  ;;  %v5313_v32 = vld [vmem:[%s7241_s29 + $0x7e8] sm:$0xf0] }
 0x167   : > { %v6207_v30 = vld [vmem:[%s7241_s29 + $0xec8] sm:$0xf]  ;;  %v5952_v35 = vor.u32 %v6775_v29, %v5951_v28  ;;  %3633 = vmatpush.bf16.msrb.mxu1 %v5696_v34  ;;  %v5057_v28 = vld [vmem:[%s7241_s29 + $0x5e8] sm:$0xf0]  ;;  %v4548_v34 = vor.u32 %v6419_v16, %v4545_v18  ;;  %v3417_v18 = vpop.f32.mrf.mxu0 }
 0x168   : > { %v6839_v31 = vld [vmem:[%s7241_s29 + $0xee4] sm:$0xf0]  ;;  %v5217_v16 = vld [vmem:[%s7241_s29 + $0x728] sm:$0xf0] }
 0x169   : > { %v5407_v36 = vld [vmem:[%s7241_s29 + $0x888] sm:$0xf]  ;;  %v6208_v39 = vor.u32 %v6839_v31, %v6207_v30  ;;  %3646 = vmatpush.bf16.msrb.mxu2 %v5952_v35  ;;  %v6611_v31 = vld [vmem:[%s7241_s29 + $0x7cc] sm:$0xf]  ;;  %v4804_v35 = vor.u32 %v6483_v19, %v4801_v26 }
 0x16a   : > { %v6639_v37 = vld [vmem:[%s7241_s29 + $0x8a4] sm:$0xf0]  ;;  %v4417_v22 = vld [vmem:[%s7241_s29 + $0xe8] sm:$0xf0] }
 0x16b   : > { %v5663_v38 = vld [vmem:[%s7241_s29 + $0xa88] sm:$0xf]  ;;  %v5408_v51 = vor.u32 %v6639_v37, %v5407_v36  ;;  %3659 = vmatpush.bf16.msrb.mxu3 %v6208_v39  ;;  %v5060_v36 = vor.u32 %v6547_v27, %v5057_v28  ;;  %v4513_v39 = vld [vmem:[%s7241_s29 + $0x1a8] sm:$0xf0]  ;;  %v3430_v27 = vpop.f32.mrf.mxu1 }
 0x16c   : > { %v6703_v40 = vld [vmem:[%s7241_s29 + $0xaa4] sm:$0xf0] }
 0x16d   : > { %v5919_v41 = vld [vmem:[%s7241_s29 + $0xc88] sm:$0xf]  ;;  %v5664_v53 = vor.u32 %v6703_v40, %v5663_v38  ;;  %3621 = vmatpush.bf16.msrb.mxu0 %v5408_v51  ;;  %v6411_v38 = vld [vmem:[%s7241_s29 + $0x18c] sm:$0xf] }
 0x16e   : > { %v6767_v43 = vld [vmem:[%s7241_s29 + $0xca4] sm:$0xf0]  ;;  %v6475_v40 = vld [vmem:[%s7241_s29 + $0x38c] sm:$0xf] }
 0x16f   : > { %v6175_v44 = vld [vmem:[%s7241_s29 + $0xe88] sm:$0xf]  ;;  %v5920_v54 = vor.u32 %v6767_v43, %v5919_v41  ;;  %3634 = vmatpush.bf16.msrb.mxu1 %v5664_v53  ;;  %v3406_v41 = vpop.f32.mrf.mxu3  ;;  %v5316_v43 = vor.u32 %v6611_v31, %v5313_v32  ;;  %v5025_v51 = vld [vmem:[%s7241_s29 + $0x5a8] sm:$0xf0] }
 0x170   : > { %v6831_v47 = vld [vmem:[%s7241_s29 + $0xea4] sm:$0xf0]  ;;  %v6603_v53 = vld [vmem:[%s7241_s29 + $0x78c] sm:$0xf]  ;;  %v3443_v41 = vpop.f32.mrf.mxu2 }
 0x171   : > { %v7658_v52 = vld [vmem:[%s7247_s4] sm:$0xff]  ;;  %v6176_v58 = vor.u32 %v6831_v47, %v6175_v44  ;;  %3647 = vmatpush.bf16.msrb.mxu2 %v5920_v54 }
 0x172   : > { %v5375_v55 = vld [vmem:[%s7241_s29 + $0x848] sm:$0xf]  ;;  %v780_v0 = vperm.slane %v7658_v52, 0  ;;  %v4769_v44 = vld [vmem:[%s7241_s29 + $0x3a8] sm:$0xf0] }
 0x173   : > { %v6631_v56 = vld [vmem:[%s7241_s29 + $0x864] sm:$0xf0]  ;;  %3660 = vmatpush.bf16.msrb.mxu3 %v6176_v58  ;;  %v6539_v47 = vld [vmem:[%s7241_s29 + $0x58c] sm:$0xf] }
 0x174   : > { %v5631_v57 = vld [vmem:[%s7241_s29 + $0xa48] sm:$0xf]  ;;  %v5376_v2 = vor.u32 %v6631_v56, %v5375_v55  ;;  %v3366_v20 = vadd.f32 %v3365_v33, %v780_v0  ;;  %v5281_v54 = vld [vmem:[%s7241_s29 + $0x7a8] sm:$0xf0]  ;;  %v4772_v55 = vor.u32 %v6475_v40, %v4769_v44  ;;  %v5028_v56 = vor.u32 %v6539_v47, %v5025_v51 }
 0x175   : > { %v6695_v59 = vld [vmem:[%s7241_s29 + $0xa64] sm:$0xf0]  ;;  %v6403_v58 = vld [vmem:[%s7241_s29 + $0x14c] sm:$0xf] }
 0x176   : > { %v5887_v60 = vld [vmem:[%s7241_s29 + $0xc48] sm:$0xf]  ;;  %v5632_v6 = vor.u32 %v6695_v59, %v5631_v57  ;;  %3622 = vmatpush.bf16.msrb.mxu0 %v5376_v2  ;;  %v3379_v37 = vadd.f32 %v3378_v49, %v3366_v20  ;;  %v4516_v49 = vor.u32 %v6411_v38, %v4513_v39  ;;  %v4481_v59 = vld [vmem:[%s7241_s29 + $0x168] sm:$0xf0] }
 0x177   : > { %v6759_v61 = vld [vmem:[%s7241_s29 + $0xc64] sm:$0xf0]  ;;  %v4993_v0 = vld [vmem:[%s7241_s29 + $0x568] sm:$0xf0] }
 0x178   : > { %v6143_v62 = vld [vmem:[%s7241_s29 + $0xe48] sm:$0xf]  ;;  %v5888_v8 = vor.u32 %v6759_v61, %v5887_v60  ;;  %3635 = vmatpush.bf16.msrb.mxu1 %v5632_v6  ;;  %v3392_v57 = vadd.f32 %v7655_v50, %v3379_v37  ;;  %v6467_v60 = vld [vmem:[%s7241_s29 + $0x34c] sm:$0xf]  ;;  %v5284_v61 = vor.u32 %v6603_v53, %v5281_v54  ;;  %v3456_v54 = vpop.f32.mrf.mxu3 }
 0x179   : > { %v6823_v63 = vld [vmem:[%s7241_s29 + $0xe64] sm:$0xf0]  ;;  %v6595_v2 = vld [vmem:[%s7241_s29 + $0x74c] sm:$0xf] }
 0x17a   : > { %v5343_v3 = vld [vmem:[%s7241_s29 + $0x808] sm:$0xf]  ;;  %v6144_v12 = vor.u32 %v6823_v63, %v6143_v62  ;;  %3648 = vmatpush.bf16.msrb.mxu2 %v5888_v8  ;;  %v4737_v62 = vld [vmem:[%s7241_s29 + $0x368] sm:$0xf0] }
 0x17b   : > { %v6623_v4 = vld [vmem:[%s7241_s29 + $0x824] sm:$0xf0]  ;;  %v6531_v63 = vld [vmem:[%s7241_s29 + $0x54c] sm:$0xf]  ;;  %v4740_v5 = vor.u32 %v6467_v60, %v4737_v62 }
 0x17c   : > { %v5599_v9 = vld [vmem:[%s7241_s29 + $0xa08] sm:$0xf]  ;;  %v5344_v23 = vor.u32 %v6623_v4, %v5343_v3  ;;  %3661 = vmatpush.bf16.msrb.mxu3 %v6144_v12  ;;  %v5249_v50 = vld [vmem:[%s7241_s29 + $0x768] sm:$0xf0]  ;;  %v4484_v3 = vor.u32 %v6403_v58, %v4481_v59  ;;  %v3405_v4 = vadd.f32 %v7669_v1, %v3392_v57  ;;  %v4996_v6 = vor.u32 %v6531_v63, %v4993_v0  ;;  %v3419_v59 = vpop.f32.mrf.mxu0 }
 0x17d   : > { %v6687_v10 = vld [vmem:[%s7241_s29 + $0xa24] sm:$0xf0]  ;;  %v6395_v8 = vld [vmem:[%s7241_s29 + $0x10c] sm:$0xf] }
 0x17e   : > { %v5855_v11 = vld [vmem:[%s7241_s29 + $0xc08] sm:$0xf]  ;;  %v5600_v29 = vor.u32 %v6687_v10, %v5599_v9  ;;  %3623 = vmatpush.bf16.msrb.mxu0 %v5344_v23  ;;  %v4449_v9 = vld [vmem:[%s7241_s29 + $0x128] sm:$0xf0]  ;;  %v3418_v26 = vadd.f32 %v3417_v18, %v3405_v4 }
 0x17f   : > { %v6751_v13 = vld [vmem:[%s7241_s29 + $0xc24] sm:$0xf0]  ;;  %v6459_v10 = vld [vmem:[%s7241_s29 + $0x30c] sm:$0xf]  ;;  %v4452_v1 = vor.u32 %v6395_v8, %v4449_v9 }
 0x180   : > { %v6111_v14 = vld [vmem:[%s7241_s29 + $0xe08] sm:$0xf]  ;;  %v5856_v30 = vor.u32 %v6751_v13, %v5855_v11  ;;  %3636 = vmatpush.bf16.msrb.mxu1 %v5600_v29  ;;  %v5252_v11 = vor.u32 %v6595_v2, %v5249_v50  ;;  %v4705_v12 = vld [vmem:[%s7241_s29 + $0x328] sm:$0xf0]  ;;  %v3432_v2 = vpop.f32.mrf.mxu1 }
 0x181   : > { %v6815_v15 = vld [vmem:[%s7241_s29 + $0xe24] sm:$0xf0]  ;;  %3624 = vmatmul.bf16.vlgmr.msrb.gmra.mxu0 %v7409_v45  ;;  %v6523_v13 = vld [vmem:[%s7241_s29 + $0x50c] sm:$0xf]  ;;  %v4708_v19 = vor.u32 %v6459_v10, %v4705_v12 }
 0x182   : > { %v6112_v33 = vor.u32 %v6815_v15, %v6111_v14  ;;  %3649 = vmatpush.bf16.msrb.mxu2 %v5856_v30  ;;  %3668 = vmatpush.bf16.msra.mxu0 %v4548_v34  ;;  %v4961_v14 = vld [vmem:[%s7241_s29 + $0x528] sm:$0xf0]  ;;  %v3431_v34 = vadd.f32 %v3430_v27, %v3418_v26 }
 0x183   : > { %3637 = vmatmul.bf16.vlgmr.msrb.gmra.mxu1 %v7413_v48  ;;  %v6587_v15 = vld [vmem:[%s7241_s29 + $0x70c] sm:$0xf]  ;;  %v4964_v20 = vor.u32 %v6523_v13, %v4961_v14 }
 0x184   : > { %3662 = vmatpush.bf16.msrb.mxu3 %v6112_v33  ;;  %3681 = vmatpush.bf16.msra.mxu1 %v4804_v35  ;;  %v6451_v23 = vld [vmem:[%s7241_s29 + $0x2cc] sm:$0xf]  ;;  %v5220_v28 = vor.u32 %v6587_v15, %v5217_v16  ;;  %v4420_v35 = vor.u32 %v6387_v21, %v4417_v22  ;;  %v3444_v53 = vadd.f32 %v3443_v41, %v3431_v34  ;;  %v3458_v22 = vpop.f32.mrf.mxu3 }
 0x185   : > { %3650 = vmatmul.bf16.vlgmr.msrb.gmra.mxu2 %v7405_v42  ;;  %v4673_v29 = vld [vmem:[%s7241_s29 + $0x2e8] sm:$0xf0] }
 0x186   : > { %3694 = vmatpush.bf16.msra.mxu2 %v5060_v36  ;;  %3669 = vmatpush.bf16.msra.mxu0 %v4516_v49  ;;  %v6515_v30 = vld [vmem:[%s7241_s29 + $0x4cc] sm:$0xf]  ;;  %v4676_v36 = vor.u32 %v6451_v23, %v4673_v29  ;;  %v3457_v57 = vadd.f32 %v3456_v54, %v3444_v53 }
 0x187   : > { %3663 = vmatmul.bf16.vlgmr.msrb.gmra.mxu3 %v7411_v46  ;;  %v4929_v31 = vld [vmem:[%s7241_s29 + $0x4e8] sm:$0xf0] }
 0x188   : > { %3707 = vmatpush.bf16.msra.mxu3 %v5316_v43  ;;  %3682 = vmatpush.bf16.msra.mxu1 %v4772_v55  ;;  %v6579_v32 = vld [vmem:[%s7241_s29 + $0x6cc] sm:$0xf]  ;;  %v4932_v37 = vor.u32 %v6515_v30, %v4929_v31 }
 0x189   : > { %v5185_v33 = vld [vmem:[%s7241_s29 + $0x6e8] sm:$0xf0] }
 0x18a   : > { %3695 = vmatpush.bf16.msra.mxu2 %v5028_v56  ;;  %3670 = vmatpush.bf16.msra.mxu0 %v4484_v3  ;;  %v6379_v38 = vld [vmem:[%s7241_s29 + $0x8c] sm:$0xf]  ;;  %v5188_v43 = vor.u32 %v6579_v32, %v5185_v33  ;;  %v4188_v3 = vmax.f32 %v3457_v57, 0.0 }
 0x18b   : > { %v4385_v39 = vld [vmem:[%s7241_s29 + $0xa8] sm:$0xf0] }
 0x18c   : > { %3708 = vmatpush.bf16.msra.mxu3 %v5284_v61  ;;  %3683 = vmatpush.bf16.msra.mxu1 %v4740_v5  ;;  %v6443_v40 = vld [vmem:[%s7241_s29 + $0x28c] sm:$0xf]  ;;  %v4388_v56 = vor.u32 %v6379_v38, %v4385_v39  ;;  %4196 = vst [vmem:[#allocation8] sm:$0xff] %v4188_v3 }
 0x18d   : > { %v4641_v44 = vld [vmem:[%s7241_s29 + $0x2a8] sm:$0xf0] }
 0x18e   : > { %3696 = vmatpush.bf16.msra.mxu2 %v4996_v6  ;;  %3671 = vmatpush.bf16.msra.mxu0 %v4452_v1  ;;  %v6507_v47 = vld [vmem:[%s7241_s29 + $0x48c] sm:$0xf]  ;;  %v4644_v60 = vor.u32 %v6443_v40, %v4641_v44  ;;  %v3445_v1 = vpop.f32.mrf.mxu2 }
 0x18f   : > { %v4897_v51 = vld [vmem:[%s7241_s29 + $0x4a8] sm:$0xf0]  ;;  %v7785_v1 = vpop.f32.mrf.mxu0 }
 0x190   : > { %3709 = vmatpush.bf16.msra.mxu3 %v5252_v11  ;;  %3684 = vmatpush.bf16.msra.mxu1 %v4708_v19  ;;  %v6571_v49 = vld [vmem:[%s7241_s29 + $0x68c] sm:$0xf]  ;;  %v4900_v61 = vor.u32 %v6507_v47, %v4897_v51 }
 0x191   : > { %v5153_v55 = vld [vmem:[%s7241_s29 + $0x6a8] sm:$0xf0] }
 0x192   : > { %3697 = vmatpush.bf16.msra.mxu2 %v4964_v20  ;;  %3672 = vmatpush.bf16.msra.mxu0 %v4420_v35  ;;  %v6371_v58 = vld [vmem:[%s7241_s29 + $0x4c] sm:$0xf]  ;;  %v5156_v50 = vor.u32 %v6571_v49, %v5153_v55 }
 0x193   : > { %v4353_v62 = vld [vmem:[%s7241_s29 + $0x68] sm:$0xf0] }
 0x194   : > { %3710 = vmatpush.bf16.msra.mxu3 %v5220_v28  ;;  %3685 = vmatpush.bf16.msra.mxu1 %v4676_v36  ;;  %v6435_v63 = vld [vmem:[%s7241_s29 + $0x24c] sm:$0xf]  ;;  %v4356_v9 = vor.u32 %v6371_v58, %v4353_v62 }
 0x195   : > { %v4609_v0 = vld [vmem:[%s7241_s29 + $0x268] sm:$0xf0] }
 0x196   : > { %3698 = vmatpush.bf16.msra.mxu2 %v4932_v37  ;;  %v6499_v4 = vld [vmem:[%s7241_s29 + $0x44c] sm:$0xf]  ;;  %3673 = vmatpush.bf16.msra.mxu0 %v4388_v56  ;;  %v4612_v12 = vor.u32 %v6435_v63, %v4609_v0 }
 0x197   : > { %v4865_v5 = vld [vmem:[%s7241_s29 + $0x468] sm:$0xf0] }
 0x198   : > { %3711 = vmatpush.bf16.msra.mxu3 %v5188_v43  ;;  %v6563_v6 = vld [vmem:[%s7241_s29 + $0x64c] sm:$0xf]  ;;  %3686 = vmatpush.bf16.msra.mxu1 %v4644_v60  ;;  %v4868_v13 = vor.u32 %v6499_v4, %v4865_v5 }
 0x199   : > { %v5121_v8 = vld [vmem:[%s7241_s29 + $0x668] sm:$0xf0] }
 0x19a   : > { %v6363_v10 = vld [vmem:[%s7241_s29 + $0xc] sm:$0xf]  ;;  %3699 = vmatpush.bf16.msra.mxu2 %v4900_v61  ;;  %v5124_v18 = vor.u32 %v6563_v6, %v5121_v8  ;;  %3674 = vmatpush.bf16.msra.mxu0 %v4356_v9 }
 0x19b   : > { %v4321_v11 = vld [vmem:[%s7241_s29 + $0x28] sm:$0xf0] }
 0x19c   : > { %v6427_v14 = vld [vmem:[%s7241_s29 + $0x20c] sm:$0xf]  ;;  %3712 = vmatpush.bf16.msra.mxu3 %v5156_v50  ;;  %v4324_v28 = vor.u32 %v6363_v10, %v4321_v11  ;;  %3687 = vmatpush.bf16.msra.mxu1 %v4612_v12 }
 0x19d   : > { %v4577_v15 = vld [vmem:[%s7241_s29 + $0x228] sm:$0xf0] }
 0x19e   : > { %v6491_v16 = vld [vmem:[%s7241_s29 + $0x40c] sm:$0xf]  ;;  %3700 = vmatpush.bf16.msra.mxu2 %v4868_v13  ;;  %v4580_v32 = vor.u32 %v6427_v14, %v4577_v15  ;;  %3675 = vmatpush.bf16.msra.mxu0 %v4324_v28 }
 0x19f   : > { %v4833_v19 = vld [vmem:[%s7241_s29 + $0x428] sm:$0xf0] }
 0x1a0   : > { %v6555_v20 = vld [vmem:[%s7241_s29 + $0x60c] sm:$0xf]  ;;  %v4836_v33 = vor.u32 %v6491_v16, %v4833_v19  ;;  %3713 = vmatpush.bf16.msra.mxu3 %v5124_v18  ;;  %3688 = vmatpush.bf16.msra.mxu1 %v4580_v32 }
 0x1a1   : > { %v5089_v21 = vld [vmem:[%s7241_s29 + $0x628] sm:$0xf0]  ;;  %3676 = vmatmul.bf16.vlgmr.msra.gmra.mxu0 %v7345_v17 }
 0x1a2   : > { %v6675_v23 = vld [vmem:[%s7241_s29 + $0x9cc] sm:$0xf]  ;;  %v5092_v36 = vor.u32 %v6555_v20, %v5089_v21  ;;  %3701 = vmatpush.bf16.msra.mxu2 %v4836_v33 }
 0x1a3   : > { %v5569_v26 = vld [vmem:[%s7241_s29 + $0x9e8] sm:$0xf0]  ;;  %3689 = vmatmul.bf16.vlgmr.msra.gmra.mxu1 %v7352_v25 }
 0x1a4   : > { %v6739_v27 = vld [vmem:[%s7241_s29 + $0xbcc] sm:$0xf]  ;;  %v5572_v37 = vor.u32 %v6675_v23, %v5569_v26  ;;  %3714 = vmatpush.bf16.msra.mxu3 %v5092_v36  ;;  %v7790_v23 = vpop.f32.mrf.mxu1 }
 0x1a5   : > { %v5825_v29 = vld [vmem:[%s7241_s29 + $0xbe8] sm:$0xf0]  ;;  %3702 = vmatmul.bf16.vlgmr.msra.gmra.mxu2 %v7337_v7 }
 0x1a6   : > { %v6803_v30 = vld [vmem:[%s7241_s29 + $0xdcc] sm:$0xf]  ;;  %v5828_v38 = vor.u32 %v6739_v27, %v5825_v29  ;;  %3720 = vmatpush.bf16.msrb.mxu0 %v5572_v37 }
 0x1a7   : > { %v6081_v31 = vld [vmem:[%s7241_s29 + $0xde8] sm:$0xf0]  ;;  %3715 = vmatmul.bf16.vlgmr.msra.gmra.mxu3 %v7350_v24 }
 0x1a8   : > { %v6867_v34 = vld [vmem:[%s7241_s29 + $0xfcc] sm:$0xf]  ;;  %v6084_v39 = vor.u32 %v6803_v30, %v6081_v31  ;;  %3733 = vmatpush.bf16.msrb.mxu1 %v5828_v38  ;;  %v7800_v38 = vpop.f32.mrf.mxu2 }
 0x1a9   : > { %v6337_v35 = vld [vmem:[%s7241_s29 + $0xfe8] sm:$0xf0] }
 0x1aa   : > { %v6667_v40 = vld [vmem:[%s7241_s29 + $0x98c] sm:$0xf]  ;;  %v6340_v44 = vor.u32 %v6867_v34, %v6337_v35  ;;  %3746 = vmatpush.bf16.msrb.mxu2 %v6084_v39 }
 0x1ab   : > { %v5537_v41 = vld [vmem:[%s7241_s29 + $0x9a8] sm:$0xf0] }
 0x1ac   : > { %v6731_v43 = vld [vmem:[%s7241_s29 + $0xb8c] sm:$0xf]  ;;  %v5540_v55 = vor.u32 %v6667_v40, %v5537_v41  ;;  %3759 = vmatpush.bf16.msrb.mxu3 %v6340_v44  ;;  %v7805_v44 = vpop.f32.mrf.mxu3 }
 0x1ad   : > { %v5793_v47 = vld [vmem:[%s7241_s29 + $0xba8] sm:$0xf0] }
 0x1ae   : > { %v6795_v51 = vld [vmem:[%s7241_s29 + $0xd8c] sm:$0xf]  ;;  %v5796_v56 = vor.u32 %v6731_v43, %v5793_v47  ;;  %3721 = vmatpush.bf16.msrb.mxu0 %v5540_v55 }
 0x1af   : > { %v6049_v53 = vld [vmem:[%s7241_s29 + $0xda8] sm:$0xf0] }
 0x1b0   : > { %v6859_v54 = vld [vmem:[%s7241_s29 + $0xf8c] sm:$0xf]  ;;  %v6052_v57 = vor.u32 %v6795_v51, %v6049_v53  ;;  %3734 = vmatpush.bf16.msrb.mxu1 %v5796_v56 }
 0x1b1   : > { %v6305_v49 = vld [vmem:[%s7241_s29 + $0xfa8] sm:$0xf0] }
 0x1b2   : > { %v6659_v58 = vld [vmem:[%s7241_s29 + $0x94c] sm:$0xf]  ;;  %v6308_v61 = vor.u32 %v6859_v54, %v6305_v49  ;;  %3747 = vmatpush.bf16.msrb.mxu2 %v6052_v57  ;;  %v3471_v54 = vpop.f32.mrf.mxu0 }
 0x1b3   : > { %v5505_v59 = vld [vmem:[%s7241_s29 + $0x968] sm:$0xf0]  ;;  %v6608_v54 = vld [vmem:[%s7241_s29 + $0x7ac] sm:$0xf0] }
 0x1b4   : > { %v6723_v60 = vld [vmem:[%s7241_s29 + $0xb4c] sm:$0xf]  ;;  %v5508_v3 = vor.u32 %v6659_v58, %v5505_v59  ;;  %3760 = vmatpush.bf16.msrb.mxu3 %v6308_v61  ;;  %v3484_v59 = vpop.f32.mrf.mxu1 }
 0x1b5   : > { %v5761_v62 = vld [vmem:[%s7241_s29 + $0xb68] sm:$0xf0]  ;;  %v4743_v59 = vld [vmem:[%s7241_s29 + $0x350] sm:$0xf] }
 0x1b6   : > { %v6787_v63 = vld [vmem:[%s7241_s29 + $0xd4c] sm:$0xf]  ;;  %v5764_v4 = vor.u32 %v6723_v60, %v5761_v62  ;;  %3722 = vmatpush.bf16.msrb.mxu0 %v5508_v3 }
 0x1b7   : > { %v6017_v0 = vld [vmem:[%s7241_s29 + $0xd68] sm:$0xf0] }
 0x1b8   : > { %v6851_v2 = vld [vmem:[%s7241_s29 + $0xf4c] sm:$0xf]  ;;  %v6020_v5 = vor.u32 %v6787_v63, %v6017_v0  ;;  %3735 = vmatpush.bf16.msrb.mxu1 %v5764_v4 }
 0x1b9   : > { %v6273_v50 = vld [vmem:[%s7241_s29 + $0xf68] sm:$0xf0] }
 0x1ba   : > { %v6651_v6 = vld [vmem:[%s7241_s29 + $0x90c] sm:$0xf]  ;;  %v6276_v10 = vor.u32 %v6851_v2, %v6273_v50  ;;  %3748 = vmatpush.bf16.msrb.mxu2 %v6020_v5  ;;  %v781_v50 = vperm.slane %v7658_v52, 1  ;;  %v3497_v52 = vpop.f32.mrf.mxu2 }
 0x1bb   : > { %v5473_v8 = vld [vmem:[%s7241_s29 + $0x928] sm:$0xf0]  ;;  %v6528_v52 = vld [vmem:[%s7241_s29 + $0x52c] sm:$0xf0] }
 0x1bc   : > { %v6715_v9 = vld [vmem:[%s7241_s29 + $0xb0c] sm:$0xf]  ;;  %v5476_v16 = vor.u32 %v6651_v6, %v5473_v8  ;;  %3761 = vmatpush.bf16.msrb.mxu3 %v6276_v10 }
 0x1bd   : > { %v5729_v11 = vld [vmem:[%s7241_s29 + $0xb28] sm:$0xf0] }
 0x1be   : > { %v6779_v12 = vld [vmem:[%s7241_s29 + $0xd0c] sm:$0xf]  ;;  %v5732_v18 = vor.u32 %v6715_v9, %v5729_v11  ;;  %3723 = vmatpush.bf16.msrb.mxu0 %v5476_v16  ;;  %v3510_v16 = vpop.f32.mrf.mxu3 }
 0x1bf   : > { %v5985_v13 = vld [vmem:[%s7241_s29 + $0xd28] sm:$0xf0] }
 0x1c0   : > { %v6843_v14 = vld [vmem:[%s7241_s29 + $0xf0c] sm:$0xf]  ;;  %v5988_v19 = vor.u32 %v6779_v12, %v5985_v13  ;;  %3736 = vmatpush.bf16.msrb.mxu1 %v5732_v18  ;;  %v4551_v18 = vld [vmem:[%s7241_s29 + $0x1d0] sm:$0xf] }
 0x1c1   : > { %v6241_v15 = vld [vmem:[%s7241_s29 + $0xf28] sm:$0xf0] }
 0x1c2   : > { %v6643_v20 = vld [vmem:[%s7241_s29 + $0x8cc] sm:$0xf]  ;;  %v6244_v26 = vor.u32 %v6843_v14, %v6241_v15  ;;  %3749 = vmatpush.bf16.msrb.mxu2 %v5988_v19  ;;  %v6424_v19 = vld [vmem:[%s7241_s29 + $0x1ec] sm:$0xf0] }
 0x1c3   : > { %v5441_v21 = vld [vmem:[%s7241_s29 + $0x8e8] sm:$0xf0] }
 0x1c4   : > { %v6707_v22 = vld [vmem:[%s7241_s29 + $0xacc] sm:$0xf]  ;;  %v5444_v32 = vor.u32 %v6643_v20, %v5441_v21  ;;  %3762 = vmatpush.bf16.msrb.mxu3 %v6244_v26  ;;  %v4807_v20 = vld [vmem:[%s7241_s29 + $0x3d0] sm:$0xf]  ;;  %v3470_v21 = vadd.f32 %v7785_v1, %v781_v50 }
 0x1c5   : > { %v5697_v27 = vld [vmem:[%s7241_s29 + $0xae8] sm:$0xf0]  ;;  %v6488_v26 = vld [vmem:[%s7241_s29 + $0x3ec] sm:$0xf0] }
 0x1c6   : > { %v6771_v28 = vld [vmem:[%s7241_s29 + $0xccc] sm:$0xf]  ;;  %v5700_v33 = vor.u32 %v6707_v22, %v5697_v27  ;;  %3724 = vmatpush.bf16.msrb.mxu0 %v5444_v32  ;;  %v5063_v27 = vld [vmem:[%s7241_s29 + $0x5d0] sm:$0xf] }
 0x1c7   : > { %v5953_v29 = vld [vmem:[%s7241_s29 + $0xce8] sm:$0xf0]  ;;  %v6616_v32 = vld [vmem:[%s7241_s29 + $0x7ec] sm:$0xf0] }
 0x1c8   : > { %v6835_v30 = vld [vmem:[%s7241_s29 + $0xecc] sm:$0xf]  ;;  %v5956_v34 = vor.u32 %v6771_v28, %v5953_v29  ;;  %3737 = vmatpush.bf16.msrb.mxu1 %v5700_v33  ;;  %v6552_v28 = vld [vmem:[%s7241_s29 + $0x5ec] sm:$0xf0]  ;;  %v4552_v33 = vor.u32 %v6424_v19, %v4551_v18 }
 0x1c9   : > { %v6209_v31 = vld [vmem:[%s7241_s29 + $0xee8] sm:$0xf0]  ;;  %v4423_v18 = vld [vmem:[%s7241_s29 + $0xd0] sm:$0xf] }
 0x1ca   : > { %v6635_v35 = vld [vmem:[%s7241_s29 + $0x88c] sm:$0xf]  ;;  %v6212_v39 = vor.u32 %v6835_v30, %v6209_v31  ;;  %3750 = vmatpush.bf16.msrb.mxu2 %v5956_v34  ;;  %v5319_v31 = vld [vmem:[%s7241_s29 + $0x7d0] sm:$0xf]  ;;  %v4808_v34 = vor.u32 %v6488_v26, %v4807_v20 }
 0x1cb   : > { %v5409_v36 = vld [vmem:[%s7241_s29 + $0x8a8] sm:$0xf0]  ;;  %v6392_v19 = vld [vmem:[%s7241_s29 + $0xec] sm:$0xf0] }
 0x1cc   : > { %v6699_v37 = vld [vmem:[%s7241_s29 + $0xa8c] sm:$0xf]  ;;  %v5412_v53 = vor.u32 %v6635_v35, %v5409_v36  ;;  %3763 = vmatpush.bf16.msrb.mxu3 %v6212_v39  ;;  %v5064_v35 = vor.u32 %v6552_v28, %v5063_v27  ;;  %v3483_v36 = vadd.f32 %v7790_v23, %v3470_v21  ;;  %v6416_v39 = vld [vmem:[%s7241_s29 + $0x1ac] sm:$0xf0] }
 0x1cd   : > { %v5665_v40 = vld [vmem:[%s7241_s29 + $0xaa8] sm:$0xf0]  ;;  %v4679_v20 = vld [vmem:[%s7241_s29 + $0x2d0] sm:$0xf] }
 0x1ce   : > { %v6763_v41 = vld [vmem:[%s7241_s29 + $0xc8c] sm:$0xf]  ;;  %v5668_v49 = vor.u32 %v6699_v37, %v5665_v40  ;;  %3725 = vmatpush.bf16.msrb.mxu0 %v5412_v53  ;;  %v4519_v37 = vld [vmem:[%s7241_s29 + $0x190] sm:$0xf] }
 0x1cf   : > { %v5921_v43 = vld [vmem:[%s7241_s29 + $0xca8] sm:$0xf0]  ;;  %v4775_v40 = vld [vmem:[%s7241_s29 + $0x390] sm:$0xf]  ;;  %v4520_v23 = vor.u32 %v6416_v39, %v4519_v37  ;;  %v3547_v39 = vpop.f32.mrf.mxu2 }
 0x1d0   : > { %v6827_v47 = vld [vmem:[%s7241_s29 + $0xe8c] sm:$0xf]  ;;  %v5924_v55 = vor.u32 %v6763_v41, %v5921_v43  ;;  %3738 = vmatpush.bf16.msrb.mxu1 %v5668_v49  ;;  %v5320_v41 = vor.u32 %v6616_v32, %v5319_v31  ;;  %v6480_v43 = vld [vmem:[%s7241_s29 + $0x3ac] sm:$0xf0] }
 0x1d1   : > { %v6177_v51 = vld [vmem:[%s7241_s29 + $0xea8] sm:$0xf0]  ;;  %v5287_v53 = vld [vmem:[%s7241_s29 + $0x790] sm:$0xf]  ;;  %v4776_v49 = vor.u32 %v6480_v43, %v4775_v40 }
 0x1d2   : > { %v6627_v56 = vld [vmem:[%s7241_s29 + $0x84c] sm:$0xf]  ;;  %v6180_v60 = vor.u32 %v6827_v47, %v6177_v51  ;;  %3751 = vmatpush.bf16.msrb.mxu2 %v5924_v55  ;;  %v5031_v47 = vld [vmem:[%s7241_s29 + $0x590] sm:$0xf] }
 0x1d3   : > { %v5377_v57 = vld [vmem:[%s7241_s29 + $0x868] sm:$0xf0]  ;;  %v6544_v51 = vld [vmem:[%s7241_s29 + $0x5ac] sm:$0xf0] }
 0x1d4   : > { %v6691_v58 = vld [vmem:[%s7241_s29 + $0xa4c] sm:$0xf]  ;;  %v5380_v3 = vor.u32 %v6627_v56, %v5377_v57  ;;  %3764 = vmatpush.bf16.msrb.mxu3 %v6180_v60  ;;  %v5032_v55 = vor.u32 %v6544_v51, %v5031_v47  ;;  %v3496_v56 = vadd.f32 %v7800_v38, %v3483_v36  ;;  %v4487_v57 = vld [vmem:[%s7241_s29 + $0x150] sm:$0xf]  ;;  %v5288_v60 = vor.u32 %v6608_v54, %v5287_v53  ;;  %v3560_v53 = vpop.f32.mrf.mxu3 }
 0x1d5   : > { %v5633_v61 = vld [vmem:[%s7241_s29 + $0xa68] sm:$0xf0]  ;;  %v6600_v38 = vld [vmem:[%s7241_s29 + $0x76c] sm:$0xf0] }
 0x1d6   : > { %v6755_v62 = vld [vmem:[%s7241_s29 + $0xc4c] sm:$0xf]  ;;  %v5636_v6 = vor.u32 %v6691_v58, %v5633_v61  ;;  %3726 = vmatpush.bf16.msrb.mxu0 %v5380_v3  ;;  %v6408_v58 = vld [vmem:[%s7241_s29 + $0x16c] sm:$0xf0]  ;;  %v3509_v50 = vadd.f32 %v7805_v44, %v3496_v56 }
 0x1d7   : > { %v5889_v63 = vld [vmem:[%s7241_s29 + $0xc68] sm:$0xf0]  ;;  %v6472_v61 = vld [vmem:[%s7241_s29 + $0x36c] sm:$0xf0] }
 0x1d8   : > { %v6819_v0 = vld [vmem:[%s7241_s29 + $0xe4c] sm:$0xf]  ;;  %v5892_v8 = vor.u32 %v6755_v62, %v5889_v63  ;;  %3739 = vmatpush.bf16.msrb.mxu1 %v5636_v6  ;;  %v4999_v62 = vld [vmem:[%s7241_s29 + $0x550] sm:$0xf]  ;;  %v4744_v3 = vor.u32 %v6472_v61, %v4743_v59 }
 0x1d9   : > { %v6145_v2 = vld [vmem:[%s7241_s29 + $0xe68] sm:$0xf0]  ;;  %v6536_v63 = vld [vmem:[%s7241_s29 + $0x56c] sm:$0xf0] }
 0x1da   : > { %v6619_v4 = vld [vmem:[%s7241_s29 + $0x80c] sm:$0xf]  ;;  %v6148_v12 = vor.u32 %v6819_v0, %v6145_v2  ;;  %3752 = vmatpush.bf16.msrb.mxu2 %v5892_v8  ;;  %v5255_v0 = vld [vmem:[%s7241_s29 + $0x750] sm:$0xf]  ;;  %v4488_v2 = vor.u32 %v6408_v58, %v4487_v57 }
 0x1db   : > { %v5345_v5 = vld [vmem:[%s7241_s29 + $0x828] sm:$0xf0]  ;;  %v6400_v6 = vld [vmem:[%s7241_s29 + $0x12c] sm:$0xf0] }
 0x1dc   : > { %v6683_v9 = vld [vmem:[%s7241_s29 + $0xa0c] sm:$0xf]  ;;  %v5348_v22 = vor.u32 %v6619_v4, %v5345_v5  ;;  %3765 = vmatpush.bf16.msrb.mxu3 %v6148_v12  ;;  %v5000_v4 = vor.u32 %v6536_v63, %v4999_v62  ;;  %v4455_v5 = vld [vmem:[%s7241_s29 + $0x110] sm:$0xf] }
 0x1dd   : > { %v5601_v10 = vld [vmem:[%s7241_s29 + $0xa28] sm:$0xf0]  ;;  %v4711_v8 = vld [vmem:[%s7241_s29 + $0x310] sm:$0xf]  ;;  %v4456_v44 = vor.u32 %v6400_v6, %v4455_v5 }
 0x1de   : > { %v6747_v11 = vld [vmem:[%s7241_s29 + $0xc0c] sm:$0xf]  ;;  %v5604_v29 = vor.u32 %v6683_v9, %v5601_v10  ;;  %3727 = vmatpush.bf16.msrb.mxu0 %v5348_v22  ;;  %v5256_v9 = vor.u32 %v6600_v38, %v5255_v0  ;;  %v6464_v10 = vld [vmem:[%s7241_s29 + $0x32c] sm:$0xf0]  ;;  %v3534_v22 = vpop.f32.mrf.mxu1 }
 0x1df   : > { %v5857_v13 = vld [vmem:[%s7241_s29 + $0xc28] sm:$0xf0]  ;;  %v5223_v12 = vld [vmem:[%s7241_s29 + $0x710] sm:$0xf] }
 0x1e0   : > { %v6811_v14 = vld [vmem:[%s7241_s29 + $0xe0c] sm:$0xf]  ;;  %v5860_v30 = vor.u32 %v6747_v11, %v5857_v13  ;;  %3740 = vmatpush.bf16.msrb.mxu1 %v5604_v29  ;;  %v4967_v11 = vld [vmem:[%s7241_s29 + $0x510] sm:$0xf] }
 0x1e1   : > { %v6113_v15 = vld [vmem:[%s7241_s29 + $0xe28] sm:$0xf0]  ;;  %3728 = vmatmul.bf16.vlgmr.msrb.gmra.mxu0 %v7409_v45  ;;  %v6592_v13 = vld [vmem:[%s7241_s29 + $0x72c] sm:$0xf0]  ;;  %v4968_v16 = vor.u32 %v6528_v52, %v4967_v11 }
 0x1e2   : > { %v6116_v1 = vor.u32 %v6811_v14, %v6113_v15  ;;  %3753 = vmatpush.bf16.msrb.mxu2 %v5860_v30  ;;  %3772 = vmatpush.bf16.msra.mxu0 %v4552_v33  ;;  %v3521_v14 = vpop.f32.mrf.mxu0  ;;  %v4712_v15 = vor.u32 %v6464_v10, %v4711_v8  ;;  %v5224_v26 = vor.u32 %v6592_v13, %v5223_v12  ;;  %v6456_v27 = vld [vmem:[%s7241_s29 + $0x2ec] sm:$0xf0]  ;;  %v3549_v13 = vpop.f32.mrf.mxu2 }
 0x1e3   : > { %3741 = vmatmul.bf16.vlgmr.msrb.gmra.mxu1 %v7413_v48  ;;  %v3522_v21 = vadd.f32 %v3521_v14, %v3509_v50  ;;  %v4935_v28 = vld [vmem:[%s7241_s29 + $0x4d0] sm:$0xf]  ;;  %v4680_v33 = vor.u32 %v6456_v27, %v4679_v20 }
 0x1e4   : > { %3766 = vmatpush.bf16.msrb.mxu3 %v6116_v1  ;;  %3785 = vmatpush.bf16.msra.mxu1 %v4808_v34  ;;  %v6520_v29 = vld [vmem:[%s7241_s29 + $0x4ec] sm:$0xf0]  ;;  %v4424_v1 = vor.u32 %v6392_v19, %v4423_v18  ;;  %v3562_v18 = vpop.f32.mrf.mxu3 }
 0x1e5   : > { %3754 = vmatmul.bf16.vlgmr.msrb.gmra.mxu2 %v7405_v42  ;;  %v5191_v30 = vld [vmem:[%s7241_s29 + $0x6d0] sm:$0xf]  ;;  %v3535_v32 = vadd.f32 %v3534_v22, %v3522_v21  ;;  %v4936_v34 = vor.u32 %v6520_v29, %v4935_v28 }
 0x1e6   : > { %3798 = vmatpush.bf16.msra.mxu2 %v5064_v35  ;;  %3773 = vmatpush.bf16.msra.mxu0 %v4520_v23  ;;  %v6584_v31 = vld [vmem:[%s7241_s29 + $0x6ec] sm:$0xf0]  ;;  %v3536_v63 = vpop.f32.mrf.mxu1 }
 0x1e7   : > { %3767 = vmatmul.bf16.vlgmr.msrb.gmra.mxu3 %v7411_v46  ;;  %v4391_v35 = vld [vmem:[%s7241_s29 + $0x90] sm:$0xf]  ;;  %v5192_v40 = vor.u32 %v6584_v31, %v5191_v30  ;;  %v3548_v51 = vadd.f32 %v3547_v39, %v3535_v32 }
 0x1e8   : > { %3811 = vmatpush.bf16.msra.mxu3 %v5320_v41  ;;  %3786 = vmatpush.bf16.msra.mxu1 %v4776_v49  ;;  %v6384_v36 = vld [vmem:[%s7241_s29 + $0xac] sm:$0xf0] }
 0x1e9   : > { %v4647_v37 = vld [vmem:[%s7241_s29 + $0x290] sm:$0xf]  ;;  %v4392_v49 = vor.u32 %v6384_v36, %v4391_v35 }
 0x1ea   : > { %3799 = vmatpush.bf16.msra.mxu2 %v5032_v55  ;;  %3774 = vmatpush.bf16.msra.mxu0 %v4488_v2  ;;  %v6448_v41 = vld [vmem:[%s7241_s29 + $0x2ac] sm:$0xf0]  ;;  %v3561_v55 = vadd.f32 %v3560_v53, %v3548_v51  ;;  %v3523_v57 = vpop.f32.mrf.mxu0 }
 0x1eb   : > { %v4903_v43 = vld [vmem:[%s7241_s29 + $0x490] sm:$0xf]  ;;  %v4648_v58 = vor.u32 %v6448_v41, %v4647_v37 }
 0x1ec   : > { %3812 = vmatpush.bf16.msra.mxu3 %v5288_v60  ;;  %3787 = vmatpush.bf16.msra.mxu1 %v4744_v3  ;;  %v6512_v47 = vld [vmem:[%s7241_s29 + $0x4ac] sm:$0xf0]  ;;  %v4189_v38 = vmax.f32 %v3561_v55, 0.0 }
 0x1ed   : > { %v5159_v54 = vld [vmem:[%s7241_s29 + $0x690] sm:$0xf]  ;;  %v4904_v59 = vor.u32 %v6512_v47, %v4903_v43 }
 0x1ee   : > { %3800 = vmatpush.bf16.msra.mxu2 %v5000_v4  ;;  %3775 = vmatpush.bf16.msra.mxu0 %v4456_v44  ;;  %v6576_v23 = vld [vmem:[%s7241_s29 + $0x6ac] sm:$0xf0]  ;;  %4197 = vst [vmem:[#allocation8 + $0x8] sm:$0xff] %v4189_v38  ;;  %v7939_v18 = vpop.f32.mrf.mxu1 }
 0x1ef   : > { %v4359_v56 = vld [vmem:[%s7241_s29 + $0x50] sm:$0xf]  ;;  %v5160_v0 = vor.u32 %v6576_v23, %v5159_v54 }
 0x1f0   : > { %3813 = vmatpush.bf16.msra.mxu3 %v5256_v9  ;;  %3788 = vmatpush.bf16.msra.mxu1 %v4712_v15  ;;  %v6376_v60 = vld [vmem:[%s7241_s29 + $0x6c] sm:$0xf0] }
 0x1f1   : > { %v4615_v61 = vld [vmem:[%s7241_s29 + $0x250] sm:$0xf]  ;;  %v4360_v5 = vor.u32 %v6376_v60, %v4359_v56 }
 0x1f2   : > { %3801 = vmatpush.bf16.msra.mxu2 %v4968_v16  ;;  %3776 = vmatpush.bf16.msra.mxu0 %v4424_v1  ;;  %v6440_v62 = vld [vmem:[%s7241_s29 + $0x26c] sm:$0xf0] }
 0x1f3   : > { %v4871_v2 = vld [vmem:[%s7241_s29 + $0x450] sm:$0xf]  ;;  %v4616_v9 = vor.u32 %v6440_v62, %v4615_v61 }
 0x1f4   : > { %3814 = vmatpush.bf16.msra.mxu3 %v5224_v26  ;;  %3789 = vmatpush.bf16.msra.mxu1 %v4680_v33  ;;  %v6504_v50 = vld [vmem:[%s7241_s29 + $0x46c] sm:$0xf0] }
 0x1f5   : > { %v5127_v3 = vld [vmem:[%s7241_s29 + $0x650] sm:$0xf]  ;;  %v4872_v10 = vor.u32 %v6504_v50, %v4871_v2 }
 0x1f6   : > { %3802 = vmatpush.bf16.msra.mxu2 %v4936_v34  ;;  %v6568_v4 = vld [vmem:[%s7241_s29 + $0x66c] sm:$0xf0]  ;;  %3777 = vmatpush.bf16.msra.mxu0 %v4392_v49 }
 0x1f7   : > { %v4327_v6 = vld [vmem:[%s7241_s29 + $0x10] sm:$0xf]  ;;  %v5128_v44 = vor.u32 %v6568_v4, %v5127_v3 }
 0x1f8   : > { %3815 = vmatpush.bf16.msra.mxu3 %v5192_v40  ;;  %v6368_v8 = vld [vmem:[%s7241_s29 + $0x2c] sm:$0xf0]  ;;  %3790 = vmatpush.bf16.msra.mxu1 %v4648_v58 }
 0x1f9   : > { %v4583_v11 = vld [vmem:[%s7241_s29 + $0x210] sm:$0xf]  ;;  %v4328_v22 = vor.u32 %v6368_v8, %v4327_v6 }
 0x1fa   : > { %3803 = vmatpush.bf16.msra.mxu2 %v4904_v59  ;;  %v6432_v52 = vld [vmem:[%s7241_s29 + $0x22c] sm:$0xf0]  ;;  %3778 = vmatpush.bf16.msra.mxu0 %v4360_v5 }
 0x1fb   : > { %v4839_v12 = vld [vmem:[%s7241_s29 + $0x410] sm:$0xf]  ;;  %v4584_v29 = vor.u32 %v6432_v52, %v4583_v11 }
 0x1fc   : > { %3816 = vmatpush.bf16.msra.mxu3 %v5160_v0  ;;  %v6496_v14 = vld [vmem:[%s7241_s29 + $0x42c] sm:$0xf0]  ;;  %3791 = vmatpush.bf16.msra.mxu1 %v4616_v9 }
 0x1fd   : > { %v5095_v15 = vld [vmem:[%s7241_s29 + $0x610] sm:$0xf]  ;;  %v4840_v30 = vor.u32 %v6496_v14, %v4839_v12  ;;  %v7934_v12 = vpop.f32.mrf.mxu0 }
 0x1fe   : > { %v6560_v16 = vld [vmem:[%s7241_s29 + $0x62c] sm:$0xf0]  ;;  %3804 = vmatpush.bf16.msra.mxu2 %v4872_v10  ;;  %3779 = vmatpush.bf16.msra.mxu0 %v4328_v22 }
 0x1ff   : > { %v5575_v19 = vld [vmem:[%s7241_s29 + $0x9d0] sm:$0xf]  ;;  %v5096_v1 = vor.u32 %v6560_v16, %v5095_v15 }
 0x200   : > { %v6680_v20 = vld [vmem:[%s7241_s29 + $0x9ec] sm:$0xf0]  ;;  %3817 = vmatpush.bf16.msra.mxu3 %v5128_v44  ;;  %3792 = vmatpush.bf16.msra.mxu1 %v4584_v29 }
 0x201   : > { %v5831_v21 = vld [vmem:[%s7241_s29 + $0xbd0] sm:$0xf]  ;;  %v5576_v33 = vor.u32 %v6680_v20, %v5575_v19  ;;  %3780 = vmatmul.bf16.vlgmr.msra.gmra.mxu0 %v7345_v17 }
 0x202   : > { %v6744_v26 = vld [vmem:[%s7241_s29 + $0xbec] sm:$0xf0]  ;;  %3805 = vmatpush.bf16.msra.mxu2 %v4840_v30 }
 0x203   : > { %v6087_v27 = vld [vmem:[%s7241_s29 + $0xdd0] sm:$0xf]  ;;  %v5832_v34 = vor.u32 %v6744_v26, %v5831_v21  ;;  %3824 = vmatpush.bf16.msrb.mxu0 %v5576_v33  ;;  %3793 = vmatmul.bf16.vlgmr.msra.gmra.mxu1 %v7352_v25  ;;  %v7949_v33 = vpop.f32.mrf.mxu2 }
 0x204   : > { %v6808_v28 = vld [vmem:[%s7241_s29 + $0xdec] sm:$0xf0]  ;;  %3818 = vmatpush.bf16.msra.mxu3 %v5096_v1 }
 0x205   : > { %v6343_v31 = vld [vmem:[%s7241_s29 + $0xfd0] sm:$0xf]  ;;  %v6088_v35 = vor.u32 %v6808_v28, %v6087_v27  ;;  %3837 = vmatpush.bf16.msrb.mxu1 %v5832_v34  ;;  %3806 = vmatmul.bf16.vlgmr.msra.gmra.mxu2 %v7337_v7 }
 0x206   : > { %v6872_v32 = vld [vmem:[%s7241_s29 + $0xfec] sm:$0xf0] }
 0x207   : > { %v5543_v36 = vld [vmem:[%s7241_s29 + $0x990] sm:$0xf]  ;;  %v6344_v40 = vor.u32 %v6872_v32, %v6343_v31  ;;  %3850 = vmatpush.bf16.msrb.mxu2 %v6088_v35  ;;  %3819 = vmatmul.bf16.vlgmr.msra.gmra.mxu3 %v7350_v24 }
 0x208   : > { %v6672_v37 = vld [vmem:[%s7241_s29 + $0x9ac] sm:$0xf0] }
 0x209   : > { %v5799_v39 = vld [vmem:[%s7241_s29 + $0xb90] sm:$0xf]  ;;  %v5544_v54 = vor.u32 %v6672_v37, %v5543_v36  ;;  %3863 = vmatpush.bf16.msrb.mxu3 %v6344_v40 }
 0x20a   : > { %v6736_v41 = vld [vmem:[%s7241_s29 + $0xbac] sm:$0xf0] }
 0x20b   : > { %v6055_v43 = vld [vmem:[%s7241_s29 + $0xd90] sm:$0xf]  ;;  %v5800_v23 = vor.u32 %v6736_v41, %v5799_v39  ;;  %3825 = vmatpush.bf16.msrb.mxu0 %v5544_v54  ;;  %v7954_v39 = vpop.f32.mrf.mxu3 }
 0x20c   : > { %v6800_v47 = vld [vmem:[%s7241_s29 + $0xdac] sm:$0xf0] }
 0x20d   : > { %v6311_v51 = vld [vmem:[%s7241_s29 + $0xf90] sm:$0xf]  ;;  %v6056_v49 = vor.u32 %v6800_v47, %v6055_v43  ;;  %3838 = vmatpush.bf16.msrb.mxu1 %v5800_v23  ;;  %v3575_v47 = vpop.f32.mrf.mxu0 }
 0x20e   : > { %v6864_v53 = vld [vmem:[%s7241_s29 + $0xfac] sm:$0xf0]  ;;  %v6604_v47 = vld [vmem:[%s7241_s29 + $0x794] sm:$0xf] }
 0x20f   : > { %v5511_v55 = vld [vmem:[%s7241_s29 + $0x950] sm:$0xf]  ;;  %v6312_v58 = vor.u32 %v6864_v53, %v6311_v51  ;;  %3851 = vmatpush.bf16.msrb.mxu2 %v6056_v49 }
 0x210   : > { %v6664_v56 = vld [vmem:[%s7241_s29 + $0x96c] sm:$0xf0] }
 0x211   : > { %v5767_v57 = vld [vmem:[%s7241_s29 + $0xb50] sm:$0xf]  ;;  %v5512_v0 = vor.u32 %v6664_v56, %v5511_v55  ;;  %3864 = vmatpush.bf16.msrb.mxu3 %v6312_v58  ;;  %v3588_v55 = vpop.f32.mrf.mxu1 }
 0x212   : > { %v6728_v59 = vld [vmem:[%s7241_s29 + $0xb6c] sm:$0xf0]  ;;  %v4489_v55 = vld [vmem:[%s7241_s29 + $0x170] sm:$0xf0] }
 0x213   : > { %v6023_v60 = vld [vmem:[%s7241_s29 + $0xd50] sm:$0xf]  ;;  %v5768_v38 = vor.u32 %v6728_v59, %v5767_v57  ;;  %3826 = vmatpush.bf16.msrb.mxu0 %v5512_v0 }
 0x214   : > { %v6792_v61 = vld [vmem:[%s7241_s29 + $0xd6c] sm:$0xf0] }
 0x215   : > { %v6279_v62 = vld [vmem:[%s7241_s29 + $0xf50] sm:$0xf]  ;;  %v6024_v2 = vor.u32 %v6792_v61, %v6023_v60  ;;  %3839 = vmatpush.bf16.msrb.mxu1 %v5768_v38 }
 0x216   : > { %v6856_v63 = vld [vmem:[%s7241_s29 + $0xf6c] sm:$0xf0] }
 0x217   : > { %v5479_v50 = vld [vmem:[%s7241_s29 + $0x910] sm:$0xf]  ;;  %v6280_v5 = vor.u32 %v6856_v63, %v6279_v62  ;;  %3852 = vmatpush.bf16.msrb.mxu2 %v6024_v2  ;;  %v7967_v62 = vld [vmem:[%s7247_s4] sm:$0xff] }
 0x218   : > { %v6656_v3 = vld [vmem:[%s7241_s29 + $0x92c] sm:$0xf0]  ;;  %v782_v63 = vperm.slane %v7967_v62, 2 }
 0x219   : > { %v5735_v4 = vld [vmem:[%s7241_s29 + $0xb10] sm:$0xf]  ;;  %v5480_v52 = vor.u32 %v6656_v3, %v5479_v50  ;;  %3865 = vmatpush.bf16.msrb.mxu3 %v6280_v5 }
 0x21a   : > { %v6720_v6 = vld [vmem:[%s7241_s29 + $0xb2c] sm:$0xf0] }
 0x21b   : > { %v5991_v8 = vld [vmem:[%s7241_s29 + $0xd10] sm:$0xf]  ;;  %v5736_v13 = vor.u32 %v6720_v6, %v5735_v4  ;;  %3827 = vmatpush.bf16.msrb.mxu0 %v5480_v52 }
 0x21c   : > { %v6784_v9 = vld [vmem:[%s7241_s29 + $0xd2c] sm:$0xf0] }
 0x21d   : > { %v6247_v10 = vld [vmem:[%s7241_s29 + $0xf10] sm:$0xf]  ;;  %v5992_v44 = vor.u32 %v6784_v9, %v5991_v8  ;;  %3840 = vmatpush.bf16.msrb.mxu1 %v5736_v13  ;;  %v3601_v8 = vpop.f32.mrf.mxu2  ;;  %v3614_v13 = vpop.f32.mrf.mxu3 }
 0x21e   : > { %v6848_v11 = vld [vmem:[%s7241_s29 + $0xf2c] sm:$0xf0]  ;;  %v6524_v8 = vld [vmem:[%s7241_s29 + $0x514] sm:$0xf] }
 0x21f   : > { %v5447_v14 = vld [vmem:[%s7241_s29 + $0x8d0] sm:$0xf]  ;;  %v6248_v19 = vor.u32 %v6848_v11, %v6247_v10  ;;  %3853 = vmatpush.bf16.msrb.mxu2 %v5992_v44  ;;  %v6420_v44 = vld [vmem:[%s7241_s29 + $0x1d4] sm:$0xf] }
 0x220   : > { %v6648_v15 = vld [vmem:[%s7241_s29 + $0x8ec] sm:$0xf0] }
 0x221   : > { %v5703_v16 = vld [vmem:[%s7241_s29 + $0xad0] sm:$0xf]  ;;  %v5448_v28 = vor.u32 %v6648_v15, %v5447_v14  ;;  %3866 = vmatpush.bf16.msrb.mxu3 %v6248_v19  ;;  %v4553_v14 = vld [vmem:[%s7241_s29 + $0x1f0] sm:$0xf0] }
 0x222   : > { %v6712_v20 = vld [vmem:[%s7241_s29 + $0xaec] sm:$0xf0]  ;;  %v6484_v15 = vld [vmem:[%s7241_s29 + $0x3d4] sm:$0xf] }
 0x223   : > { %v5959_v21 = vld [vmem:[%s7241_s29 + $0xcd0] sm:$0xf]  ;;  %v5704_v29 = vor.u32 %v6712_v20, %v5703_v16  ;;  %3828 = vmatpush.bf16.msrb.mxu0 %v5448_v28  ;;  %v3574_v16 = vadd.f32 %v7934_v12, %v782_v63  ;;  %v4809_v20 = vld [vmem:[%s7241_s29 + $0x3f0] sm:$0xf0] }
 0x224   : > { %v6776_v22 = vld [vmem:[%s7241_s29 + $0xcec] sm:$0xf0]  ;;  %v6612_v28 = vld [vmem:[%s7241_s29 + $0x7d4] sm:$0xf] }
 0x225   : > { %v6215_v26 = vld [vmem:[%s7241_s29 + $0xed0] sm:$0xf]  ;;  %v5960_v30 = vor.u32 %v6776_v22, %v5959_v21  ;;  %3841 = vmatpush.bf16.msrb.mxu1 %v5704_v29  ;;  %v6548_v21 = vld [vmem:[%s7241_s29 + $0x5d4] sm:$0xf] }
 0x226   : > { %v6840_v27 = vld [vmem:[%s7241_s29 + $0xeec] sm:$0xf0]  ;;  %v5065_v22 = vld [vmem:[%s7241_s29 + $0x5f0] sm:$0xf0] }
 0x227   : > { %v5415_v31 = vld [vmem:[%s7241_s29 + $0x890] sm:$0xf]  ;;  %v6216_v34 = vor.u32 %v6840_v27, %v6215_v26  ;;  %3854 = vmatpush.bf16.msrb.mxu2 %v5960_v30  ;;  %v5321_v29 = vld [vmem:[%s7241_s29 + $0x7f0] sm:$0xf0]  ;;  %v4556_v30 = vor.u32 %v6420_v44, %v4553_v14 }
 0x228   : > { %v6640_v32 = vld [vmem:[%s7241_s29 + $0x8ac] sm:$0xf0]  ;;  %v6388_v14 = vld [vmem:[%s7241_s29 + $0xd4] sm:$0xf] }
 0x229   : > { %v5671_v1 = vld [vmem:[%s7241_s29 + $0xa90] sm:$0xf]  ;;  %v5416_v43 = vor.u32 %v6640_v32, %v5415_v31  ;;  %3867 = vmatpush.bf16.msrb.mxu3 %v6216_v34  ;;  %v4812_v31 = vor.u32 %v6484_v15, %v4809_v20  ;;  %v5068_v32 = vor.u32 %v6548_v21, %v5065_v22  ;;  %v6412_v34 = vld [vmem:[%s7241_s29 + $0x194] sm:$0xf]  ;;  %v3638_v20 = vpop.f32.mrf.mxu1 }
 0x22a   : > { %v6704_v35 = vld [vmem:[%s7241_s29 + $0xaac] sm:$0xf0]  ;;  %v4425_v15 = vld [vmem:[%s7241_s29 + $0xf0] sm:$0xf0] }
 0x22b   : > { %v5927_v36 = vld [vmem:[%s7241_s29 + $0xc90] sm:$0xf]  ;;  %v5672_v51 = vor.u32 %v6704_v35, %v5671_v1  ;;  %3829 = vmatpush.bf16.msrb.mxu0 %v5416_v43  ;;  %v3587_v1 = vadd.f32 %v7939_v18, %v3574_v16  ;;  %v4521_v35 = vld [vmem:[%s7241_s29 + $0x1b0] sm:$0xf0] }
 0x22c   : > { %v6768_v37 = vld [vmem:[%s7241_s29 + $0xcac] sm:$0xf0]  ;;  %v5033_v43 = vld [vmem:[%s7241_s29 + $0x5b0] sm:$0xf0]  ;;  %v4524_v18 = vor.u32 %v6412_v34, %v4521_v35 }
 0x22d   : > { %v6183_v40 = vld [vmem:[%s7241_s29 + $0xe90] sm:$0xf]  ;;  %v5928_v53 = vor.u32 %v6768_v37, %v5927_v36  ;;  %3842 = vmatpush.bf16.msrb.mxu1 %v5672_v51  ;;  %v6476_v36 = vld [vmem:[%s7241_s29 + $0x394] sm:$0xf]  ;;  %v5324_v37 = vor.u32 %v6612_v28, %v5321_v29 }
 0x22e   : > { %v6832_v41 = vld [vmem:[%s7241_s29 + $0xeac] sm:$0xf0]  ;;  %v5289_v51 = vld [vmem:[%s7241_s29 + $0x7b0] sm:$0xf0] }
 0x22f   : > { %v5383_v54 = vld [vmem:[%s7241_s29 + $0x850] sm:$0xf]  ;;  %v6184_v56 = vor.u32 %v6832_v41, %v6183_v40  ;;  %3855 = vmatpush.bf16.msrb.mxu2 %v5928_v53  ;;  %v4777_v40 = vld [vmem:[%s7241_s29 + $0x3b0] sm:$0xf0] }
 0x230   : > { %v6632_v23 = vld [vmem:[%s7241_s29 + $0x86c] sm:$0xf0]  ;;  %v6540_v41 = vld [vmem:[%s7241_s29 + $0x594] sm:$0xf]  ;;  %v4780_v53 = vor.u32 %v6476_v36, %v4777_v40  ;;  %v3651_v36 = vpop.f32.mrf.mxu2 }
 0x231   : > { %v5639_v49 = vld [vmem:[%s7241_s29 + $0xa50] sm:$0xf]  ;;  %v5384_v0 = vor.u32 %v6632_v23, %v5383_v54  ;;  %3868 = vmatpush.bf16.msrb.mxu3 %v6184_v56  ;;  %v5036_v54 = vor.u32 %v6540_v41, %v5033_v43  ;;  %v3600_v23 = vadd.f32 %v7949_v33, %v3587_v1  ;;  %v6468_v56 = vld [vmem:[%s7241_s29 + $0x354] sm:$0xf] }
 0x232   : > { %v6696_v57 = vld [vmem:[%s7241_s29 + $0xa6c] sm:$0xf0]  ;;  %v5257_v33 = vld [vmem:[%s7241_s29 + $0x770] sm:$0xf0] }
 0x233   : > { %v5895_v58 = vld [vmem:[%s7241_s29 + $0xc50] sm:$0xf]  ;;  %v5640_v50 = vor.u32 %v6696_v57, %v5639_v49  ;;  %3830 = vmatpush.bf16.msrb.mxu0 %v5384_v0  ;;  %v6404_v49 = vld [vmem:[%s7241_s29 + $0x154] sm:$0xf]  ;;  %v5292_v57 = vor.u32 %v6604_v47, %v5289_v51  ;;  %v3613_v0 = vadd.f32 %v7954_v39, %v3600_v23  ;;  %v3664_v51 = vpop.f32.mrf.mxu3 }
 0x234   : > { %v6760_v59 = vld [vmem:[%s7241_s29 + $0xc6c] sm:$0xf0]  ;;  %v4492_v63 = vor.u32 %v6404_v49, %v4489_v55  ;;  %v6452_v16 = vld [vmem:[%s7241_s29 + $0x2d4] sm:$0xf] }
 0x235   : > { %v6151_v60 = vld [vmem:[%s7241_s29 + $0xe50] sm:$0xf]  ;;  %v5896_v3 = vor.u32 %v6760_v59, %v5895_v58  ;;  %3843 = vmatpush.bf16.msrb.mxu1 %v5640_v50  ;;  %v4745_v58 = vld [vmem:[%s7241_s29 + $0x370] sm:$0xf0] }
 0x236   : > { %v6824_v61 = vld [vmem:[%s7241_s29 + $0xe6c] sm:$0xf0]  ;;  %v6532_v59 = vld [vmem:[%s7241_s29 + $0x554] sm:$0xf] }
 0x237   : > { %v5351_v38 = vld [vmem:[%s7241_s29 + $0x810] sm:$0xf]  ;;  %v6152_v9 = vor.u32 %v6824_v61, %v6151_v60  ;;  %3856 = vmatpush.bf16.msrb.mxu2 %v5896_v3  ;;  %v5001_v60 = vld [vmem:[%s7241_s29 + $0x570] sm:$0xf0] }
 0x238   : > { %v6624_v2 = vld [vmem:[%s7241_s29 + $0x82c] sm:$0xf0]  ;;  %v6596_v61 = vld [vmem:[%s7241_s29 + $0x754] sm:$0xf] }
 0x239   : > { %v5607_v4 = vld [vmem:[%s7241_s29 + $0xa10] sm:$0xf]  ;;  %v5352_v19 = vor.u32 %v6624_v2, %v5351_v38  ;;  %3869 = vmatpush.bf16.msrb.mxu3 %v6152_v9  ;;  %v4748_v38 = vor.u32 %v6468_v56, %v4745_v58  ;;  %v5004_v2 = vor.u32 %v6532_v59, %v5001_v60  ;;  %v6396_v50 = vld [vmem:[%s7241_s29 + $0x114] sm:$0xf] }
 0x23a   : > { %v6688_v5 = vld [vmem:[%s7241_s29 + $0xa2c] sm:$0xf0]  ;;  %v4457_v3 = vld [vmem:[%s7241_s29 + $0x130] sm:$0xf0] }
 0x23b   : > { %v5863_v6 = vld [vmem:[%s7241_s29 + $0xc10] sm:$0xf]  ;;  %v5608_v26 = vor.u32 %v6688_v5, %v5607_v4  ;;  %3831 = vmatpush.bf16.msrb.mxu0 %v5352_v19  ;;  %v6460_v4 = vld [vmem:[%s7241_s29 + $0x314] sm:$0xf]  ;;  %v5260_v5 = vor.u32 %v6596_v61, %v5257_v33  ;;  %v4460_v39 = vor.u32 %v6396_v50, %v4457_v3  ;;  %v3640_v61 = vpop.f32.mrf.mxu1 }
 0x23c   : > { %v6752_v10 = vld [vmem:[%s7241_s29 + $0xc2c] sm:$0xf0]  ;;  %v4969_v9 = vld [vmem:[%s7241_s29 + $0x530] sm:$0xf0] }
 0x23d   : > { %v6119_v11 = vld [vmem:[%s7241_s29 + $0xe10] sm:$0xf]  ;;  %v5864_v27 = vor.u32 %v6752_v10, %v5863_v6  ;;  %3844 = vmatpush.bf16.msrb.mxu1 %v5608_v26  ;;  %v4713_v6 = vld [vmem:[%s7241_s29 + $0x330] sm:$0xf0]  ;;  %v4972_v44 = vor.u32 %v6524_v8, %v4969_v9 }
 0x23e   : > { %v6816_v52 = vld [vmem:[%s7241_s29 + $0xe2c] sm:$0xf0]  ;;  %3832 = vmatmul.bf16.vlgmr.msrb.gmra.mxu0 %v7409_v45  ;;  %v6588_v10 = vld [vmem:[%s7241_s29 + $0x714] sm:$0xf]  ;;  %v4716_v13 = vor.u32 %v6460_v4, %v4713_v6 }
 0x23f   : > { %v6120_v12 = vor.u32 %v6816_v52, %v6119_v11  ;;  %3857 = vmatpush.bf16.msrb.mxu2 %v5864_v27  ;;  %3876 = vmatpush.bf16.msra.mxu0 %v4556_v30  ;;  %v5225_v11 = vld [vmem:[%s7241_s29 + $0x730] sm:$0xf0]  ;;  %v3625_v52 = vpop.f32.mrf.mxu0  ;;  %v4428_v30 = vor.u32 %v6388_v14, %v4425_v15  ;;  %v3666_v15 = vpop.f32.mrf.mxu3 }
 0x240   : > { %3845 = vmatmul.bf16.vlgmr.msrb.gmra.mxu1 %v7413_v48  ;;  %v3626_v19 = vadd.f32 %v3625_v52, %v3613_v0  ;;  %v5228_v21 = vor.u32 %v6588_v10, %v5225_v11  ;;  %v4681_v22 = vld [vmem:[%s7241_s29 + $0x2f0] sm:$0xf0] }
 0x241   : > { %3870 = vmatpush.bf16.msrb.mxu3 %v6120_v12  ;;  %3889 = vmatpush.bf16.msra.mxu1 %v4812_v31  ;;  %v6516_v26 = vld [vmem:[%s7241_s29 + $0x4d4] sm:$0xf]  ;;  %v4684_v31 = vor.u32 %v6452_v16, %v4681_v22 }
 0x242   : > { %3858 = vmatmul.bf16.vlgmr.msrb.gmra.mxu2 %v7405_v42  ;;  %v4937_v27 = vld [vmem:[%s7241_s29 + $0x4f0] sm:$0xf0]  ;;  %v3639_v12 = vadd.f32 %v3638_v20, %v3626_v19 }
 0x243   : > { %3902 = vmatpush.bf16.msra.mxu2 %v5068_v32  ;;  %3877 = vmatpush.bf16.msra.mxu0 %v4524_v18  ;;  %v6580_v28 = vld [vmem:[%s7241_s29 + $0x6d4] sm:$0xf]  ;;  %v4940_v32 = vor.u32 %v6516_v26, %v4937_v27 }
 0x244   : > { %3871 = vmatmul.bf16.vlgmr.msrb.gmra.mxu3 %v7411_v46  ;;  %v5193_v29 = vld [vmem:[%s7241_s29 + $0x6f0] sm:$0xf0]  ;;  %v3652_v47 = vadd.f32 %v3651_v36, %v3639_v12 }
 0x245   : > { %3915 = vmatpush.bf16.msra.mxu3 %v5324_v37  ;;  %3890 = vmatpush.bf16.msra.mxu1 %v4780_v53  ;;  %v6380_v1 = vld [vmem:[%s7241_s29 + $0x94] sm:$0xf]  ;;  %v5196_v37 = vor.u32 %v6580_v28, %v5193_v29 }
 0x246   : > { %v4393_v34 = vld [vmem:[%s7241_s29 + $0xb0] sm:$0xf0]  ;;  %v3665_v23 = vadd.f32 %v3664_v51, %v3652_v47 }
 0x247   : > { %3903 = vmatpush.bf16.msra.mxu2 %v5036_v54  ;;  %3878 = vmatpush.bf16.msra.mxu0 %v4492_v63  ;;  %v6444_v35 = vld [vmem:[%s7241_s29 + $0x294] sm:$0xf]  ;;  %v4396_v54 = vor.u32 %v6380_v1, %v4393_v34  ;;  %v3627_v55 = vpop.f32.mrf.mxu0 }
 0x248   : > { %v4649_v40 = vld [vmem:[%s7241_s29 + $0x2b0] sm:$0xf0]  ;;  %v4190_v63 = vmax.f32 %v3665_v23, 0.0 }
 0x249   : > { %3916 = vmatpush.bf16.msra.mxu3 %v5292_v57  ;;  %3891 = vmatpush.bf16.msra.mxu1 %v4748_v38  ;;  %v6508_v41 = vld [vmem:[%s7241_s29 + $0x494] sm:$0xf]  ;;  %v4652_v56 = vor.u32 %v6444_v35, %v4649_v40 }
 0x24a   : > { %v4905_v43 = vld [vmem:[%s7241_s29 + $0x4b0] sm:$0xf0]  ;;  %4198 = vst [vmem:[#allocation8 + $0x10] sm:$0xff] %v4190_v63 }
 0x24b   : > { %3904 = vmatpush.bf16.msra.mxu2 %v5004_v2  ;;  %3879 = vmatpush.bf16.msra.mxu0 %v4460_v39  ;;  %v6572_v18 = vld [vmem:[%s7241_s29 + $0x694] sm:$0xf]  ;;  %v4908_v57 = vor.u32 %v6508_v41, %v4905_v43  ;;  %v3653_v39 = vpop.f32.mrf.mxu2 }
 0x24c   : > { %v5161_v53 = vld [vmem:[%s7241_s29 + $0x6b0] sm:$0xf0] }
 0x24d   : > { %3917 = vmatpush.bf16.msra.mxu3 %v5260_v5  ;;  %3892 = vmatpush.bf16.msra.mxu1 %v4716_v13  ;;  %v6372_v49 = vld [vmem:[%s7241_s29 + $0x54] sm:$0xf]  ;;  %v5164_v33 = vor.u32 %v6572_v18, %v5161_v53 }
 0x24e   : > { %v4361_v58 = vld [vmem:[%s7241_s29 + $0x70] sm:$0xf0] }
 0x24f   : > { %3905 = vmatpush.bf16.msra.mxu2 %v4972_v44  ;;  %3880 = vmatpush.bf16.msra.mxu0 %v4428_v30  ;;  %v6436_v59 = vld [vmem:[%s7241_s29 + $0x254] sm:$0xf]  ;;  %v4364_v3 = vor.u32 %v6372_v49, %v4361_v58  ;;  %v8086_v39 = vpop.f32.mrf.mxu0 }
 0x250   : > { %v4617_v60 = vld [vmem:[%s7241_s29 + $0x270] sm:$0xf0] }
 0x251   : > { %3918 = vmatpush.bf16.msra.mxu3 %v5228_v21  ;;  %3893 = vmatpush.bf16.msra.mxu1 %v4684_v31  ;;  %v6500_v0 = vld [vmem:[%s7241_s29 + $0x454] sm:$0xf]  ;;  %v4620_v6 = vor.u32 %v6436_v59, %v4617_v60 }
 0x252   : > { %v4873_v38 = vld [vmem:[%s7241_s29 + $0x470] sm:$0xf0] }
 0x253   : > { %3906 = vmatpush.bf16.msra.mxu2 %v4940_v32  ;;  %v6564_v2 = vld [vmem:[%s7241_s29 + $0x654] sm:$0xf]  ;;  %3881 = vmatpush.bf16.msra.mxu0 %v4396_v54  ;;  %v4876_v8 = vor.u32 %v6500_v0, %v4873_v38 }
 0x254   : > { %v5129_v50 = vld [vmem:[%s7241_s29 + $0x670] sm:$0xf0] }
 0x255   : > { %3919 = vmatpush.bf16.msra.mxu3 %v5196_v37  ;;  %v6364_v4 = vld [vmem:[%s7241_s29 + $0x14] sm:$0xf]  ;;  %3894 = vmatpush.bf16.msra.mxu1 %v4652_v56  ;;  %v5132_v52 = vor.u32 %v6564_v2, %v5129_v50 }
 0x256   : > { %v4329_v5 = vld [vmem:[%s7241_s29 + $0x30] sm:$0xf0] }
 0x257   : > { %3907 = vmatpush.bf16.msra.mxu2 %v4908_v57  ;;  %v6428_v9 = vld [vmem:[%s7241_s29 + $0x214] sm:$0xf]  ;;  %3882 = vmatpush.bf16.msra.mxu0 %v4364_v3  ;;  %v4332_v21 = vor.u32 %v6364_v4, %v4329_v5 }
 0x258   : > { %v4585_v10 = vld [vmem:[%s7241_s29 + $0x230] sm:$0xf0] }
 0x259   : > { %v6492_v11 = vld [vmem:[%s7241_s29 + $0x414] sm:$0xf]  ;;  %3920 = vmatpush.bf16.msra.mxu3 %v5164_v33  ;;  %3895 = vmatpush.bf16.msra.mxu1 %v4620_v6  ;;  %v4588_v28 = vor.u32 %v6428_v9, %v4585_v10 }
 0x25a   : > { %v4841_v13 = vld [vmem:[%s7241_s29 + $0x430] sm:$0xf0] }
 0x25b   : > { %v6556_v44 = vld [vmem:[%s7241_s29 + $0x614] sm:$0xf]  ;;  %3908 = vmatpush.bf16.msra.mxu2 %v4876_v8  ;;  %v4844_v29 = vor.u32 %v6492_v11, %v4841_v13  ;;  %3883 = vmatpush.bf16.msra.mxu0 %v4332_v21 }
 0x25c   : > { %v5097_v14 = vld [vmem:[%s7241_s29 + $0x630] sm:$0xf0] }
 0x25d   : > { %v6676_v16 = vld [vmem:[%s7241_s29 + $0x9d4] sm:$0xf]  ;;  %3921 = vmatpush.bf16.msra.mxu3 %v5132_v52  ;;  %v5100_v31 = vor.u32 %v6556_v44, %v5097_v14  ;;  %3896 = vmatpush.bf16.msra.mxu1 %v4588_v28 }
 0x25e   : > { %v5577_v19 = vld [vmem:[%s7241_s29 + $0x9f0] sm:$0xf0]  ;;  %3884 = vmatmul.bf16.vlgmr.msra.gmra.mxu0 %v7345_v17 }
 0x25f   : > { %v6740_v20 = vld [vmem:[%s7241_s29 + $0xbd4] sm:$0xf]  ;;  %v5580_v32 = vor.u32 %v6676_v16, %v5577_v19  ;;  %3909 = vmatpush.bf16.msra.mxu2 %v4844_v29  ;;  %v8091_v16 = vpop.f32.mrf.mxu1 }
 0x260   : > { %v5833_v22 = vld [vmem:[%s7241_s29 + $0xbf0] sm:$0xf0]  ;;  %3897 = vmatmul.bf16.vlgmr.msra.gmra.mxu1 %v7352_v25 }
 0x261   : > { %v6804_v26 = vld [vmem:[%s7241_s29 + $0xdd4] sm:$0xf]  ;;  %v5836_v1 = vor.u32 %v6740_v20, %v5833_v22  ;;  %3922 = vmatpush.bf16.msra.mxu3 %v5100_v31  ;;  %3928 = vmatpush.bf16.msrb.mxu0 %v5580_v32 }
 0x262   : > { %v6089_v27 = vld [vmem:[%s7241_s29 + $0xdf0] sm:$0xf0]  ;;  %3910 = vmatmul.bf16.vlgmr.msra.gmra.mxu2 %v7337_v7 }
 0x263   : > { %v6868_v12 = vld [vmem:[%s7241_s29 + $0xfd4] sm:$0xf]  ;;  %v6092_v34 = vor.u32 %v6804_v26, %v6089_v27  ;;  %3941 = vmatpush.bf16.msrb.mxu1 %v5836_v1  ;;  %v8101_v1 = vpop.f32.mrf.mxu2 }
 0x264   : > { %v6345_v30 = vld [vmem:[%s7241_s29 + $0xff0] sm:$0xf0]  ;;  %3923 = vmatmul.bf16.vlgmr.msra.gmra.mxu3 %v7350_v24 }
 0x265   : > { %v6668_v35 = vld [vmem:[%s7241_s29 + $0x994] sm:$0xf]  ;;  %v6348_v40 = vor.u32 %v6868_v12, %v6345_v30  ;;  %3954 = vmatpush.bf16.msrb.mxu2 %v6092_v34 }
 0x266   : > { %v5545_v36 = vld [vmem:[%s7241_s29 + $0x9b0] sm:$0xf0] }
 0x267   : > { %v6732_v37 = vld [vmem:[%s7241_s29 + $0xb94] sm:$0xf]  ;;  %v5548_v53 = vor.u32 %v6668_v35, %v5545_v36  ;;  %3967 = vmatpush.bf16.msrb.mxu3 %v6348_v40  ;;  %v8106_v40 = vpop.f32.mrf.mxu3 }
 0x268   : > { %v5801_v41 = vld [vmem:[%s7241_s29 + $0xbb0] sm:$0xf0] }
 0x269   : > { %v6796_v43 = vld [vmem:[%s7241_s29 + $0xd94] sm:$0xf]  ;;  %v5804_v54 = vor.u32 %v6732_v37, %v5801_v41  ;;  %3929 = vmatpush.bf16.msrb.mxu0 %v5548_v53 }
 0x26a   : > { %v6057_v47 = vld [vmem:[%s7241_s29 + $0xdb0] sm:$0xf0] }
 0x26b   : > { %v6860_v51 = vld [vmem:[%s7241_s29 + $0xf94] sm:$0xf]  ;;  %v6060_v23 = vor.u32 %v6796_v43, %v6057_v47  ;;  %3942 = vmatpush.bf16.msrb.mxu1 %v5804_v54 }
 0x26c   : > { %v6313_v18 = vld [vmem:[%s7241_s29 + $0xfb0] sm:$0xf0] }
 0x26d   : > { %v6660_v49 = vld [vmem:[%s7241_s29 + $0x954] sm:$0xf]  ;;  %v6316_v57 = vor.u32 %v6860_v51, %v6313_v18  ;;  %3955 = vmatpush.bf16.msrb.mxu2 %v6060_v23  ;;  %v3679_v51 = vpop.f32.mrf.mxu0 }
 0x26e   : > { %v5513_v55 = vld [vmem:[%s7241_s29 + $0x970] sm:$0xf0]  ;;  %v6609_v51 = vld [vmem:[%s7241_s29 + $0x7b4] sm:$0xf0] }
 0x26f   : > { %v6724_v56 = vld [vmem:[%s7241_s29 + $0xb54] sm:$0xf]  ;;  %v5516_v63 = vor.u32 %v6660_v49, %v5513_v55  ;;  %3968 = vmatpush.bf16.msrb.mxu3 %v6316_v57  ;;  %v3692_v55 = vpop.f32.mrf.mxu1 }
 0x270   : > { %v5769_v58 = vld [vmem:[%s7241_s29 + $0xb70] sm:$0xf0]  ;;  %v4751_v55 = vld [vmem:[%s7241_s29 + $0x358] sm:$0xf] }
 0x271   : > { %v6788_v59 = vld [vmem:[%s7241_s29 + $0xd54] sm:$0xf]  ;;  %v5772_v0 = vor.u32 %v6724_v56, %v5769_v58  ;;  %3930 = vmatpush.bf16.msrb.mxu0 %v5516_v63 }
 0x272   : > { %v6025_v60 = vld [vmem:[%s7241_s29 + $0xd70] sm:$0xf0] }
 0x273   : > { %v6852_v61 = vld [vmem:[%s7241_s29 + $0xf54] sm:$0xf]  ;;  %v6028_v38 = vor.u32 %v6788_v59, %v6025_v60  ;;  %3943 = vmatpush.bf16.msrb.mxu1 %v5772_v0 }
 0x274   : > { %v6281_v33 = vld [vmem:[%s7241_s29 + $0xf70] sm:$0xf0] }
 0x275   : > { %v6652_v2 = vld [vmem:[%s7241_s29 + $0x914] sm:$0xf]  ;;  %v6284_v4 = vor.u32 %v6852_v61, %v6281_v33  ;;  %3956 = vmatpush.bf16.msrb.mxu2 %v6028_v38  ;;  %v783_v33 = vperm.slane %v7967_v62, 3  ;;  %v3705_v62 = vpop.f32.mrf.mxu2 }
 0x276   : > { %v5481_v50 = vld [vmem:[%s7241_s29 + $0x930] sm:$0xf0]  ;;  %v6529_v62 = vld [vmem:[%s7241_s29 + $0x534] sm:$0xf0] }
 0x277   : > { %v6716_v3 = vld [vmem:[%s7241_s29 + $0xb14] sm:$0xf]  ;;  %v5484_v11 = vor.u32 %v6652_v2, %v5481_v50  ;;  %3969 = vmatpush.bf16.msrb.mxu3 %v6284_v4 }
 0x278   : > { %v5737_v5 = vld [vmem:[%s7241_s29 + $0xb30] sm:$0xf0] }
 0x279   : > { %v6780_v6 = vld [vmem:[%s7241_s29 + $0xd14] sm:$0xf]  ;;  %v5740_v52 = vor.u32 %v6716_v3, %v5737_v5  ;;  %3931 = vmatpush.bf16.msrb.mxu0 %v5484_v11  ;;  %v3718_v11 = vpop.f32.mrf.mxu3 }
 0x27a   : > { %v5993_v8 = vld [vmem:[%s7241_s29 + $0xd30] sm:$0xf0] }
 0x27b   : > { %v6844_v9 = vld [vmem:[%s7241_s29 + $0xf14] sm:$0xf]  ;;  %v5996_v13 = vor.u32 %v6780_v6, %v5993_v8  ;;  %3944 = vmatpush.bf16.msrb.mxu1 %v5740_v52  ;;  %v4559_v52 = vld [vmem:[%s7241_s29 + $0x1d8] sm:$0xf] }
 0x27c   : > { %v6249_v10 = vld [vmem:[%s7241_s29 + $0xf30] sm:$0xf0] }
 0x27d   : > { %v6644_v44 = vld [vmem:[%s7241_s29 + $0x8d4] sm:$0xf]  ;;  %v6252_v19 = vor.u32 %v6844_v9, %v6249_v10  ;;  %3957 = vmatpush.bf16.msrb.mxu2 %v5996_v13  ;;  %v6425_v13 = vld [vmem:[%s7241_s29 + $0x1f4] sm:$0xf0] }
 0x27e   : > { %v5449_v14 = vld [vmem:[%s7241_s29 + $0x8f0] sm:$0xf0] }
 0x27f   : > { %v6708_v15 = vld [vmem:[%s7241_s29 + $0xad4] sm:$0xf]  ;;  %v5452_v28 = vor.u32 %v6644_v44, %v5449_v14  ;;  %3970 = vmatpush.bf16.msrb.mxu3 %v6252_v19  ;;  %v4815_v44 = vld [vmem:[%s7241_s29 + $0x3d8] sm:$0xf]  ;;  %v3678_v14 = vadd.f32 %v8086_v39, %v783_v33 }
 0x280   : > { %v5705_v20 = vld [vmem:[%s7241_s29 + $0xaf0] sm:$0xf0]  ;;  %v6489_v19 = vld [vmem:[%s7241_s29 + $0x3f4] sm:$0xf0] }
 0x281   : > { %v6772_v21 = vld [vmem:[%s7241_s29 + $0xcd4] sm:$0xf]  ;;  %v5708_v29 = vor.u32 %v6708_v15, %v5705_v20  ;;  %3932 = vmatpush.bf16.msrb.mxu0 %v5452_v28  ;;  %v5071_v20 = vld [vmem:[%s7241_s29 + $0x5d8] sm:$0xf] }
 0x282   : > { %v5961_v22 = vld [vmem:[%s7241_s29 + $0xcf0] sm:$0xf0]  ;;  %v6617_v28 = vld [vmem:[%s7241_s29 + $0x7f4] sm:$0xf0] }
 0x283   : > { %v6836_v26 = vld [vmem:[%s7241_s29 + $0xed4] sm:$0xf]  ;;  %v5964_v12 = vor.u32 %v6772_v21, %v5961_v22  ;;  %3945 = vmatpush.bf16.msrb.mxu1 %v5708_v29  ;;  %v6553_v21 = vld [vmem:[%s7241_s29 + $0x5f4] sm:$0xf0]  ;;  %v4560_v29 = vor.u32 %v6425_v13, %v4559_v52 }
 0x284   : > { %v6217_v27 = vld [vmem:[%s7241_s29 + $0xef0] sm:$0xf0]  ;;  %v4431_v52 = vld [vmem:[%s7241_s29 + $0xd8] sm:$0xf] }
 0x285   : > { %v6636_v30 = vld [vmem:[%s7241_s29 + $0x894] sm:$0xf]  ;;  %v6220_v34 = vor.u32 %v6836_v26, %v6217_v27  ;;  %3958 = vmatpush.bf16.msrb.mxu2 %v5964_v12  ;;  %v5327_v27 = vld [vmem:[%s7241_s29 + $0x7d8] sm:$0xf]  ;;  %v4816_v12 = vor.u32 %v6489_v19, %v4815_v44 }
 0x286   : > { %v5417_v31 = vld [vmem:[%s7241_s29 + $0x8b0] sm:$0xf0]  ;;  %v6393_v13 = vld [vmem:[%s7241_s29 + $0xf4] sm:$0xf0] }
 0x287   : > { %v6700_v32 = vld [vmem:[%s7241_s29 + $0xa94] sm:$0xf]  ;;  %v5420_v47 = vor.u32 %v6636_v30, %v5417_v31  ;;  %3971 = vmatpush.bf16.msrb.mxu3 %v6220_v34  ;;  %v5072_v30 = vor.u32 %v6553_v21, %v5071_v20  ;;  %v3691_v31 = vadd.f32 %v8091_v16, %v3678_v14  ;;  %v6417_v34 = vld [vmem:[%s7241_s29 + $0x1b4] sm:$0xf0] }
 0x288   : > { %v5673_v35 = vld [vmem:[%s7241_s29 + $0xab0] sm:$0xf0]  ;;  %v4687_v44 = vld [vmem:[%s7241_s29 + $0x2d8] sm:$0xf] }
 0x289   : > { %v6764_v36 = vld [vmem:[%s7241_s29 + $0xc94] sm:$0xf]  ;;  %v5676_v18 = vor.u32 %v6700_v32, %v5673_v35  ;;  %3933 = vmatpush.bf16.msrb.mxu0 %v5420_v47  ;;  %v4527_v32 = vld [vmem:[%s7241_s29 + $0x198] sm:$0xf] }
 0x28a   : > { %v5929_v37 = vld [vmem:[%s7241_s29 + $0xcb0] sm:$0xf0]  ;;  %v4783_v35 = vld [vmem:[%s7241_s29 + $0x398] sm:$0xf]  ;;  %v4528_v16 = vor.u32 %v6417_v34, %v4527_v32  ;;  %v3755_v34 = vpop.f32.mrf.mxu2 }
 0x28b   : > { %v6828_v41 = vld [vmem:[%s7241_s29 + $0xe94] sm:$0xf]  ;;  %v5932_v53 = vor.u32 %v6764_v36, %v5929_v37  ;;  %3946 = vmatpush.bf16.msrb.mxu1 %v5676_v18  ;;  %v5328_v36 = vor.u32 %v6617_v28, %v5327_v27  ;;  %v6481_v37 = vld [vmem:[%s7241_s29 + $0x3b4] sm:$0xf0] }
 0x28c   : > { %v6185_v43 = vld [vmem:[%s7241_s29 + $0xeb0] sm:$0xf0]  ;;  %v5295_v47 = vld [vmem:[%s7241_s29 + $0x798] sm:$0xf]  ;;  %v4784_v18 = vor.u32 %v6481_v37, %v4783_v35 }
 0x28d   : > { %v6628_v54 = vld [vmem:[%s7241_s29 + $0x854] sm:$0xf]  ;;  %v6188_v56 = vor.u32 %v6828_v41, %v6185_v43  ;;  %3959 = vmatpush.bf16.msrb.mxu2 %v5932_v53  ;;  %v5039_v41 = vld [vmem:[%s7241_s29 + $0x598] sm:$0xf] }
 0x28e   : > { %v5385_v23 = vld [vmem:[%s7241_s29 + $0x870] sm:$0xf0]  ;;  %v6545_v43 = vld [vmem:[%s7241_s29 + $0x5b4] sm:$0xf0] }
 0x28f   : > { %v6692_v49 = vld [vmem:[%s7241_s29 + $0xa54] sm:$0xf]  ;;  %v5388_v63 = vor.u32 %v6628_v54, %v5385_v23  ;;  %3972 = vmatpush.bf16.msrb.mxu3 %v6188_v56  ;;  %v5040_v53 = vor.u32 %v6545_v43, %v5039_v41  ;;  %v3704_v54 = vadd.f32 %v8101_v1, %v3691_v31  ;;  %v4495_v23 = vld [vmem:[%s7241_s29 + $0x158] sm:$0xf]  ;;  %v5296_v56 = vor.u32 %v6609_v51, %v5295_v47  ;;  %v3768_v47 = vpop.f32.mrf.mxu3 }
 0x290   : > { %v5641_v57 = vld [vmem:[%s7241_s29 + $0xa70] sm:$0xf0]  ;;  %v6601_v1 = vld [vmem:[%s7241_s29 + $0x774] sm:$0xf0] }
 0x291   : > { %v6756_v58 = vld [vmem:[%s7241_s29 + $0xc54] sm:$0xf]  ;;  %v5644_v2 = vor.u32 %v6692_v49, %v5641_v57  ;;  %3934 = vmatpush.bf16.msrb.mxu0 %v5388_v63  ;;  %v6409_v49 = vld [vmem:[%s7241_s29 + $0x174] sm:$0xf0]  ;;  %v3717_v33 = vadd.f32 %v8106_v40, %v3704_v54 }
 0x292   : > { %v5897_v59 = vld [vmem:[%s7241_s29 + $0xc70] sm:$0xf0]  ;;  %v6473_v57 = vld [vmem:[%s7241_s29 + $0x374] sm:$0xf0] }
 0x293   : > { %v6820_v60 = vld [vmem:[%s7241_s29 + $0xe54] sm:$0xf]  ;;  %v5900_v50 = vor.u32 %v6756_v58, %v5897_v59  ;;  %3947 = vmatpush.bf16.msrb.mxu1 %v5644_v2  ;;  %v5007_v58 = vld [vmem:[%s7241_s29 + $0x558] sm:$0xf]  ;;  %v4752_v63 = vor.u32 %v6473_v57, %v4751_v55 }
 0x294   : > { %v6153_v61 = vld [vmem:[%s7241_s29 + $0xe70] sm:$0xf0]  ;;  %v6537_v59 = vld [vmem:[%s7241_s29 + $0x574] sm:$0xf0] }
 0x295   : > { %v6620_v0 = vld [vmem:[%s7241_s29 + $0x814] sm:$0xf]  ;;  %v6156_v6 = vor.u32 %v6820_v60, %v6153_v61  ;;  %3960 = vmatpush.bf16.msrb.mxu2 %v5900_v50  ;;  %v5263_v60 = vld [vmem:[%s7241_s29 + $0x758] sm:$0xf]  ;;  %v4496_v61 = vor.u32 %v6409_v49, %v4495_v23 }
 0x296   : > { %v5353_v38 = vld [vmem:[%s7241_s29 + $0x830] sm:$0xf0]  ;;  %v6401_v2 = vld [vmem:[%s7241_s29 + $0x134] sm:$0xf0] }
 0x297   : > { %v6684_v3 = vld [vmem:[%s7241_s29 + $0xa14] sm:$0xf]  ;;  %v5356_v15 = vor.u32 %v6620_v0, %v5353_v38  ;;  %3973 = vmatpush.bf16.msrb.mxu3 %v6156_v6  ;;  %v5008_v0 = vor.u32 %v6537_v59, %v5007_v58  ;;  %v4463_v38 = vld [vmem:[%s7241_s29 + $0x118] sm:$0xf] }
 0x298   : > { %v5609_v4 = vld [vmem:[%s7241_s29 + $0xa30] sm:$0xf0]  ;;  %v4719_v50 = vld [vmem:[%s7241_s29 + $0x318] sm:$0xf]  ;;  %v4464_v40 = vor.u32 %v6401_v2, %v4463_v38 }
 0x299   : > { %v6748_v5 = vld [vmem:[%s7241_s29 + $0xc14] sm:$0xf]  ;;  %v5612_v22 = vor.u32 %v6684_v3, %v5609_v4  ;;  %3935 = vmatpush.bf16.msrb.mxu0 %v5356_v15  ;;  %v5264_v3 = vor.u32 %v6601_v1, %v5263_v60  ;;  %v6465_v4 = vld [vmem:[%s7241_s29 + $0x334] sm:$0xf0]  ;;  %v3742_v15 = vpop.f32.mrf.mxu1 }
 0x29a   : > { %v5865_v8 = vld [vmem:[%s7241_s29 + $0xc30] sm:$0xf0]  ;;  %v5231_v6 = vld [vmem:[%s7241_s29 + $0x718] sm:$0xf] }
 0x29b   : > { %v6812_v9 = vld [vmem:[%s7241_s29 + $0xe14] sm:$0xf]  ;;  %v5868_v26 = vor.u32 %v6748_v5, %v5865_v8  ;;  %3948 = vmatpush.bf16.msrb.mxu1 %v5612_v22  ;;  %v4975_v5 = vld [vmem:[%s7241_s29 + $0x518] sm:$0xf] }
 0x29c   : > { %v6121_v10 = vld [vmem:[%s7241_s29 + $0xe30] sm:$0xf0]  ;;  %3936 = vmatmul.bf16.vlgmr.msrb.gmra.mxu0 %v7409_v45  ;;  %v6593_v8 = vld [vmem:[%s7241_s29 + $0x734] sm:$0xf0]  ;;  %v4976_v11 = vor.u32 %v6529_v62, %v4975_v5 }
 0x29d   : > { %v6124_v39 = vor.u32 %v6812_v9, %v6121_v10  ;;  %3961 = vmatpush.bf16.msrb.mxu2 %v5868_v26  ;;  %3980 = vmatpush.bf16.msra.mxu0 %v4560_v29  ;;  %v3729_v9 = vpop.f32.mrf.mxu0  ;;  %v4720_v10 = vor.u32 %v6465_v4, %v4719_v50  ;;  %v5232_v19 = vor.u32 %v6593_v8, %v5231_v6  ;;  %v6457_v20 = vld [vmem:[%s7241_s29 + $0x2f4] sm:$0xf0]  ;;  %v3757_v8 = vpop.f32.mrf.mxu2 }
 0x29e   : > { %3949 = vmatmul.bf16.vlgmr.msrb.gmra.mxu1 %v7413_v48  ;;  %v3730_v14 = vadd.f32 %v3729_v9, %v3717_v33  ;;  %v4943_v21 = vld [vmem:[%s7241_s29 + $0x4d8] sm:$0xf]  ;;  %v4688_v29 = vor.u32 %v6457_v20, %v4687_v44 }
 0x29f   : > { %3974 = vmatpush.bf16.msrb.mxu3 %v6124_v39  ;;  %3993 = vmatpush.bf16.msra.mxu1 %v4816_v12  ;;  %v6521_v22 = vld [vmem:[%s7241_s29 + $0x4f4] sm:$0xf0]  ;;  %v4432_v39 = vor.u32 %v6393_v13, %v4431_v52  ;;  %v3770_v52 = vpop.f32.mrf.mxu3 }
 0x2a0   : > { %3962 = vmatmul.bf16.vlgmr.msrb.gmra.mxu2 %v7405_v42  ;;  %v5199_v26 = vld [vmem:[%s7241_s29 + $0x6d8] sm:$0xf]  ;;  %v3743_v28 = vadd.f32 %v3742_v15, %v3730_v14  ;;  %v4944_v12 = vor.u32 %v6521_v22, %v4943_v21 }
 0x2a1   : > { %4006 = vmatpush.bf16.msra.mxu2 %v5072_v30  ;;  %3981 = vmatpush.bf16.msra.mxu0 %v4528_v16  ;;  %v6585_v27 = vld [vmem:[%s7241_s29 + $0x6f4] sm:$0xf0]  ;;  %v3744_v59 = vpop.f32.mrf.mxu1 }
 0x2a2   : > { %3975 = vmatmul.bf16.vlgmr.msrb.gmra.mxu3 %v7411_v46  ;;  %v4399_v30 = vld [vmem:[%s7241_s29 + $0x98] sm:$0xf]  ;;  %v5200_v35 = vor.u32 %v6585_v27, %v5199_v26  ;;  %v3756_v43 = vadd.f32 %v3755_v34, %v3743_v28 }
 0x2a3   : > { %4019 = vmatpush.bf16.msra.mxu3 %v5328_v36  ;;  %3994 = vmatpush.bf16.msra.mxu1 %v4784_v18  ;;  %v6385_v31 = vld [vmem:[%s7241_s29 + $0xb4] sm:$0xf0] }
 0x2a4   : > { %v4655_v32 = vld [vmem:[%s7241_s29 + $0x298] sm:$0xf]  ;;  %v4400_v18 = vor.u32 %v6385_v31, %v4399_v30 }
 0x2a5   : > { %4007 = vmatpush.bf16.msra.mxu2 %v5040_v53  ;;  %3982 = vmatpush.bf16.msra.mxu0 %v4496_v61  ;;  %v6449_v36 = vld [vmem:[%s7241_s29 + $0x2b4] sm:$0xf0]  ;;  %v3769_v53 = vadd.f32 %v3768_v47, %v3756_v43  ;;  %v3731_v23 = vpop.f32.mrf.mxu0 }
 0x2a6   : > { %v4911_v37 = vld [vmem:[%s7241_s29 + $0x498] sm:$0xf]  ;;  %v4656_v49 = vor.u32 %v6449_v36, %v4655_v32 }
 0x2a7   : > { %4020 = vmatpush.bf16.msra.mxu3 %v5296_v56  ;;  %3995 = vmatpush.bf16.msra.mxu1 %v4752_v63  ;;  %v6513_v41 = vld [vmem:[%s7241_s29 + $0x4b4] sm:$0xf0]  ;;  %v4191_v1 = vmax.f32 %v3769_v53, 0.0 }
 0x2a8   : > { %v5167_v51 = vld [vmem:[%s7241_s29 + $0x698] sm:$0xf]  ;;  %v4912_v55 = vor.u32 %v6513_v41, %v4911_v37 }
 0x2a9   : > { %4008 = vmatpush.bf16.msra.mxu2 %v5008_v0  ;;  %3983 = vmatpush.bf16.msra.mxu0 %v4464_v40  ;;  %v6577_v16 = vld [vmem:[%s7241_s29 + $0x6b4] sm:$0xf0]  ;;  %4199 = vst [vmem:[#allocation8 + $0x18] sm:$0xff] %v4191_v1  ;;  %v8240_v52 = vpop.f32.mrf.mxu1 }
 0x2aa   : > { %v4367_v54 = vld [vmem:[%s7241_s29 + $0x58] sm:$0xf]  ;;  %v5168_v60 = vor.u32 %v6577_v16, %v5167_v51 }
 0x2ab   : > { %4021 = vmatpush.bf16.msra.mxu3 %v5264_v3  ;;  %3996 = vmatpush.bf16.msra.mxu1 %v4720_v10  ;;  %v6377_v56 = vld [vmem:[%s7241_s29 + $0x74] sm:$0xf0] }
 0x2ac   : > { %v4623_v57 = vld [vmem:[%s7241_s29 + $0x258] sm:$0xf]  ;;  %v4368_v38 = vor.u32 %v6377_v56, %v4367_v54 }
 0x2ad   : > { %4009 = vmatpush.bf16.msra.mxu2 %v4976_v11  ;;  %3984 = vmatpush.bf16.msra.mxu0 %v4432_v39  ;;  %v6441_v58 = vld [vmem:[%s7241_s29 + $0x274] sm:$0xf0] }
 0x2ae   : > { %v4879_v61 = vld [vmem:[%s7241_s29 + $0x458] sm:$0xf]  ;;  %v4624_v3 = vor.u32 %v6441_v58, %v4623_v57 }
 0x2af   : > { %4022 = vmatpush.bf16.msra.mxu3 %v5232_v19  ;;  %3997 = vmatpush.bf16.msra.mxu1 %v4688_v29  ;;  %v6505_v33 = vld [vmem:[%s7241_s29 + $0x474] sm:$0xf0] }
 0x2b0   : > { %v5135_v63 = vld [vmem:[%s7241_s29 + $0x658] sm:$0xf]  ;;  %v4880_v4 = vor.u32 %v6505_v33, %v4879_v61 }
 0x2b1   : > { %4010 = vmatpush.bf16.msra.mxu2 %v4944_v12  ;;  %v6569_v0 = vld [vmem:[%s7241_s29 + $0x674] sm:$0xf0]  ;;  %3985 = vmatpush.bf16.msra.mxu0 %v4400_v18 }
 0x2b2   : > { %v4335_v2 = vld [vmem:[%s7241_s29 + $0x18] sm:$0xf]  ;;  %v5136_v40 = vor.u32 %v6569_v0, %v5135_v63 }
 0x2b3   : > { %4023 = vmatpush.bf16.msra.mxu3 %v5200_v35  ;;  %v6369_v50 = vld [vmem:[%s7241_s29 + $0x34] sm:$0xf0]  ;;  %3998 = vmatpush.bf16.msra.mxu1 %v4656_v49 }
 0x2b4   : > { %v4591_v5 = vld [vmem:[%s7241_s29 + $0x218] sm:$0xf]  ;;  %v4336_v15 = vor.u32 %v6369_v50, %v4335_v2 }
 0x2b5   : > { %4011 = vmatpush.bf16.msra.mxu2 %v4912_v55  ;;  %v6433_v62 = vld [vmem:[%s7241_s29 + $0x234] sm:$0xf0]  ;;  %3986 = vmatpush.bf16.msra.mxu0 %v4368_v38 }
 0x2b6   : > { %v4847_v6 = vld [vmem:[%s7241_s29 + $0x418] sm:$0xf]  ;;  %v4592_v22 = vor.u32 %v6433_v62, %v4591_v5 }
 0x2b7   : > { %4024 = vmatpush.bf16.msra.mxu3 %v5168_v60  ;;  %v6497_v9 = vld [vmem:[%s7241_s29 + $0x434] sm:$0xf0]  ;;  %3999 = vmatpush.bf16.msra.mxu1 %v4624_v3 }
 0x2b8   : > { %v5103_v10 = vld [vmem:[%s7241_s29 + $0x618] sm:$0xf]  ;;  %v4848_v26 = vor.u32 %v6497_v9, %v4847_v6  ;;  %v8235_v6 = vpop.f32.mrf.mxu0 }
 0x2b9   : > { %v6561_v11 = vld [vmem:[%s7241_s29 + $0x634] sm:$0xf0]  ;;  %4012 = vmatpush.bf16.msra.mxu2 %v4880_v4  ;;  %3987 = vmatpush.bf16.msra.mxu0 %v4336_v15 }
 0x2ba   : > { %v5583_v13 = vld [vmem:[%s7241_s29 + $0x9d8] sm:$0xf]  ;;  %v5104_v39 = vor.u32 %v6561_v11, %v5103_v10 }
 0x2bb   : > { %v6681_v44 = vld [vmem:[%s7241_s29 + $0x9f4] sm:$0xf0]  ;;  %4025 = vmatpush.bf16.msra.mxu3 %v5136_v40  ;;  %4000 = vmatpush.bf16.msra.mxu1 %v4592_v22 }
 0x2bc   : > { %v5839_v14 = vld [vmem:[%s7241_s29 + $0xbd8] sm:$0xf]  ;;  %v5584_v29 = vor.u32 %v6681_v44, %v5583_v13  ;;  %3988 = vmatmul.bf16.vlgmr.msra.gmra.mxu0 %v7345_v17 }
 0x2bd   : > { %v6745_v19 = vld [vmem:[%s7241_s29 + $0xbf4] sm:$0xf0]  ;;  %4013 = vmatpush.bf16.msra.mxu2 %v4848_v26 }
 0x2be   : > { %v6095_v20 = vld [vmem:[%s7241_s29 + $0xdd8] sm:$0xf]  ;;  %v5840_v12 = vor.u32 %v6745_v19, %v5839_v14  ;;  %4032 = vmatpush.bf16.msrb.mxu0 %v5584_v29  ;;  %4001 = vmatmul.bf16.vlgmr.msra.gmra.mxu1 %v7352_v25  ;;  %v8250_v29 = vpop.f32.mrf.mxu2 }
 0x2bf   : > { %v6809_v21 = vld [vmem:[%s7241_s29 + $0xdf4] sm:$0xf0]  ;;  %4026 = vmatpush.bf16.msra.mxu3 %v5104_v39 }
 0x2c0   : > { %v6351_v27 = vld [vmem:[%s7241_s29 + $0xfd8] sm:$0xf]  ;;  %v6096_v30 = vor.u32 %v6809_v21, %v6095_v20  ;;  %4045 = vmatpush.bf16.msrb.mxu1 %v5840_v12  ;;  %4014 = vmatmul.bf16.vlgmr.msra.gmra.mxu2 %v7337_v7 }
 0x2c1   : > { %v6873_v28 = vld [vmem:[%s7241_s29 + $0xff4] sm:$0xf0] }
 0x2c2   : > { %v5551_v31 = vld [vmem:[%s7241_s29 + $0x998] sm:$0xf]  ;;  %v6352_v35 = vor.u32 %v6873_v28, %v6351_v27  ;;  %4058 = vmatpush.bf16.msrb.mxu2 %v6096_v30  ;;  %4027 = vmatmul.bf16.vlgmr.msra.gmra.mxu3 %v7350_v24 }
 0x2c3   : > { %v6673_v32 = vld [vmem:[%s7241_s29 + $0x9b4] sm:$0xf0] }
 0x2c4   : > { %v5807_v34 = vld [vmem:[%s7241_s29 + $0xb98] sm:$0xf]  ;;  %v5552_v51 = vor.u32 %v6673_v32, %v5551_v31  ;;  %4071 = vmatpush.bf16.msrb.mxu3 %v6352_v35 }
 0x2c5   : > { %v6737_v36 = vld [vmem:[%s7241_s29 + $0xbb4] sm:$0xf0] }
 0x2c6   : > { %v6063_v37 = vld [vmem:[%s7241_s29 + $0xd98] sm:$0xf]  ;;  %v5808_v16 = vor.u32 %v6737_v36, %v5807_v34  ;;  %4033 = vmatpush.bf16.msrb.mxu0 %v5552_v51  ;;  %v8255_v34 = vpop.f32.mrf.mxu3 }
 0x2c7   : > { %v6801_v41 = vld [vmem:[%s7241_s29 + $0xdb4] sm:$0xf0] }
 0x2c8   : > { %v6319_v43 = vld [vmem:[%s7241_s29 + $0xf98] sm:$0xf]  ;;  %v6064_v18 = vor.u32 %v6801_v41, %v6063_v37  ;;  %4046 = vmatpush.bf16.msrb.mxu1 %v5808_v16  ;;  %v3783_v41 = vpop.f32.mrf.mxu0 }
 0x2c9   : > { %v6865_v47 = vld [vmem:[%s7241_s29 + $0xfb4] sm:$0xf0]  ;;  %v6605_v41 = vld [vmem:[%s7241_s29 + $0x79c] sm:$0xf] }
 0x2ca   : > { %v5519_v53 = vld [vmem:[%s7241_s29 + $0x958] sm:$0xf]  ;;  %v6320_v49 = vor.u32 %v6865_v47, %v6319_v43  ;;  %4059 = vmatpush.bf16.msrb.mxu2 %v6064_v18 }
 0x2cb   : > { %v6665_v54 = vld [vmem:[%s7241_s29 + $0x974] sm:$0xf0] }
 0x2cc   : > { %v5775_v23 = vld [vmem:[%s7241_s29 + $0xb58] sm:$0xf]  ;;  %v5520_v60 = vor.u32 %v6665_v54, %v5519_v53  ;;  %4072 = vmatpush.bf16.msrb.mxu3 %v6320_v49  ;;  %v3796_v53 = vpop.f32.mrf.mxu1 }
 0x2cd   : > { %v6729_v55 = vld [vmem:[%s7241_s29 + $0xb74] sm:$0xf0]  ;;  %v4497_v53 = vld [vmem:[%s7241_s29 + $0x178] sm:$0xf0] }
 0x2ce   : > { %v6031_v56 = vld [vmem:[%s7241_s29 + $0xd58] sm:$0xf]  ;;  %v5776_v1 = vor.u32 %v6729_v55, %v5775_v23  ;;  %4034 = vmatpush.bf16.msrb.mxu0 %v5520_v60 }
 0x2cf   : > { %v6793_v57 = vld [vmem:[%s7241_s29 + $0xd74] sm:$0xf0] }
 0x2d0   : > { %v6287_v58 = vld [vmem:[%s7241_s29 + $0xf58] sm:$0xf]  ;;  %v6032_v61 = vor.u32 %v6793_v57, %v6031_v56  ;;  %4047 = vmatpush.bf16.msrb.mxu1 %v5776_v1 }
 0x2d1   : > { %v6857_v59 = vld [vmem:[%s7241_s29 + $0xf74] sm:$0xf0] }
 0x2d2   : > { %v5487_v33 = vld [vmem:[%s7241_s29 + $0x918] sm:$0xf]  ;;  %v6288_v38 = vor.u32 %v6857_v59, %v6287_v58  ;;  %4060 = vmatpush.bf16.msrb.mxu2 %v6032_v61  ;;  %v8268_v58 = vld [vmem:[%s7247_s4] sm:$0xff] }
 0x2d3   : > { %v6657_v63 = vld [vmem:[%s7241_s29 + $0x934] sm:$0xf0]  ;;  %v784_v59 = vperm.slane %v8268_v58, 4 }
 0x2d4   : > { %v5743_v0 = vld [vmem:[%s7241_s29 + $0xb18] sm:$0xf]  ;;  %v5488_v62 = vor.u32 %v6657_v63, %v5487_v33  ;;  %4073 = vmatpush.bf16.msrb.mxu3 %v6288_v38 }
 0x2d5   : > { %v6721_v2 = vld [vmem:[%s7241_s29 + $0xb34] sm:$0xf0] }
 0x2d6   : > { %v5999_v50 = vld [vmem:[%s7241_s29 + $0xd18] sm:$0xf]  ;;  %v5744_v8 = vor.u32 %v6721_v2, %v5743_v0  ;;  %4035 = vmatpush.bf16.msrb.mxu0 %v5488_v62 }
 0x2d7   : > { %v6785_v3 = vld [vmem:[%s7241_s29 + $0xd34] sm:$0xf0] }
 0x2d8   : > { %v6255_v4 = vld [vmem:[%s7241_s29 + $0xf18] sm:$0xf]  ;;  %v6000_v40 = vor.u32 %v6785_v3, %v5999_v50  ;;  %4048 = vmatpush.bf16.msrb.mxu1 %v5744_v8  ;;  %v3809_v50 = vpop.f32.mrf.mxu2  ;;  %v3822_v8 = vpop.f32.mrf.mxu3 }
 0x2d9   : > { %v6849_v5 = vld [vmem:[%s7241_s29 + $0xf34] sm:$0xf0]  ;;  %v6525_v50 = vld [vmem:[%s7241_s29 + $0x51c] sm:$0xf] }
 0x2da   : > { %v5455_v9 = vld [vmem:[%s7241_s29 + $0x8d8] sm:$0xf]  ;;  %v6256_v13 = vor.u32 %v6849_v5, %v6255_v4  ;;  %4061 = vmatpush.bf16.msrb.mxu2 %v6000_v40  ;;  %v6421_v40 = vld [vmem:[%s7241_s29 + $0x1dc] sm:$0xf] }
 0x2db   : > { %v6649_v10 = vld [vmem:[%s7241_s29 + $0x8f4] sm:$0xf0] }
 0x2dc   : > { %v5711_v11 = vld [vmem:[%s7241_s29 + $0xad8] sm:$0xf]  ;;  %v5456_v21 = vor.u32 %v6649_v10, %v5455_v9  ;;  %4074 = vmatpush.bf16.msrb.mxu3 %v6256_v13  ;;  %v4561_v9 = vld [vmem:[%s7241_s29 + $0x1f8] sm:$0xf0] }
 0x2dd   : > { %v6713_v44 = vld [vmem:[%s7241_s29 + $0xaf4] sm:$0xf0]  ;;  %v6485_v10 = vld [vmem:[%s7241_s29 + $0x3dc] sm:$0xf] }
 0x2de   : > { %v5967_v14 = vld [vmem:[%s7241_s29 + $0xcd8] sm:$0xf]  ;;  %v5712_v22 = vor.u32 %v6713_v44, %v5711_v11  ;;  %4036 = vmatpush.bf16.msrb.mxu0 %v5456_v21  ;;  %v3782_v11 = vadd.f32 %v8235_v6, %v784_v59  ;;  %v4817_v44 = vld [vmem:[%s7241_s29 + $0x3f8] sm:$0xf0] }
 0x2df   : > { %v6777_v15 = vld [vmem:[%s7241_s29 + $0xcf4] sm:$0xf0]  ;;  %v6613_v21 = vld [vmem:[%s7241_s29 + $0x7dc] sm:$0xf] }
 0x2e0   : > { %v6223_v19 = vld [vmem:[%s7241_s29 + $0xed8] sm:$0xf]  ;;  %v5968_v26 = vor.u32 %v6777_v15, %v5967_v14  ;;  %4049 = vmatpush.bf16.msrb.mxu1 %v5712_v22  ;;  %v6549_v14 = vld [vmem:[%s7241_s29 + $0x5dc] sm:$0xf] }
 0x2e1   : > { %v6841_v20 = vld [vmem:[%s7241_s29 + $0xef4] sm:$0xf0]  ;;  %v5073_v15 = vld [vmem:[%s7241_s29 + $0x5f8] sm:$0xf0] }
 0x2e2   : > { %v5423_v27 = vld [vmem:[%s7241_s29 + $0x898] sm:$0xf]  ;;  %v6224_v12 = vor.u32 %v6841_v20, %v6223_v19  ;;  %4062 = vmatpush.bf16.msrb.mxu2 %v5968_v26  ;;  %v5329_v22 = vld [vmem:[%s7241_s29 + $0x7f8] sm:$0xf0]  ;;  %v4564_v26 = vor.u32 %v6421_v40, %v4561_v9 }
 0x2e3   : > { %v6641_v28 = vld [vmem:[%s7241_s29 + $0x8b4] sm:$0xf0]  ;;  %v6389_v9 = vld [vmem:[%s7241_s29 + $0xdc] sm:$0xf] }
 0x2e4   : > { %v5679_v39 = vld [vmem:[%s7241_s29 + $0xa98] sm:$0xf]  ;;  %v5424_v37 = vor.u32 %v6641_v28, %v5423_v27  ;;  %4075 = vmatpush.bf16.msrb.mxu3 %v6224_v12  ;;  %v4820_v27 = vor.u32 %v6485_v10, %v4817_v44  ;;  %v5076_v28 = vor.u32 %v6549_v14, %v5073_v15  ;;  %v6413_v12 = vld [vmem:[%s7241_s29 + $0x19c] sm:$0xf]  ;;  %v3846_v44 = vpop.f32.mrf.mxu1 }
 0x2e5   : > { %v6705_v30 = vld [vmem:[%s7241_s29 + $0xab4] sm:$0xf0]  ;;  %v4433_v10 = vld [vmem:[%s7241_s29 + $0xf8] sm:$0xf0] }
 0x2e6   : > { %v5935_v31 = vld [vmem:[%s7241_s29 + $0xc98] sm:$0xf]  ;;  %v5680_v43 = vor.u32 %v6705_v30, %v5679_v39  ;;  %4037 = vmatpush.bf16.msrb.mxu0 %v5424_v37  ;;  %v3795_v39 = vadd.f32 %v8240_v52, %v3782_v11  ;;  %v4529_v30 = vld [vmem:[%s7241_s29 + $0x1b8] sm:$0xf0] }
 0x2e7   : > { %v6769_v32 = vld [vmem:[%s7241_s29 + $0xcb4] sm:$0xf0]  ;;  %v5041_v37 = vld [vmem:[%s7241_s29 + $0x5b8] sm:$0xf0]  ;;  %v4532_v52 = vor.u32 %v6413_v12, %v4529_v30 }
 0x2e8   : > { %v6191_v35 = vld [vmem:[%s7241_s29 + $0xe98] sm:$0xf]  ;;  %v5936_v47 = vor.u32 %v6769_v32, %v5935_v31  ;;  %4050 = vmatpush.bf16.msrb.mxu1 %v5680_v43  ;;  %v6477_v31 = vld [vmem:[%s7241_s29 + $0x39c] sm:$0xf]  ;;  %v5332_v32 = vor.u32 %v6613_v21, %v5329_v22 }
 0x2e9   : > { %v6833_v36 = vld [vmem:[%s7241_s29 + $0xeb4] sm:$0xf0]  ;;  %v5297_v43 = vld [vmem:[%s7241_s29 + $0x7b8] sm:$0xf0] }
 0x2ea   : > { %v5391_v51 = vld [vmem:[%s7241_s29 + $0x858] sm:$0xf]  ;;  %v6192_v54 = vor.u32 %v6833_v36, %v6191_v35  ;;  %4063 = vmatpush.bf16.msrb.mxu2 %v5936_v47  ;;  %v4785_v35 = vld [vmem:[%s7241_s29 + $0x3b8] sm:$0xf0] }
 0x2eb   : > { %v6633_v16 = vld [vmem:[%s7241_s29 + $0x874] sm:$0xf0]  ;;  %v6541_v36 = vld [vmem:[%s7241_s29 + $0x59c] sm:$0xf]  ;;  %v4788_v47 = vor.u32 %v6477_v31, %v4785_v35  ;;  %v3859_v31 = vpop.f32.mrf.mxu2 }
 0x2ec   : > { %v5647_v18 = vld [vmem:[%s7241_s29 + $0xa58] sm:$0xf]  ;;  %v5392_v60 = vor.u32 %v6633_v16, %v5391_v51  ;;  %4076 = vmatpush.bf16.msrb.mxu3 %v6192_v54  ;;  %v5044_v51 = vor.u32 %v6541_v36, %v5041_v37  ;;  %v3808_v16 = vadd.f32 %v8250_v29, %v3795_v39  ;;  %v6469_v54 = vld [vmem:[%s7241_s29 + $0x35c] sm:$0xf] }
 0x2ed   : > { %v6697_v23 = vld [vmem:[%s7241_s29 + $0xa74] sm:$0xf0]  ;;  %v5265_v29 = vld [vmem:[%s7241_s29 + $0x778] sm:$0xf0] }
 0x2ee   : > { %v5903_v49 = vld [vmem:[%s7241_s29 + $0xc58] sm:$0xf]  ;;  %v5648_v33 = vor.u32 %v6697_v23, %v5647_v18  ;;  %4038 = vmatpush.bf16.msrb.mxu0 %v5392_v60  ;;  %v6405_v18 = vld [vmem:[%s7241_s29 + $0x15c] sm:$0xf]  ;;  %v5300_v23 = vor.u32 %v6605_v41, %v5297_v43  ;;  %v3821_v60 = vadd.f32 %v8255_v34, %v3808_v16  ;;  %v3872_v43 = vpop.f32.mrf.mxu3 }
 0x2ef   : > { %v6761_v55 = vld [vmem:[%s7241_s29 + $0xc74] sm:$0xf0]  ;;  %v4500_v59 = vor.u32 %v6405_v18, %v4497_v53  ;;  %v6453_v11 = vld [vmem:[%s7241_s29 + $0x2dc] sm:$0xf] }
 0x2f0   : > { %v6159_v56 = vld [vmem:[%s7241_s29 + $0xe58] sm:$0xf]  ;;  %v5904_v63 = vor.u32 %v6761_v55, %v5903_v49  ;;  %4051 = vmatpush.bf16.msrb.mxu1 %v5648_v33  ;;  %v4753_v49 = vld [vmem:[%s7241_s29 + $0x378] sm:$0xf0] }
 0x2f1   : > { %v6825_v57 = vld [vmem:[%s7241_s29 + $0xe74] sm:$0xf0]  ;;  %v6533_v55 = vld [vmem:[%s7241_s29 + $0x55c] sm:$0xf] }
 0x2f2   : > { %v5359_v1 = vld [vmem:[%s7241_s29 + $0x818] sm:$0xf]  ;;  %v6160_v3 = vor.u32 %v6825_v57, %v6159_v56  ;;  %4064 = vmatpush.bf16.msrb.mxu2 %v5904_v63  ;;  %v5009_v56 = vld [vmem:[%s7241_s29 + $0x578] sm:$0xf0] }
 0x2f3   : > { %v6625_v61 = vld [vmem:[%s7241_s29 + $0x834] sm:$0xf0]  ;;  %v6597_v57 = vld [vmem:[%s7241_s29 + $0x75c] sm:$0xf] }
 0x2f4   : > { %v5615_v0 = vld [vmem:[%s7241_s29 + $0xa18] sm:$0xf]  ;;  %v5360_v13 = vor.u32 %v6625_v61, %v5359_v1  ;;  %4077 = vmatpush.bf16.msrb.mxu3 %v6160_v3  ;;  %v4756_v1 = vor.u32 %v6469_v54, %v4753_v49  ;;  %v5012_v61 = vor.u32 %v6533_v55, %v5009_v56  ;;  %v6397_v33 = vld [vmem:[%s7241_s29 + $0x11c] sm:$0xf] }
 0x2f5   : > { %v6689_v38 = vld [vmem:[%s7241_s29 + $0xa34] sm:$0xf0]  ;;  %v4465_v63 = vld [vmem:[%s7241_s29 + $0x138] sm:$0xf0] }
 0x2f6   : > { %v5871_v2 = vld [vmem:[%s7241_s29 + $0xc18] sm:$0xf]  ;;  %v5616_v19 = vor.u32 %v6689_v38, %v5615_v0  ;;  %4039 = vmatpush.bf16.msrb.mxu0 %v5360_v13  ;;  %v6461_v0 = vld [vmem:[%s7241_s29 + $0x31c] sm:$0xf]  ;;  %v5268_v38 = vor.u32 %v6597_v57, %v5265_v29  ;;  %v4468_v34 = vor.u32 %v6397_v33, %v4465_v63  ;;  %v3848_v57 = vpop.f32.mrf.mxu1 }
 0x2f7   : > { %v6753_v4 = vld [vmem:[%s7241_s29 + $0xc34] sm:$0xf0]  ;;  %v4977_v3 = vld [vmem:[%s7241_s29 + $0x538] sm:$0xf0] }
 0x2f8   : > { %v6127_v5 = vld [vmem:[%s7241_s29 + $0xe18] sm:$0xf]  ;;  %v5872_v20 = vor.u32 %v6753_v4, %v5871_v2  ;;  %4052 = vmatpush.bf16.msrb.mxu1 %v5616_v19  ;;  %v4721_v2 = vld [vmem:[%s7241_s29 + $0x338] sm:$0xf0]  ;;  %v4980_v40 = vor.u32 %v6525_v50, %v4977_v3 }
 0x2f9   : > { %v6817_v62 = vld [vmem:[%s7241_s29 + $0xe34] sm:$0xf0]  ;;  %4040 = vmatmul.bf16.vlgmr.msrb.gmra.mxu0 %v7409_v45  ;;  %v6589_v4 = vld [vmem:[%s7241_s29 + $0x71c] sm:$0xf]  ;;  %v4724_v8 = vor.u32 %v6461_v0, %v4721_v2 }
 0x2fa   : > { %v6128_v6 = vor.u32 %v6817_v62, %v6127_v5  ;;  %4065 = vmatpush.bf16.msrb.mxu2 %v5872_v20  ;;  %4084 = vmatpush.bf16.msra.mxu0 %v4564_v26  ;;  %v5233_v5 = vld [vmem:[%s7241_s29 + $0x738] sm:$0xf0]  ;;  %v3833_v62 = vpop.f32.mrf.mxu0  ;;  %v4436_v26 = vor.u32 %v6389_v9, %v4433_v10  ;;  %v3874_v10 = vpop.f32.mrf.mxu3 }
 0x2fb   : > { %4053 = vmatmul.bf16.vlgmr.msrb.gmra.mxu1 %v7413_v48  ;;  %v3834_v13 = vadd.f32 %v3833_v62, %v3821_v60  ;;  %v5236_v14 = vor.u32 %v6589_v4, %v5233_v5  ;;  %v4689_v15 = vld [vmem:[%s7241_s29 + $0x2f8] sm:$0xf0] }
 0x2fc   : > { %4078 = vmatpush.bf16.msrb.mxu3 %v6128_v6  ;;  %4097 = vmatpush.bf16.msra.mxu1 %v4820_v27  ;;  %v6517_v19 = vld [vmem:[%s7241_s29 + $0x4dc] sm:$0xf]  ;;  %v4692_v27 = vor.u32 %v6453_v11, %v4689_v15 }
 0x2fd   : > { %4066 = vmatmul.bf16.vlgmr.msrb.gmra.mxu2 %v7405_v42  ;;  %v4945_v20 = vld [vmem:[%s7241_s29 + $0x4f8] sm:$0xf0]  ;;  %v3847_v6 = vadd.f32 %v3846_v44, %v3834_v13 }
 0x2fe   : > { %4110 = vmatpush.bf16.msra.mxu2 %v5076_v28  ;;  %4085 = vmatpush.bf16.msra.mxu0 %v4532_v52  ;;  %v6581_v21 = vld [vmem:[%s7241_s29 + $0x6dc] sm:$0xf]  ;;  %v4948_v28 = vor.u32 %v6517_v19, %v4945_v20 }
 0x2ff   : > { %4079 = vmatmul.bf16.vlgmr.msrb.gmra.mxu3 %v7411_v46  ;;  %v5201_v22 = vld [vmem:[%s7241_s29 + $0x6f8] sm:$0xf0]  ;;  %v3860_v41 = vadd.f32 %v3859_v31, %v3847_v6 }
 0x300   : > { %4123 = vmatpush.bf16.msra.mxu3 %v5332_v32  ;;  %4098 = vmatpush.bf16.msra.mxu1 %v4788_v47  ;;  %v6381_v39 = vld [vmem:[%s7241_s29 + $0x9c] sm:$0xf]  ;;  %v5204_v32 = vor.u32 %v6581_v21, %v5201_v22 }
 0x301   : > { %v4401_v12 = vld [vmem:[%s7241_s29 + $0xb8] sm:$0xf0]  ;;  %v3873_v16 = vadd.f32 %v3872_v43, %v3860_v41 }
 0x302   : > { %4111 = vmatpush.bf16.msra.mxu2 %v5044_v51  ;;  %4086 = vmatpush.bf16.msra.mxu0 %v4500_v59  ;;  %v6445_v30 = vld [vmem:[%s7241_s29 + $0x29c] sm:$0xf]  ;;  %v4404_v51 = vor.u32 %v6381_v39, %v4401_v12  ;;  %v3835_v53 = vpop.f32.mrf.mxu0 }
 0x303   : > { %v4657_v35 = vld [vmem:[%s7241_s29 + $0x2b8] sm:$0xf0]  ;;  %v4192_v59 = vmax.f32 %v3873_v16, 0.0 }
 0x304   : > { %4124 = vmatpush.bf16.msra.mxu3 %v5300_v23  ;;  %4099 = vmatpush.bf16.msra.mxu1 %v4756_v1  ;;  %v6509_v36 = vld [vmem:[%s7241_s29 + $0x49c] sm:$0xf]  ;;  %v4660_v54 = vor.u32 %v6445_v30, %v4657_v35 }
 0x305   : > { %v4913_v37 = vld [vmem:[%s7241_s29 + $0x4b8] sm:$0xf0]  ;;  %4200 = vst [vmem:[#allocation8 + $0x20] sm:$0xff] %v4192_v59 }
 0x306   : > { %4112 = vmatpush.bf16.msra.mxu2 %v5012_v61  ;;  %4087 = vmatpush.bf16.msra.mxu0 %v4468_v34  ;;  %v6573_v52 = vld [vmem:[%s7241_s29 + $0x69c] sm:$0xf]  ;;  %v4916_v23 = vor.u32 %v6509_v36, %v4913_v37  ;;  %v3861_v34 = vpop.f32.mrf.mxu2 }
 0x307   : > { %v5169_v47 = vld [vmem:[%s7241_s29 + $0x6b8] sm:$0xf0] }
 0x308   : > { %4125 = vmatpush.bf16.msra.mxu3 %v5268_v38  ;;  %4100 = vmatpush.bf16.msra.mxu1 %v4724_v8  ;;  %v6373_v18 = vld [vmem:[%s7241_s29 + $0x5c] sm:$0xf]  ;;  %v5172_v29 = vor.u32 %v6573_v52, %v5169_v47 }
 0x309   : > { %v4369_v49 = vld [vmem:[%s7241_s29 + $0x78] sm:$0xf0] }
 0x30a   : > { %4113 = vmatpush.bf16.msra.mxu2 %v4980_v40  ;;  %4088 = vmatpush.bf16.msra.mxu0 %v4436_v26  ;;  %v6437_v55 = vld [vmem:[%s7241_s29 + $0x25c] sm:$0xf]  ;;  %v4372_v63 = vor.u32 %v6373_v18, %v4369_v49 }
 0x30b   : > { %v4625_v56 = vld [vmem:[%s7241_s29 + $0x278] sm:$0xf0] }
 0x30c   : > { %4126 = vmatpush.bf16.msra.mxu3 %v5236_v14  ;;  %4101 = vmatpush.bf16.msra.mxu1 %v4692_v27  ;;  %v6501_v60 = vld [vmem:[%s7241_s29 + $0x45c] sm:$0xf]  ;;  %v4628_v2 = vor.u32 %v6437_v55, %v4625_v56 }
 0x30d   : > { %v4881_v1 = vld [vmem:[%s7241_s29 + $0x478] sm:$0xf0] }
 0x30e   : > { %4114 = vmatpush.bf16.msra.mxu2 %v4948_v28  ;;  %v6565_v61 = vld [vmem:[%s7241_s29 + $0x65c] sm:$0xf]  ;;  %4089 = vmatpush.bf16.msra.mxu0 %v4404_v51  ;;  %v4884_v50 = vor.u32 %v6501_v60, %v4881_v1 }
 0x30f   : > { %v5137_v33 = vld [vmem:[%s7241_s29 + $0x678] sm:$0xf0] }
 0x310   : > { %4127 = vmatpush.bf16.msra.mxu3 %v5204_v32  ;;  %v6365_v0 = vld [vmem:[%s7241_s29 + $0x1c] sm:$0xf]  ;;  %4102 = vmatpush.bf16.msra.mxu1 %v4660_v54  ;;  %v5140_v62 = vor.u32 %v6565_v61, %v5137_v33 }
 0x311   : > { %v4337_v38 = vld [vmem:[%s7241_s29 + $0x38] sm:$0xf0] }
 0x312   : > { %4115 = vmatpush.bf16.msra.mxu2 %v4916_v23  ;;  %v6429_v3 = vld [vmem:[%s7241_s29 + $0x21c] sm:$0xf]  ;;  %4090 = vmatpush.bf16.msra.mxu0 %v4372_v63  ;;  %v4340_v14 = vor.u32 %v6365_v0, %v4337_v38 }
 0x313   : > { %v4593_v4 = vld [vmem:[%s7241_s29 + $0x238] sm:$0xf0] }
 0x314   : > { %v6493_v5 = vld [vmem:[%s7241_s29 + $0x41c] sm:$0xf]  ;;  %4128 = vmatpush.bf16.msra.mxu3 %v5172_v29  ;;  %4103 = vmatpush.bf16.msra.mxu1 %v4628_v2  ;;  %v4596_v21 = vor.u32 %v6429_v3, %v4593_v4 }
 0x315   : > { %v4849_v8 = vld [vmem:[%s7241_s29 + $0x438] sm:$0xf0] }
 0x316   : > { %v6557_v40 = vld [vmem:[%s7241_s29 + $0x61c] sm:$0xf]  ;;  %4116 = vmatpush.bf16.msra.mxu2 %v4884_v50  ;;  %v4852_v22 = vor.u32 %v6493_v5, %v4849_v8  ;;  %4091 = vmatpush.bf16.msra.mxu0 %v4340_v14  ;;  %v8387_v50 = vpop.f32.mrf.mxu0  ;;  %v8392_v8 = vpop.f32.mrf.mxu1 }
 0x317   : > { %v5105_v9 = vld [vmem:[%s7241_s29 + $0x638] sm:$0xf0] }
 0x318   : > { %v6677_v11 = vld [vmem:[%s7241_s29 + $0x9dc] sm:$0xf]  ;;  %4129 = vmatpush.bf16.msra.mxu3 %v5140_v62  ;;  %v5108_v27 = vor.u32 %v6557_v40, %v5105_v9  ;;  %4104 = vmatpush.bf16.msra.mxu1 %v4596_v21 }
 0x319   : > { %v5585_v13 = vld [vmem:[%s7241_s29 + $0x9f8] sm:$0xf0]  ;;  %4092 = vmatmul.bf16.vlgmr.msra.gmra.mxu0 %v7345_v17 }
 0x31a   : > { %v6741_v44 = vld [vmem:[%s7241_s29 + $0xbdc] sm:$0xf]  ;;  %v5588_v28 = vor.u32 %v6677_v11, %v5585_v13  ;;  %4117 = vmatpush.bf16.msra.mxu2 %v4852_v22 }
 0x31b   : > { %v5841_v15 = vld [vmem:[%s7241_s29 + $0xbf8] sm:$0xf0]  ;;  %4105 = vmatmul.bf16.vlgmr.msra.gmra.mxu1 %v7352_v25 }
 0x31c   : > { %v6805_v19 = vld [vmem:[%s7241_s29 + $0xddc] sm:$0xf]  ;;  %v5844_v39 = vor.u32 %v6741_v44, %v5841_v15  ;;  %4130 = vmatpush.bf16.msra.mxu3 %v5108_v27  ;;  %4136 = vmatpush.bf16.msrb.mxu0 %v5588_v28 }
 0x31d   : > { %v6097_v20 = vld [vmem:[%s7241_s29 + $0xdf8] sm:$0xf0]  ;;  %4118 = vmatmul.bf16.vlgmr.msra.gmra.mxu2 %v7337_v7 }
 0x31e   : > { %v6869_v6 = vld [vmem:[%s7241_s29 + $0xfdc] sm:$0xf]  ;;  %v6100_v12 = vor.u32 %v6805_v19, %v6097_v20  ;;  %4149 = vmatpush.bf16.msrb.mxu1 %v5844_v39 }
 0x31f   : > { %v6353_v26 = vld [vmem:[%s7241_s29 + $0xff8] sm:$0xf0]  ;;  %4131 = vmatmul.bf16.vlgmr.msra.gmra.mxu3 %v7350_v24 }
 0x320   : > { %v6669_v30 = vld [vmem:[%s7241_s29 + $0x99c] sm:$0xf]  ;;  %v6356_v35 = vor.u32 %v6869_v6, %v6353_v26  ;;  %4162 = vmatpush.bf16.msrb.mxu2 %v6100_v12  ;;  %v3911_v6 = vpop.f32.mrf.mxu2  ;;  %v3924_v12 = vpop.f32.mrf.mxu3 }
 0x321   : > { %v5553_v31 = vld [vmem:[%s7241_s29 + $0x9b8] sm:$0xf0] }
 0x322   : > { %v6733_v32 = vld [vmem:[%s7241_s29 + $0xb9c] sm:$0xf]  ;;  %v5556_v47 = vor.u32 %v6669_v30, %v5553_v31  ;;  %4175 = vmatpush.bf16.msrb.mxu3 %v6356_v35  ;;  %v3887_v35 = vpop.f32.mrf.mxu0 }
 0x323   : > { %v5809_v36 = vld [vmem:[%s7241_s29 + $0xbb8] sm:$0xf0] }
 0x324   : > { %v6797_v37 = vld [vmem:[%s7241_s29 + $0xd9c] sm:$0xf]  ;;  %v5812_v51 = vor.u32 %v6733_v32, %v5809_v36  ;;  %4137 = vmatpush.bf16.msrb.mxu0 %v5556_v47  ;;  %v3900_v47 = vpop.f32.mrf.mxu1 }
 0x325   : > { %v6065_v41 = vld [vmem:[%s7241_s29 + $0xdb8] sm:$0xf0] }
 0x326   : > { %v6861_v43 = vld [vmem:[%s7241_s29 + $0xf9c] sm:$0xf]  ;;  %v6068_v16 = vor.u32 %v6797_v37, %v6065_v41  ;;  %4150 = vmatpush.bf16.msrb.mxu1 %v5812_v51 }
 0x327   : > { %v6321_v52 = vld [vmem:[%s7241_s29 + $0xfb8] sm:$0xf0] }
 0x328   : > { %v6661_v18 = vld [vmem:[%s7241_s29 + $0x95c] sm:$0xf]  ;;  %v6324_v23 = vor.u32 %v6861_v43, %v6321_v52  ;;  %4163 = vmatpush.bf16.msrb.mxu2 %v6068_v16 }
 0x329   : > { %v5521_v53 = vld [vmem:[%s7241_s29 + $0x978] sm:$0xf0] }
 0x32a   : > { %v6725_v54 = vld [vmem:[%s7241_s29 + $0xb5c] sm:$0xf]  ;;  %v5524_v59 = vor.u32 %v6661_v18, %v5521_v53  ;;  %4176 = vmatpush.bf16.msrb.mxu3 %v6324_v23 }
 0x32b   : > { %v5777_v49 = vld [vmem:[%s7241_s29 + $0xb78] sm:$0xf0] }
 0x32c   : > { %v6789_v55 = vld [vmem:[%s7241_s29 + $0xd5c] sm:$0xf]  ;;  %v5780_v7 = vor.u32 %v6725_v54, %v5777_v49  ;;  %4138 = vmatpush.bf16.msrb.mxu0 %v5524_v59  ;;  %v785_v49 = vperm.slane %v8268_v58, 5 }
 0x32d   : > { %v6033_v56 = vld [vmem:[%s7241_s29 + $0xd78] sm:$0xf0] }
 0x32e   : > { %v6853_v57 = vld [vmem:[%s7241_s29 + $0xf5c] sm:$0xf]  ;;  %v6036_v60 = vor.u32 %v6789_v55, %v6033_v56  ;;  %4151 = vmatpush.bf16.msrb.mxu1 %v5780_v7 }
 0x32f   : > { %v6289_v29 = vld [vmem:[%s7241_s29 + $0xf78] sm:$0xf0] }
 0x330   : > { %v6653_v1 = vld [vmem:[%s7241_s29 + $0x91c] sm:$0xf]  ;;  %v6292_v33 = vor.u32 %v6853_v57, %v6289_v29  ;;  %4164 = vmatpush.bf16.msrb.mxu2 %v6036_v60  ;;  %v3913_v60 = vpop.f32.mrf.mxu2 }
 0x331   : > { %v5489_v61 = vld [vmem:[%s7241_s29 + $0x938] sm:$0xf0] }
 0x332   : > { %v6717_v24 = vld [vmem:[%s7241_s29 + $0xb1c] sm:$0xf]  ;;  %v5492_v25 = vor.u32 %v6653_v1, %v5489_v61  ;;  %4177 = vmatpush.bf16.msrb.mxu3 %v6292_v33 }
 0x333   : > { %v5745_v63 = vld [vmem:[%s7241_s29 + $0xb38] sm:$0xf0] }
 0x334   : > { %v6781_v17 = vld [vmem:[%s7241_s29 + $0xd1c] sm:$0xf]  ;;  %v5748_v3 = vor.u32 %v6717_v24, %v5745_v63  ;;  %4139 = vmatpush.bf16.msrb.mxu0 %v5492_v25  ;;  %v3926_v63 = vpop.f32.mrf.mxu3 }
 0x335   : > { %v6001_v0 = vld [vmem:[%s7241_s29 + $0xd38] sm:$0xf0] }
 0x336   : > { %v6845_v38 = vld [vmem:[%s7241_s29 + $0xf1c] sm:$0xf]  ;;  %v6004_v4 = vor.u32 %v6781_v17, %v6001_v0  ;;  %4152 = vmatpush.bf16.msrb.mxu1 %v5748_v3 }
 0x337   : > { %v6257_v2 = vld [vmem:[%s7241_s29 + $0xf38] sm:$0xf0] }
 0x338   : > { %v6645_v5 = vld [vmem:[%s7241_s29 + $0x8dc] sm:$0xf]  ;;  %v6260_v40 = vor.u32 %v6845_v38, %v6257_v2  ;;  %4165 = vmatpush.bf16.msrb.mxu2 %v6004_v4  ;;  %v3886_v38 = vadd.f32 %v8387_v50, %v785_v49 }
 0x339   : > { %v5457_v34 = vld [vmem:[%s7241_s29 + $0x8f8] sm:$0xf0] }
 0x33a   : > { %v6709_v62 = vld [vmem:[%s7241_s29 + $0xadc] sm:$0xf]  ;;  %v5460_v14 = vor.u32 %v6645_v5, %v5457_v34  ;;  %4178 = vmatpush.bf16.msrb.mxu3 %v6260_v40  ;;  %v3899_v5 = vadd.f32 %v8392_v8, %v3886_v38 }
 0x33b   : > { %v5713_v9 = vld [vmem:[%s7241_s29 + $0xaf8] sm:$0xf0] }
 0x33c   : > { %v6773_v10 = vld [vmem:[%s7241_s29 + $0xcdc] sm:$0xf]  ;;  %v5716_v15 = vor.u32 %v6709_v62, %v5713_v9  ;;  %4140 = vmatpush.bf16.msrb.mxu0 %v5460_v14  ;;  %v3912_v34 = vadd.f32 %v3911_v6, %v3899_v5  ;;  %v3937_v62 = vpop.f32.mrf.mxu0  ;;  %v3950_v9 = vpop.f32.mrf.mxu1 }
 0x33d   : > { %v5969_v11 = vld [vmem:[%s7241_s29 + $0xcf8] sm:$0xf0] }
 0x33e   : > { %v6837_v13 = vld [vmem:[%s7241_s29 + $0xedc] sm:$0xf]  ;;  %v5972_v19 = vor.u32 %v6773_v10, %v5969_v11  ;;  %4153 = vmatpush.bf16.msrb.mxu1 %v5716_v15  ;;  %v3925_v50 = vadd.f32 %v3924_v12, %v3912_v34  ;;  %v3963_v11 = vpop.f32.mrf.mxu2 }
 0x33f   : > { %v6225_v44 = vld [vmem:[%s7241_s29 + $0xef8] sm:$0xf0] }
 0x340   : > { %v6637_v20 = vld [vmem:[%s7241_s29 + $0x89c] sm:$0xf]  ;;  %v6228_v26 = vor.u32 %v6837_v13, %v6225_v44  ;;  %4166 = vmatpush.bf16.msrb.mxu2 %v5972_v19  ;;  %v3938_v40 = vadd.f32 %v3937_v62, %v3925_v50  ;;  %v3976_v13 = vpop.f32.mrf.mxu3 }
 0x341   : > { %v5425_v21 = vld [vmem:[%s7241_s29 + $0x8b8] sm:$0xf0] }
 0x342   : > { %v6701_v22 = vld [vmem:[%s7241_s29 + $0xa9c] sm:$0xf]  ;;  %v5428_v32 = vor.u32 %v6637_v20, %v5425_v21  ;;  %4179 = vmatpush.bf16.msrb.mxu3 %v6228_v26  ;;  %v3951_v10 = vadd.f32 %v3950_v9, %v3938_v40  ;;  %v786_v26 = vperm.slane %v8268_v58, 6 }
 0x343   : > { %v5681_v27 = vld [vmem:[%s7241_s29 + $0xab8] sm:$0xf0] }
 0x344   : > { %v6765_v28 = vld [vmem:[%s7241_s29 + $0xc9c] sm:$0xf]  ;;  %v5684_v36 = vor.u32 %v6701_v22, %v5681_v27  ;;  %4141 = vmatpush.bf16.msrb.mxu0 %v5428_v32  ;;  %v3964_v8 = vadd.f32 %v3963_v11, %v3951_v10  ;;  %v3939_v14 = vpop.f32.mrf.mxu0  ;;  %v3952_v15 = vpop.f32.mrf.mxu1 }
 0x345   : > { %v5937_v39 = vld [vmem:[%s7241_s29 + $0xcb8] sm:$0xf0] }
 0x346   : > { %v6829_v30 = vld [vmem:[%s7241_s29 + $0xe9c] sm:$0xf]  ;;  %v5940_v37 = vor.u32 %v6765_v28, %v5937_v39  ;;  %4154 = vmatpush.bf16.msrb.mxu1 %v5684_v36  ;;  %v3977_v44 = vadd.f32 %v3976_v13, %v3964_v8 }
 0x347   : > { %v6193_v31 = vld [vmem:[%s7241_s29 + $0xeb8] sm:$0xf0] }
 0x348   : > { %v6629_v41 = vld [vmem:[%s7241_s29 + $0x85c] sm:$0xf]  ;;  %v6196_v51 = vor.u32 %v6829_v30, %v6193_v31  ;;  %4167 = vmatpush.bf16.msrb.mxu2 %v5940_v37  ;;  %v4193_v19 = vmax.f32 %v3977_v44, 0.0  ;;  %v3978_v20 = vpop.f32.mrf.mxu3 }
 0x349   : > { %v5393_v43 = vld [vmem:[%s7241_s29 + $0x878] sm:$0xf0] }
 0x34a   : > { %v6693_v52 = vld [vmem:[%s7241_s29 + $0xa5c] sm:$0xf]  ;;  %v5396_v55 = vor.u32 %v6629_v41, %v5393_v43  ;;  %4180 = vmatpush.bf16.msrb.mxu3 %v6196_v51  ;;  %4201 = vst [vmem:[#allocation8 + $0x28] sm:$0xff] %v4193_v19 }
 0x34b   : > { %v5649_v16 = vld [vmem:[%s7241_s29 + $0xa78] sm:$0xf0] }
 0x34c   : > { %v6757_v18 = vld [vmem:[%s7241_s29 + $0xc5c] sm:$0xf]  ;;  %v5652_v56 = vor.u32 %v6693_v52, %v5649_v16  ;;  %4142 = vmatpush.bf16.msrb.mxu0 %v5396_v55  ;;  %v4002_v21 = vpop.f32.mrf.mxu1 }
 0x34d   : > { %v5905_v53 = vld [vmem:[%s7241_s29 + $0xc78] sm:$0xf0] }
 0x34e   : > { %v6821_v54 = vld [vmem:[%s7241_s29 + $0xe5c] sm:$0xf]  ;;  %v5908_v57 = vor.u32 %v6757_v18, %v5905_v53  ;;  %4155 = vmatpush.bf16.msrb.mxu1 %v5652_v56 }
 0x34f   : > { %v6161_v23 = vld [vmem:[%s7241_s29 + $0xe78] sm:$0xf0] }
 0x350   : > { %v6621_v29 = vld [vmem:[%s7241_s29 + $0x81c] sm:$0xf]  ;;  %v6164_v1 = vor.u32 %v6821_v54, %v6161_v23  ;;  %4168 = vmatpush.bf16.msrb.mxu2 %v5908_v57  ;;  %v4028_v22 = vpop.f32.mrf.mxu3 }
 0x351   : > { %v5361_v59 = vld [vmem:[%s7241_s29 + $0x838] sm:$0xf0] }
 0x352   : > { %v6685_v7 = vld [vmem:[%s7241_s29 + $0xa1c] sm:$0xf]  ;;  %v5364_v2 = vor.u32 %v6621_v29, %v5361_v59  ;;  %4181 = vmatpush.bf16.msrb.mxu3 %v6164_v1  ;;  %v787_v59 = vperm.slane %v8268_v58, 7 }
 0x353   : > { %v5617_v61 = vld [vmem:[%s7241_s29 + $0xa38] sm:$0xf0] }
 0x354   : > { %v6749_v24 = vld [vmem:[%s7241_s29 + $0xc1c] sm:$0xf]  ;;  %v5620_v25 = vor.u32 %v6685_v7, %v5617_v61  ;;  %4143 = vmatpush.bf16.msrb.mxu0 %v5364_v2  ;;  %v4004_v6 = vpop.f32.mrf.mxu1 }
 0x355   : > { %v5873_v33 = vld [vmem:[%s7241_s29 + $0xc38] sm:$0xf0] }
 0x356   : > { %v6813_v17 = vld [vmem:[%s7241_s29 + $0xe1c] sm:$0xf]  ;;  %v5876_v3 = vor.u32 %v6749_v24, %v5873_v33  ;;  %4156 = vmatpush.bf16.msrb.mxu1 %v5620_v25 }
 0x357   : > { %v6129_v0 = vld [vmem:[%s7241_s29 + $0xe38] sm:$0xf0]  ;;  %4144 = vmatmul.bf16.vlgmr.msrb.gmra.mxu0 %v7409_v45  ;;  %v3965_v45 = vpop.f32.mrf.mxu2 }
 0x358   : > { %v6132_v4 = vor.u32 %v6813_v17, %v6129_v0  ;;  %4169 = vmatpush.bf16.msrb.mxu2 %v5876_v3  ;;  %v4030_v28 = vpop.f32.mrf.mxu3 }
 0x359   : > { %4157 = vmatmul.bf16.vlgmr.msrb.gmra.mxu1 %v7413_v48  ;;  %v3989_v48 = vpop.f32.mrf.mxu0 }
 0x35a   : > { %4182 = vmatpush.bf16.msrb.mxu3 %v6132_v4  ;;  %v3990_v39 = vadd.f32 %v3989_v48, %v786_v26 }
 0x35b   : > { %4170 = vmatmul.bf16.vlgmr.msrb.gmra.mxu2 %v7405_v42 }
 0x35c   : > { %v4003_v12 = vadd.f32 %v4002_v21, %v3990_v39 }
 0x35d   : > { %4183 = vmatmul.bf16.vlgmr.msrb.gmra.mxu3 %v7411_v46 }
 0x35f   : > { %v4015_v42 = vpop.f32.mrf.mxu2 }
 0x360   : > { %v4016_v30 = vadd.f32 %v4015_v42, %v4003_v12 }
 0x361   : > { %v3991_v46 = vpop.f32.mrf.mxu0 }
 0x362   : > { %v4029_v31 = vadd.f32 %v4028_v22, %v4016_v30 }
 0x367   : > { %v4017_v27 = vpop.f32.mrf.mxu2 }
 0x376   : > { %v4041_v32 = vpop.f32.mrf.mxu0 }
 0x377   : > { %v4042_v35 = vadd.f32 %v4041_v32, %v4029_v31 }
 0x378   : > { %v4054_v36 = vpop.f32.mrf.mxu1 }
 0x379   : > { %v4055_v37 = vadd.f32 %v4054_v36, %v4042_v35 }
 0x37e   : > { %v4043_v51 = vpop.f32.mrf.mxu0 }
 0x380   : > { %v4067_v41 = vpop.f32.mrf.mxu2  ;;  %v4056_v16 = vpop.f32.mrf.mxu1 }
 0x381   : > { %v4068_v43 = vadd.f32 %v4067_v41, %v4055_v37 }
 0x382   : > { %v4080_v52 = vpop.f32.mrf.mxu3 }
 0x383   : > { %v4081_v47 = vadd.f32 %v4080_v52, %v4068_v43 }
 0x385   : > { %v4194_v18 = vmax.f32 %v4081_v47, 0.0 }
 0x387   : > { %4202 = vst [vmem:[#allocation8 + $0x30] sm:$0xff] %v4194_v18 }
 0x388   : > { %v4069_v53 = vpop.f32.mrf.mxu2 }
 0x38a   : > { %v4082_v54 = vpop.f32.mrf.mxu3 }
 0x396   : > { %v4093_v23 = vpop.f32.mrf.mxu0 }
 0x397   : > { %v4094_v1 = vadd.f32 %v4093_v23, %v787_v59 }
 0x398   : > { %v4106_v49 = vpop.f32.mrf.mxu1 }
 0x399   : > { %v4107_v61 = vadd.f32 %v4106_v49, %v4094_v1 }
 0x39e   : > { %v4095_v57 = vpop.f32.mrf.mxu0 }
 0x3a0   : > { %v4119_v55 = vpop.f32.mrf.mxu2  ;;  %v4108_v29 = vpop.f32.mrf.mxu1 }
 0x3a1   : > { %v4120_v24 = vadd.f32 %v4119_v55, %v4107_v61 }
 0x3a2   : > { %v4132_v56 = vpop.f32.mrf.mxu3 }
 0x3a3   : > { %v4133_v33 = vadd.f32 %v4132_v56, %v4120_v24 }
 0x3a8   : > { %v4121_v7 = vpop.f32.mrf.mxu2 }
 0x3aa   : > { %v4134_v60 = vpop.f32.mrf.mxu3 }
 0x3d4   : > { %v4145_v63 = vpop.f32.mrf.mxu0 }
 0x3d5   : > { %v4146_v0 = vadd.f32 %v4145_v63, %v4133_v33 }
 0x3d6   : > { %v4158_v17 = vpop.f32.mrf.mxu1 }
 0x3d7   : > { %v4159_v38 = vadd.f32 %v4158_v17, %v4146_v0 }
 0x3dc   : > { %v4147_v4 = vpop.f32.mrf.mxu0 }
 0x3de   : > { %v4171_v2 = vpop.f32.mrf.mxu2  ;;  %v4160_v5 = vpop.f32.mrf.mxu1 }
 0x3df   : > { %v4172_v25 = vadd.f32 %v4171_v2, %v4159_v38 }
 0x3e0   : > { %v4184_v3 = vpop.f32.mrf.mxu3 }
 0x3e1   : > { %v4185_v58 = vadd.f32 %v4184_v3, %v4172_v25 }
 0x3e3   : > { %v4195_v34 = vmax.f32 %v4185_v58, 0.0 }
 0x3e5   : > { %4203 = vst [vmem:[#allocation8 + $0x38] sm:$0xff] %v4195_v34 }
 0x3e6   : > { %v4173_v50 = vpop.f32.mrf.mxu2  ;;  %6883 = dma.vmem_to_hbm [thread:$0]  (%p6900_p5), %s4211_s26, 1024, %s4213_s7, [#allocation4]  }
 0x3e8   : > { %v4186_v62 = vpop.f32.mrf.mxu3 }
 0x3e9   : > { %7083 = dma.done.wait (%p6900_p5), [#allocation4], 1024  }
 0x3ea   : > { %7085 = vsyncadd (%p6900_p5), [#allocation4], 4294966272 }
 0x3eb PF: > { %p15_p7 = scmp.ge.s32.totalorder %s7147_s16, 6   ;;  %s8456_s12 = smov %s7092_s13 }
 0x3ec   : > { %s8457_s13 = smov %s7096_s14  ;;  %s8458_s14 = smov %s7157_s19 }
 0x3ed   : > { %s8459_s15 = smov %s7147_s16  ;;  %17 = sbr.rel (!%p15_p7) target bundleno = 5 (0x5), region = 89 }
 0x3f2   :  { %4226 = vsyncpa [#allocation3], 1 }
 0x3f3   :  { %4228 = vsyncpa [#allocation3 + $0x1], 1 }
 0x3f4   :  { %4229 = vsyncpa [#allocation6], 1 }
 0x3f5   :  { %4231 = vsyncpa [#allocation6 + $0x1], 1 }
 0x3f6   :  { %4232 = vsyncpa [#allocation4], 1 }
 0x3f7   :  { %4234 = vsyncpa [#allocation4 + $0x1], 1 }

</bundles_post_ra>
